<compile_context>
chip_gen: v5e
topology: v5e:2x2
jax: 0.10.0
libtpu: 0.0.40
codegen_flags: <defaults>
</compile_context>

<pallas_src>
import math

import jax
import jax.numpy as jnp
from jax.experimental import pallas as pl
from jax.experimental.pallas import tpu as pltpu

OUT = 128          # attention output width (fixed by the module)
LN_EPS = 1e-5      # nn.LayerNorm default eps

N_LAYERS = 3       # Attention(in,128,True) x3
A_PER = 9          # params per Attention layer
L_PER = 9          # params for Last_Atten
H_PER = 10         # params for heads (incl. one-hot lane mask)


def _bf16(a):
    return a.astype(jnp.bfloat16)


def _mm(a, b):
    # bf16 MXU inputs, f32 accumulation
    return jnp.dot(_bf16(a), _bf16(b), preferred_element_type=jnp.float32)


# --------------------------------------------------------------------------
# In-kernel building blocks (operate on values already loaded from VMEM refs)
# --------------------------------------------------------------------------
def _attn_block(x, wq, wk, wv, g, beta, w1, b1, w2, b2):
    """Attention(in_size, 128, if_res=True) on batch-major x: (TB, S, D) -> (TB, S, 128)."""
    tb, s, d = x.shape
    x2 = x.reshape(tb * s, d)                                    # 2-D matmuls fill the MXU
    q = _mm(x2, wq).reshape(tb, s, OUT)
    k = _mm(x2, wk).reshape(tb, s, OUT)
    v = _mm(x2, wv).reshape(tb, s, OUT)
    scale = 1.0 / math.sqrt(OUT)
    sc = jnp.einsum('bqf,bkf->bqk', _bf16(q * scale), _bf16(k),
                    preferred_element_type=jnp.float32)          # (TB, S, S)
    sc = sc - jnp.max(sc, axis=-1, keepdims=True)
    e = jnp.exp(sc)
    attn = e * pl.reciprocal(jnp.sum(e, axis=-1, keepdims=True), approx=True)
    res = jnp.einsum('bqk,bkf->bqf', _bf16(attn), _bf16(v),
                     preferred_element_type=jnp.float32)         # (TB, S, OUT)
    mu = jnp.mean(res, axis=-1, keepdims=True)
    var = jnp.mean((res - mu) ** 2, axis=-1, keepdims=True)
    ln = (res - mu) * jax.lax.rsqrt(var + LN_EPS) * g + beta
    h = jnp.maximum(_mm(ln.reshape(tb * s, OUT), w1) + b1, 0.0)
    out = (_mm(h, w2) + b2).reshape(tb, s, OUT)
    return out + res                                             # if_res=True


def _last_block(x, q_col, wk, wv, g, beta, w1, b1, w2, b2):
    """Last_Atten(128, 128): (TB, S, 128) -> (TB, 128)."""
    tb, s, _ = x.shape
    x2 = x.reshape(tb * s, OUT)
    k = _mm(x2, wk)                                              # (TB*S, OUT)
    v = _mm(x2, wv).reshape(tb, s, OUT)
    scale = 1.0 / math.sqrt(OUT)
    sc = _mm(k, q_col * scale).reshape(tb, s, 1)                 # MXU matvec, not VPU*XLU reduce
    sc = sc - jnp.max(sc, axis=1, keepdims=True)
    e = jnp.exp(sc)
    attn = e * pl.reciprocal(jnp.sum(e, axis=1, keepdims=True), approx=True)
    pooled = jnp.sum(attn * v, axis=1)                           # (TB, OUT)
    mu = jnp.mean(pooled, axis=-1, keepdims=True)
    var = jnp.mean((pooled - mu) ** 2, axis=-1, keepdims=True)
    ln = (pooled - mu) * jax.lax.rsqrt(var + LN_EPS) * g + beta
    h = jnp.maximum(_mm(ln, w1) + b1, 0.0)
    return _mm(h, w2) + b2                                       # (TB, OUT)


def _head_block(x, wp1, bp1, alpha, wp2, bp2, wr1, br1, wr2, br2, mask):
    """posibility + rul heads -> lane-dense (TB, slab) slab (possibility in lane 0)."""
    h = _mm(x, wp1) + bp1
    h = jnp.maximum(h, 0.0) + alpha * jnp.minimum(h, 0.0)        # PReLU (single alpha)
    pos = jax.nn.sigmoid(_mm(h, wp2) + bp2)                      # (TB, slab); only lane 0 meaningful
    r = jnp.maximum(_mm(x, wr1) + br1, 0.0)
    r = jnp.maximum(_mm(r, wr2) + br2, 0.0)                      # (TB, slab); lane 0 is exactly 0
    return pos * mask + r                                        # one full-width unmasked store


def _fused_kernel(x_ref, *refs):
    o_ref = refs[-1]
    prm = [r[...] for r in refs[:-1]]                            # all weights resident in VMEM
    x = x_ref[...]                                               # (TB, S, Din) batch-major f32
    i = 0
    for _ in range(N_LAYERS):
        x = _attn_block(x, *prm[i:i + A_PER])
        i += A_PER
    feat = _last_block(x, *prm[i:i + L_PER])
    i += L_PER
    o_ref[...] = _head_block(feat, *prm[i:i + H_PER])


# --------------------------------------------------------------------------
# Wrapper: one fused pallas_call, batch-parallel grid
# --------------------------------------------------------------------------
def _pick_tb(B, S):
    if B % 8 != 0 or B <= 8:
        return B
    target = max(8, -(-256 // S))       # aim for >= 256 matmul rows per grid step
    tb = 8
    for cand in range(8, B + 1, 8):
        if B % cand == 0:
            tb = cand
            if cand >= target:
                break
    return tb


def bilstm_forward(x_sbd, params):
    # x_sbd: (seq, batch, in_size) -- same convention as the PyTorch module.
    S, B, DIN = x_sbd.shape
    x = jnp.transpose(x_sbd, (1, 0, 2))                          # (B, S, Din), fused under jit

    hd = params['head']
    rul_size = hd['wr2'].shape[1]
    slab = max(OUT, ((1 + rul_size + 127) // 128) * 128)         # lane-dense output width

    # Pad head weights so the kernel writes a single lane-dense slab:
    #   lane 0            -> possibility (sigmoid head)
    #   lanes 1..rul_size -> RUL head, lanes beyond rul_size are ReLU(0) = 0
    wp2 = jnp.pad(hd['wp2'], ((0, 0), (0, slab - 1)))
    bp2 = jnp.pad(hd['bp2'], ((0, 0), (0, slab - 1)))
    wr2 = jnp.pad(hd['wr2'], ((0, 0), (1, slab - 1 - rul_size)))
    br2 = jnp.pad(hd['br2'], ((0, 0), (1, slab - 1 - rul_size)))
    mask = jnp.zeros((1, slab), jnp.float32).at[0, 0].set(1.0)

    last = params['last']
    flat = [x]
    for lp in params['atten_layers']:
        flat += [lp['wq'], lp['wk'], lp['wv'], lp['ln_g'], lp['ln_b'],
                 lp['w1'], lp['b1'], lp['w2'], lp['b2']]
    flat += [last['q'].reshape(OUT, 1), last['wk'], last['wv'], last['ln_g'],
             last['ln_b'], last['w1'], last['b1'], last['w2'], last['b2']]
    flat += [hd['wp1'], hd['bp1'], hd['alpha'], wp2, bp2,
             hd['wr1'], hd['br1'], wr2, br2, mask]

    TB = _pick_tb(B, S)
    grid = (B // TB,)

    in_specs = [pl.BlockSpec((TB, S, DIN), lambda b: (b, 0, 0))]
    in_specs += [pl.BlockSpec(a.shape, lambda b: (0, 0)) for a in flat[1:]]
    out_spec = pl.BlockSpec((TB, slab), lambda b: (b, 0))

    out = pl.pallas_call(
        _fused_kernel,
        out_shape=jax.ShapeDtypeStruct((B, slab), jnp.float32),
        grid=grid,
        in_specs=in_specs,
        out_specs=out_spec,
        compiler_params=pltpu.CompilerParams(
            dimension_semantics=("parallel",)),
    )(*flat)
    return out[:, :1 + rul_size]                                 # torch.cat([posibility, rul], 1)


# --------------------------------------------------------------------------
# Parameter init (deterministic, PyTorch-like uniform(-1/sqrt(fan_in), ...))
# --------------------------------------------------------------------------
def init_params(key, in_size, rul_size):
    keys = iter(jax.random.split(key, 40))

    def lin(fan_in, shape):
        bound = 1.0 / math.sqrt(fan_in)
        return jax.random.uniform(next(keys), shape, jnp.float32, -bound, bound)

    def attn_p(din):
        return dict(
            wq=lin(din, (din, OUT)), wk=lin(din, (din, OUT)), wv=lin(din, (din, OUT)),
            ln_g=jnp.ones((1, OUT), jnp.float32), ln_b=jnp.zeros((1, OUT), jnp.float32),
            w1=lin(OUT, (OUT, OUT)), b1=lin(OUT, (1, OUT)),
            w2=lin(OUT, (OUT, OUT)), b2=lin(OUT, (1, OUT)),
        )

    return dict(
        atten_layers=[attn_p(in_size), attn_p(OUT), attn_p(OUT)],
        last=dict(
            q=lin(OUT, (1, OUT)),
            wk=lin(OUT, (OUT, OUT)), wv=lin(OUT, (OUT, OUT)),
            ln_g=jnp.ones((1, OUT), jnp.float32), ln_b=jnp.zeros((1, OUT), jnp.float32),
            w1=lin(OUT, (OUT, OUT)), b1=lin(OUT, (1, OUT)),
            w2=lin(OUT, (OUT, OUT)), b2=lin(OUT, (1, OUT)),
        ),
        head=dict(
            wp1=lin(OUT, (OUT, 64)), bp1=lin(OUT, (1, 64)),
            alpha=jnp.full((1, 1), 0.25, jnp.float32),           # PReLU default
            wp2=lin(64, (64, 1)), bp2=lin(64, (1, 1)),
            wr1=lin(OUT, (OUT, OUT)), br1=lin(OUT, (1, OUT)),
            wr2=lin(OUT, (OUT, rul_size)), br2=lin(OUT, (1, rul_size)),
        ),
    )


# --------------------------------------------------------------------------
# Pure-JAX reference (same params, same bf16-at-matmul numerics)
# --------------------------------------------------------------------------
def _ref_mm(a, b):
    return jnp.dot(a.astype(jnp.bfloat16), b.astype(jnp.bfloat16),
                   preferred_element_type=jnp.float32)


def _ref_attention(x, p):
    B_, S_, D_ = x.shape
    x2 = x.reshape(-1, D_)
    q = _ref_mm(x2, p['wq']).reshape(B_, S_, OUT)
    k = _ref_mm(x2, p['wk']).reshape(B_, S_, OUT)
    v = _ref_mm(x2, p['wv']).reshape(B_, S_, OUT)
    scale = 1.0 / math.sqrt(OUT)
    s = jnp.einsum('bqf,bkf->bqk', (q * scale).astype(jnp.bfloat16),
                   k.astype(jnp.bfloat16), preferred_element_type=jnp.float32)
    attn = jax.nn.softmax(s, axis=-1)
    res = jnp.einsum('bqk,bkf->bqf', attn.astype(jnp.bfloat16),
                     v.astype(jnp.bfloat16), preferred_element_type=jnp.float32)
    mu = res.mean(-1, keepdims=True)
    var = ((res - mu) ** 2).mean(-1, keepdims=True)
    ln = (res - mu) / jnp.sqrt(var + LN_EPS) * p['ln_g'] + p['ln_b']
    h = jnp.maximum(_ref_mm(ln.reshape(-1, OUT), p['w1']) + p['b1'], 0.0)
    out = (_ref_mm(h, p['w2']) + p['b2']).reshape(B_, S_, OUT)
    return out + res


def _ref_forward(x_sbd, params):
    x = jnp.transpose(x_sbd, (1, 0, 2))
    for lp in params['atten_layers']:
        x = _ref_attention(x, lp)
    B_, S_, _ = x.shape
    lp = params['last']
    x2 = x.reshape(-1, OUT)
    k = _ref_mm(x2, lp['wk'])
    v = _ref_mm(x2, lp['wv']).reshape(B_, S_, OUT)
    scale = 1.0 / math.sqrt(OUT)
    s = _ref_mm(k, (lp['q'] * scale).reshape(OUT, 1)).reshape(B_, S_)
    attn = jax.nn.softmax(s, axis=-1)
    pooled = jnp.einsum('bs,bsf->bf', attn, v)
    mu = pooled.mean(-1, keepdims=True)
    var = ((pooled - mu) ** 2).mean(-1, keepdims=True)
    ln = (pooled - mu) / jnp.sqrt(var + LN_EPS) * lp['ln_g'] + lp['ln_b']
    h = jnp.maximum(_ref_mm(ln, lp['w1']) + lp['b1'], 0.0)
    feat = _ref_mm(h, lp['w2']) + lp['b2']
    hp = params['head']
    t = _ref_mm(feat, hp['wp1']) + hp['bp1']
    t = jnp.maximum(t, 0.0) + hp['alpha'] * jnp.minimum(t, 0.0)
    p = jax.nn.sigmoid(_ref_mm(t, hp['wp2']) + hp['bp2'])
    r = jnp.maximum(_ref_mm(feat, hp['wr1']) + hp['br1'], 0.0)
    r = jnp.maximum(_ref_mm(r, hp['wr2']) + hp['br2'], 0.0)
    return jnp.concatenate([p, r], axis=1)


if __name__ == "__main__":
    SEQ, BATCH, IN_SIZE, HIDDEN, RUL = 8, 2, 16, 32, 4   # hidden_size unused by forward
    key = jax.random.PRNGKey(0)
    kx, kp = jax.random.split(key)
    x = jax.random.normal(kx, (SEQ, BATCH, IN_SIZE), jnp.float32)
    params = init_params(kp, IN_SIZE, RUL)

    fwd = jax.jit(bilstm_forward)
    out = jax.block_until_ready(fwd(x, params))
    assert out.shape == (BATCH, 1 + RUL), out.shape

    ref = jax.block_until_ready(_ref_forward(x, params))
    max_err = float(jnp.max(jnp.abs(out - ref)))
    # 2e-2 covers bf16 matmul rounding-order + approx-reciprocal differences.
    assert max_err < 2e-2, f"mismatch vs reference: {max_err}"

    print("KERNEL_OK")
</pallas_src>

<mosaic_0001>
module attributes {stable_mosaic.version = 11 : i64} {
  func.func @_fused_kernel(%arg0: i32, %arg1: memref<2x8x16xf32, #tpu.memory_space<vmem>>, %arg2: memref<16x128xf32, #tpu.memory_space<vmem>>, %arg3: memref<16x128xf32, #tpu.memory_space<vmem>>, %arg4: memref<16x128xf32, #tpu.memory_space<vmem>>, %arg5: memref<1x128xf32, #tpu.memory_space<vmem>>, %arg6: memref<1x128xf32, #tpu.memory_space<vmem>>, %arg7: memref<128x128xf32, #tpu.memory_space<vmem>>, %arg8: memref<1x128xf32, #tpu.memory_space<vmem>>, %arg9: memref<128x128xf32, #tpu.memory_space<vmem>>, %arg10: memref<1x128xf32, #tpu.memory_space<vmem>>, %arg11: memref<128x128xf32, #tpu.memory_space<vmem>>, %arg12: memref<128x128xf32, #tpu.memory_space<vmem>>, %arg13: memref<128x128xf32, #tpu.memory_space<vmem>>, %arg14: memref<1x128xf32, #tpu.memory_space<vmem>>, %arg15: memref<1x128xf32, #tpu.memory_space<vmem>>, %arg16: memref<128x128xf32, #tpu.memory_space<vmem>>, %arg17: memref<1x128xf32, #tpu.memory_space<vmem>>, %arg18: memref<128x128xf32, #tpu.memory_space<vmem>>, %arg19: memref<1x128xf32, #tpu.memory_space<vmem>>, %arg20: memref<128x128xf32, #tpu.memory_space<vmem>>, %arg21: memref<128x128xf32, #tpu.memory_space<vmem>>, %arg22: memref<128x128xf32, #tpu.memory_space<vmem>>, %arg23: memref<1x128xf32, #tpu.memory_space<vmem>>, %arg24: memref<1x128xf32, #tpu.memory_space<vmem>>, %arg25: memref<128x128xf32, #tpu.memory_space<vmem>>, %arg26: memref<1x128xf32, #tpu.memory_space<vmem>>, %arg27: memref<128x128xf32, #tpu.memory_space<vmem>>, %arg28: memref<1x128xf32, #tpu.memory_space<vmem>>, %arg29: memref<128x1xf32, #tpu.memory_space<vmem>>, %arg30: memref<128x128xf32, #tpu.memory_space<vmem>>, %arg31: memref<128x128xf32, #tpu.memory_space<vmem>>, %arg32: memref<1x128xf32, #tpu.memory_space<vmem>>, %arg33: memref<1x128xf32, #tpu.memory_space<vmem>>, %arg34: memref<128x128xf32, #tpu.memory_space<vmem>>, %arg35: memref<1x128xf32, #tpu.memory_space<vmem>>, %arg36: memref<128x128xf32, #tpu.memory_space<vmem>>, %arg37: memref<1x128xf32, #tpu.memory_space<vmem>>, %arg38: memref<128x64xf32, #tpu.memory_space<vmem>>, %arg39: memref<1x64xf32, #tpu.memory_space<vmem>>, %arg40: memref<1x1xf32, #tpu.memory_space<vmem>>, %arg41: memref<64x128xf32, #tpu.memory_space<vmem>>, %arg42: memref<1x128xf32, #tpu.memory_space<vmem>>, %arg43: memref<128x128xf32, #tpu.memory_space<vmem>>, %arg44: memref<1x128xf32, #tpu.memory_space<vmem>>, %arg45: memref<128x128xf32, #tpu.memory_space<vmem>>, %arg46: memref<1x128xf32, #tpu.memory_space<vmem>>, %arg47: memref<1x128xf32, #tpu.memory_space<vmem>>, %arg48: memref<2x128xf32, #tpu.memory_space<vmem>>) attributes {dimension_semantics = [#tpu.dimension_semantics<parallel>], iteration_bounds = array<i64: 1>, scalar_prefetch = 0 : i64, scratch_operands = 0 : i64, tpu.core_type = #tpu.core_type<tc>, window_params = [{transform_indices = @transform_0, window_bounds = array<i64: 2, 8, 16>}, {pipeline_mode = #tpu.pipeline_mode<synchronous>, transform_indices = @transform_1, window_bounds = array<i64: 16, 128>}, {pipeline_mode = #tpu.pipeline_mode<synchronous>, transform_indices = @transform_2, window_bounds = array<i64: 16, 128>}, {pipeline_mode = #tpu.pipeline_mode<synchronous>, transform_indices = @transform_3, window_bounds = array<i64: 16, 128>}, {pipeline_mode = #tpu.pipeline_mode<synchronous>, transform_indices = @transform_4, window_bounds = array<i64: 1, 128>}, {pipeline_mode = #tpu.pipeline_mode<synchronous>, transform_indices = @transform_5, window_bounds = array<i64: 1, 128>}, {pipeline_mode = #tpu.pipeline_mode<synchronous>, transform_indices = @transform_6, window_bounds = array<i64: 128, 128>}, {pipeline_mode = #tpu.pipeline_mode<synchronous>, transform_indices = @transform_7, window_bounds = array<i64: 1, 128>}, {pipeline_mode = #tpu.pipeline_mode<synchronous>, transform_indices = @transform_8, window_bounds = array<i64: 128, 128>}, {pipeline_mode = #tpu.pipeline_mode<synchronous>, transform_indices = @transform_9, window_bounds = array<i64: 1, 128>}, {pipeline_mode = #tpu.pipeline_mode<synchronous>, transform_indices = @transform_10, window_bounds = array<i64: 128, 128>}, {pipeline_mode = #tpu.pipeline_mode<synchronous>, transform_indices = @transform_11, window_bounds = array<i64: 128, 128>}, {pipeline_mode = #tpu.pipeline_mode<synchronous>, transform_indices = @transform_12, window_bounds = array<i64: 128, 128>}, {pipeline_mode = #tpu.pipeline_mode<synchronous>, transform_indices = @transform_13, window_bounds = array<i64: 1, 128>}, {pipeline_mode = #tpu.pipeline_mode<synchronous>, transform_indices = @transform_14, window_bounds = array<i64: 1, 128>}, {pipeline_mode = #tpu.pipeline_mode<synchronous>, transform_indices = @transform_15, window_bounds = array<i64: 128, 128>}, {pipeline_mode = #tpu.pipeline_mode<synchronous>, transform_indices = @transform_16, window_bounds = array<i64: 1, 128>}, {pipeline_mode = #tpu.pipeline_mode<synchronous>, transform_indices = @transform_17, window_bounds = array<i64: 128, 128>}, {pipeline_mode = #tpu.pipeline_mode<synchronous>, transform_indices = @transform_18, window_bounds = array<i64: 1, 128>}, {pipeline_mode = #tpu.pipeline_mode<synchronous>, transform_indices = @transform_19, window_bounds = array<i64: 128, 128>}, {pipeline_mode = #tpu.pipeline_mode<synchronous>, transform_indices = @transform_20, window_bounds = array<i64: 128, 128>}, {pipeline_mode = #tpu.pipeline_mode<synchronous>, transform_indices = @transform_21, window_bounds = array<i64: 128, 128>}, {pipeline_mode = #tpu.pipeline_mode<synchronous>, transform_indices = @transform_22, window_bounds = array<i64: 1, 128>}, {pipeline_mode = #tpu.pipeline_mode<synchronous>, transform_indices = @transform_23, window_bounds = array<i64: 1, 128>}, {pipeline_mode = #tpu.pipeline_mode<synchronous>, transform_indices = @transform_24, window_bounds = array<i64: 128, 128>}, {pipeline_mode = #tpu.pipeline_mode<synchronous>, transform_indices = @transform_25, window_bounds = array<i64: 1, 128>}, {pipeline_mode = #tpu.pipeline_mode<synchronous>, transform_indices = @transform_26, window_bounds = array<i64: 128, 128>}, {pipeline_mode = #tpu.pipeline_mode<synchronous>, transform_indices = @transform_27, window_bounds = array<i64: 1, 128>}, {pipeline_mode = #tpu.pipeline_mode<synchronous>, transform_indices = @transform_28, window_bounds = array<i64: 128, 1>}, {pipeline_mode = #tpu.pipeline_mode<synchronous>, transform_indices = @transform_29, window_bounds = array<i64: 128, 128>}, {pipeline_mode = #tpu.pipeline_mode<synchronous>, transform_indices = @transform_30, window_bounds = array<i64: 128, 128>}, {pipeline_mode = #tpu.pipeline_mode<synchronous>, transform_indices = @transform_31, window_bounds = array<i64: 1, 128>}, {pipeline_mode = #tpu.pipeline_mode<synchronous>, transform_indices = @transform_32, window_bounds = array<i64: 1, 128>}, {pipeline_mode = #tpu.pipeline_mode<synchronous>, transform_indices = @transform_33, window_bounds = array<i64: 128, 128>}, {pipeline_mode = #tpu.pipeline_mode<synchronous>, transform_indices = @transform_34, window_bounds = array<i64: 1, 128>}, {pipeline_mode = #tpu.pipeline_mode<synchronous>, transform_indices = @transform_35, window_bounds = array<i64: 128, 128>}, {pipeline_mode = #tpu.pipeline_mode<synchronous>, transform_indices = @transform_36, window_bounds = array<i64: 1, 128>}, {pipeline_mode = #tpu.pipeline_mode<synchronous>, transform_indices = @transform_37, window_bounds = array<i64: 128, 64>}, {pipeline_mode = #tpu.pipeline_mode<synchronous>, transform_indices = @transform_38, window_bounds = array<i64: 1, 64>}, {pipeline_mode = #tpu.pipeline_mode<synchronous>, transform_indices = @transform_39, window_bounds = array<i64: 1, 1>}, {pipeline_mode = #tpu.pipeline_mode<synchronous>, transform_indices = @transform_40, window_bounds = array<i64: 64, 128>}, {pipeline_mode = #tpu.pipeline_mode<synchronous>, transform_indices = @transform_41, window_bounds = array<i64: 1, 128>}, {pipeline_mode = #tpu.pipeline_mode<synchronous>, transform_indices = @transform_42, window_bounds = array<i64: 128, 128>}, {pipeline_mode = #tpu.pipeline_mode<synchronous>, transform_indices = @transform_43, window_bounds = array<i64: 1, 128>}, {pipeline_mode = #tpu.pipeline_mode<synchronous>, transform_indices = @transform_44, window_bounds = array<i64: 128, 128>}, {pipeline_mode = #tpu.pipeline_mode<synchronous>, transform_indices = @transform_45, window_bounds = array<i64: 1, 128>}, {pipeline_mode = #tpu.pipeline_mode<synchronous>, transform_indices = @transform_46, window_bounds = array<i64: 1, 128>}, {transform_indices = @transform_47, window_bounds = array<i64: 2, 128>}]} {
    %c0 = arith.constant 0 : index
    %c0_0 = arith.constant 0 : index
    %0 = vector.load %arg2[%c0, %c0_0] : memref<16x128xf32, #tpu.memory_space<vmem>>, vector<16x128xf32>
    %c0_1 = arith.constant 0 : index
    %c0_2 = arith.constant 0 : index
    %1 = vector.load %arg3[%c0_1, %c0_2] : memref<16x128xf32, #tpu.memory_space<vmem>>, vector<16x128xf32>
    %c0_3 = arith.constant 0 : index
    %c0_4 = arith.constant 0 : index
    %2 = vector.load %arg4[%c0_3, %c0_4] : memref<16x128xf32, #tpu.memory_space<vmem>>, vector<16x128xf32>
    %c0_5 = arith.constant 0 : index
    %c0_6 = arith.constant 0 : index
    %3 = vector.load %arg5[%c0_5, %c0_6] : memref<1x128xf32, #tpu.memory_space<vmem>>, vector<1x128xf32>
    %c0_7 = arith.constant 0 : index
    %c0_8 = arith.constant 0 : index
    %4 = vector.load %arg6[%c0_7, %c0_8] : memref<1x128xf32, #tpu.memory_space<vmem>>, vector<1x128xf32>
    %c0_9 = arith.constant 0 : index
    %c0_10 = arith.constant 0 : index
    %5 = vector.load %arg7[%c0_9, %c0_10] : memref<128x128xf32, #tpu.memory_space<vmem>>, vector<128x128xf32>
    %c0_11 = arith.constant 0 : index
    %c0_12 = arith.constant 0 : index
    %6 = vector.load %arg8[%c0_11, %c0_12] : memref<1x128xf32, #tpu.memory_space<vmem>>, vector<1x128xf32>
    %c0_13 = arith.constant 0 : index
    %c0_14 = arith.constant 0 : index
    %7 = vector.load %arg9[%c0_13, %c0_14] : memref<128x128xf32, #tpu.memory_space<vmem>>, vector<128x128xf32>
    %c0_15 = arith.constant 0 : index
    %c0_16 = arith.constant 0 : index
    %8 = vector.load %arg10[%c0_15, %c0_16] : memref<1x128xf32, #tpu.memory_space<vmem>>, vector<1x128xf32>
    %c0_17 = arith.constant 0 : index
    %c0_18 = arith.constant 0 : index
    %9 = vector.load %arg11[%c0_17, %c0_18] : memref<128x128xf32, #tpu.memory_space<vmem>>, vector<128x128xf32>
    %c0_19 = arith.constant 0 : index
    %c0_20 = arith.constant 0 : index
    %10 = vector.load %arg12[%c0_19, %c0_20] : memref<128x128xf32, #tpu.memory_space<vmem>>, vector<128x128xf32>
    %c0_21 = arith.constant 0 : index
    %c0_22 = arith.constant 0 : index
    %11 = vector.load %arg13[%c0_21, %c0_22] : memref<128x128xf32, #tpu.memory_space<vmem>>, vector<128x128xf32>
    %c0_23 = arith.constant 0 : index
    %c0_24 = arith.constant 0 : index
    %12 = vector.load %arg14[%c0_23, %c0_24] : memref<1x128xf32, #tpu.memory_space<vmem>>, vector<1x128xf32>
    %c0_25 = arith.constant 0 : index
    %c0_26 = arith.constant 0 : index
    %13 = vector.load %arg15[%c0_25, %c0_26] : memref<1x128xf32, #tpu.memory_space<vmem>>, vector<1x128xf32>
    %c0_27 = arith.constant 0 : index
    %c0_28 = arith.constant 0 : index
    %14 = vector.load %arg16[%c0_27, %c0_28] : memref<128x128xf32, #tpu.memory_space<vmem>>, vector<128x128xf32>
    %c0_29 = arith.constant 0 : index
    %c0_30 = arith.constant 0 : index
    %15 = vector.load %arg17[%c0_29, %c0_30] : memref<1x128xf32, #tpu.memory_space<vmem>>, vector<1x128xf32>
    %c0_31 = arith.constant 0 : index
    %c0_32 = arith.constant 0 : index
    %16 = vector.load %arg18[%c0_31, %c0_32] : memref<128x128xf32, #tpu.memory_space<vmem>>, vector<128x128xf32>
    %c0_33 = arith.constant 0 : index
    %c0_34 = arith.constant 0 : index
    %17 = vector.load %arg19[%c0_33, %c0_34] : memref<1x128xf32, #tpu.memory_space<vmem>>, vector<1x128xf32>
    %c0_35 = arith.constant 0 : index
    %c0_36 = arith.constant 0 : index
    %18 = vector.load %arg20[%c0_35, %c0_36] : memref<128x128xf32, #tpu.memory_space<vmem>>, vector<128x128xf32>
    %c0_37 = arith.constant 0 : index
    %c0_38 = arith.constant 0 : index
    %19 = vector.load %arg21[%c0_37, %c0_38] : memref<128x128xf32, #tpu.memory_space<vmem>>, vector<128x128xf32>
    %c0_39 = arith.constant 0 : index
    %c0_40 = arith.constant 0 : index
    %20 = vector.load %arg22[%c0_39, %c0_40] : memref<128x128xf32, #tpu.memory_space<vmem>>, vector<128x128xf32>
    %c0_41 = arith.constant 0 : index
    %c0_42 = arith.constant 0 : index
    %21 = vector.load %arg23[%c0_41, %c0_42] : memref<1x128xf32, #tpu.memory_space<vmem>>, vector<1x128xf32>
    %c0_43 = arith.constant 0 : index
    %c0_44 = arith.constant 0 : index
    %22 = vector.load %arg24[%c0_43, %c0_44] : memref<1x128xf32, #tpu.memory_space<vmem>>, vector<1x128xf32>
    %c0_45 = arith.constant 0 : index
    %c0_46 = arith.constant 0 : index
    %23 = vector.load %arg25[%c0_45, %c0_46] : memref<128x128xf32, #tpu.memory_space<vmem>>, vector<128x128xf32>
    %c0_47 = arith.constant 0 : index
    %c0_48 = arith.constant 0 : index
    %24 = vector.load %arg26[%c0_47, %c0_48] : memref<1x128xf32, #tpu.memory_space<vmem>>, vector<1x128xf32>
    %c0_49 = arith.constant 0 : index
    %c0_50 = arith.constant 0 : index
    %25 = vector.load %arg27[%c0_49, %c0_50] : memref<128x128xf32, #tpu.memory_space<vmem>>, vector<128x128xf32>
    %c0_51 = arith.constant 0 : index
    %c0_52 = arith.constant 0 : index
    %26 = vector.load %arg28[%c0_51, %c0_52] : memref<1x128xf32, #tpu.memory_space<vmem>>, vector<1x128xf32>
    %c0_53 = arith.constant 0 : index
    %c0_54 = arith.constant 0 : index
    %27 = vector.load %arg29[%c0_53, %c0_54] : memref<128x1xf32, #tpu.memory_space<vmem>>, vector<128x1xf32>
    %c0_55 = arith.constant 0 : index
    %c0_56 = arith.constant 0 : index
    %28 = vector.load %arg30[%c0_55, %c0_56] : memref<128x128xf32, #tpu.memory_space<vmem>>, vector<128x128xf32>
    %c0_57 = arith.constant 0 : index
    %c0_58 = arith.constant 0 : index
    %29 = vector.load %arg31[%c0_57, %c0_58] : memref<128x128xf32, #tpu.memory_space<vmem>>, vector<128x128xf32>
    %c0_59 = arith.constant 0 : index
    %c0_60 = arith.constant 0 : index
    %30 = vector.load %arg32[%c0_59, %c0_60] : memref<1x128xf32, #tpu.memory_space<vmem>>, vector<1x128xf32>
    %c0_61 = arith.constant 0 : index
    %c0_62 = arith.constant 0 : index
    %31 = vector.load %arg33[%c0_61, %c0_62] : memref<1x128xf32, #tpu.memory_space<vmem>>, vector<1x128xf32>
    %c0_63 = arith.constant 0 : index
    %c0_64 = arith.constant 0 : index
    %32 = vector.load %arg34[%c0_63, %c0_64] : memref<128x128xf32, #tpu.memory_space<vmem>>, vector<128x128xf32>
    %c0_65 = arith.constant 0 : index
    %c0_66 = arith.constant 0 : index
    %33 = vector.load %arg35[%c0_65, %c0_66] : memref<1x128xf32, #tpu.memory_space<vmem>>, vector<1x128xf32>
    %c0_67 = arith.constant 0 : index
    %c0_68 = arith.constant 0 : index
    %34 = vector.load %arg36[%c0_67, %c0_68] : memref<128x128xf32, #tpu.memory_space<vmem>>, vector<128x128xf32>
    %c0_69 = arith.constant 0 : index
    %c0_70 = arith.constant 0 : index
    %35 = vector.load %arg37[%c0_69, %c0_70] : memref<1x128xf32, #tpu.memory_space<vmem>>, vector<1x128xf32>
    %c0_71 = arith.constant 0 : index
    %c0_72 = arith.constant 0 : index
    %36 = vector.load %arg38[%c0_71, %c0_72] : memref<128x64xf32, #tpu.memory_space<vmem>>, vector<128x64xf32>
    %c0_73 = arith.constant 0 : index
    %c0_74 = arith.constant 0 : index
    %37 = vector.load %arg39[%c0_73, %c0_74] : memref<1x64xf32, #tpu.memory_space<vmem>>, vector<1x64xf32>
    %c0_75 = arith.constant 0 : index
    %c0_76 = arith.constant 0 : index
    %38 = vector.load %arg40[%c0_75, %c0_76] : memref<1x1xf32, #tpu.memory_space<vmem>>, vector<1x1xf32>
    %c0_77 = arith.constant 0 : index
    %c0_78 = arith.constant 0 : index
    %39 = vector.load %arg41[%c0_77, %c0_78] : memref<64x128xf32, #tpu.memory_space<vmem>>, vector<64x128xf32>
    %c0_79 = arith.constant 0 : index
    %c0_80 = arith.constant 0 : index
    %40 = vector.load %arg42[%c0_79, %c0_80] : memref<1x128xf32, #tpu.memory_space<vmem>>, vector<1x128xf32>
    %c0_81 = arith.constant 0 : index
    %c0_82 = arith.constant 0 : index
    %41 = vector.load %arg43[%c0_81, %c0_82] : memref<128x128xf32, #tpu.memory_space<vmem>>, vector<128x128xf32>
    %c0_83 = arith.constant 0 : index
    %c0_84 = arith.constant 0 : index
    %42 = vector.load %arg44[%c0_83, %c0_84] : memref<1x128xf32, #tpu.memory_space<vmem>>, vector<1x128xf32>
    %c0_85 = arith.constant 0 : index
    %c0_86 = arith.constant 0 : index
    %43 = vector.load %arg45[%c0_85, %c0_86] : memref<128x128xf32, #tpu.memory_space<vmem>>, vector<128x128xf32>
    %c0_87 = arith.constant 0 : index
    %c0_88 = arith.constant 0 : index
    %44 = vector.load %arg46[%c0_87, %c0_88] : memref<1x128xf32, #tpu.memory_space<vmem>>, vector<1x128xf32>
    %c0_89 = arith.constant 0 : index
    %c0_90 = arith.constant 0 : index
    %45 = vector.load %arg47[%c0_89, %c0_90] : memref<1x128xf32, #tpu.memory_space<vmem>>, vector<1x128xf32>
    %c0_91 = arith.constant 0 : index
    %c0_92 = arith.constant 0 : index
    %c0_93 = arith.constant 0 : index
    %46 = vector.load %arg1[%c0_91, %c0_92, %c0_93] : memref<2x8x16xf32, #tpu.memory_space<vmem>>, vector<2x8x16xf32>
    %47 = vector.shape_cast %46 : vector<2x8x16xf32> to vector<16x16xf32>
    %48 = arith.truncf %47 : vector<16x16xf32> to vector<16x16xbf16>
    %49 = arith.truncf %0 : vector<16x128xf32> to vector<16x128xbf16>
    %cst = arith.constant dense<0.000000e+00> : vector<16x128xf32>
    %50 = tpu.matmul %48, %49, %cst {dimension_numbers = #tpu.dot_dimension_numbers<[1], [0], [0], [1], [0, 0, 1, 1], [], []>} : vector<16x16xbf16>, vector<16x128xbf16>, vector<16x128xf32> -> vector<16x128xf32>
    %51 = vector.shape_cast %50 : vector<16x128xf32> to vector<2x8x128xf32>
    %52 = arith.truncf %47 : vector<16x16xf32> to vector<16x16xbf16>
    %53 = arith.truncf %1 : vector<16x128xf32> to vector<16x128xbf16>
    %cst_94 = arith.constant dense<0.000000e+00> : vector<16x128xf32>
    %54 = tpu.matmul %52, %53, %cst_94 {dimension_numbers = #tpu.dot_dimension_numbers<[1], [0], [0], [1], [0, 0, 1, 1], [], []>} : vector<16x16xbf16>, vector<16x128xbf16>, vector<16x128xf32> -> vector<16x128xf32>
    %55 = vector.shape_cast %54 : vector<16x128xf32> to vector<2x8x128xf32>
    %56 = arith.truncf %47 : vector<16x16xf32> to vector<16x16xbf16>
    %57 = arith.truncf %2 : vector<16x128xf32> to vector<16x128xbf16>
    %cst_95 = arith.constant dense<0.000000e+00> : vector<16x128xf32>
    %58 = tpu.matmul %56, %57, %cst_95 {dimension_numbers = #tpu.dot_dimension_numbers<[1], [0], [0], [1], [0, 0, 1, 1], [], []>} : vector<16x16xbf16>, vector<16x128xbf16>, vector<16x128xf32> -> vector<16x128xf32>
    %59 = vector.shape_cast %58 : vector<16x128xf32> to vector<2x8x128xf32>
    %cst_96 = arith.constant 0.0883883461 : f32
    %60 = vector.broadcast %cst_96 : f32 to vector<2x8x128xf32>
    %61 = arith.mulf %51, %60 : vector<2x8x128xf32>
    %62 = arith.truncf %61 : vector<2x8x128xf32> to vector<2x8x128xbf16>
    %63 = arith.truncf %55 : vector<2x8x128xf32> to vector<2x8x128xbf16>
    "tpu.trace_start"() <{level = 10 : i32, message = "bqf,bkf->bqk"}> : () -> ()
    %cst_97 = arith.constant dense<0.000000e+00> : vector<2x8x8xf32>
    %64 = tpu.matmul %62, %63, %cst_97 {dimension_numbers = #tpu.dot_dimension_numbers<[2], [2], [1], [1], [0, 0, 0, 1, 1, 1], [0], [0]>} : vector<2x8x128xbf16>, vector<2x8x128xbf16>, vector<2x8x8xf32> -> vector<2x8x8xf32>
    "tpu.trace_stop"() : () -> ()
    %cst_98 = arith.constant dense<0xFF800000> : vector<2x8xf32>
    %65 = vector.multi_reduction <maximumf>, %64, %cst_98 [2] : vector<2x8x8xf32> to vector<2x8xf32>
    %66 = vector.shape_cast %65 : vector<2x8xf32> to vector<2x8x1xf32>
    %67 = vector.broadcast %66 : vector<2x8x1xf32> to vector<2x8x8xf32>
    %68 = arith.subf %64, %67 : vector<2x8x8xf32>
    %69 = math.exp %68 : vector<2x8x8xf32>
    %cst_99 = arith.constant dense<0.000000e+00> : vector<2x8xf32>
    %70 = vector.multi_reduction <add>, %69, %cst_99 [2] : vector<2x8x8xf32> to vector<2x8xf32>
    %71 = vector.shape_cast %70 : vector<2x8xf32> to vector<2x8x1xf32>
    %72 = tpu.reciprocal %71 {approx = true} : vector<2x8x1xf32> -> vector<2x8x1xf32>
    %73 = vector.broadcast %72 : vector<2x8x1xf32> to vector<2x8x8xf32>
    %74 = arith.mulf %69, %73 : vector<2x8x8xf32>
    %75 = arith.truncf %74 : vector<2x8x8xf32> to vector<2x8x8xbf16>
    %76 = arith.truncf %59 : vector<2x8x128xf32> to vector<2x8x128xbf16>
    "tpu.trace_start"() <{level = 10 : i32, message = "bqk,bkf->bqf"}> : () -> ()
    %cst_100 = arith.constant dense<0.000000e+00> : vector<2x8x128xf32>
    %77 = tpu.matmul %75, %76, %cst_100 {dimension_numbers = #tpu.dot_dimension_numbers<[2], [1], [1], [2], [0, 0, 0, 1, 1, 2], [0], [0]>} : vector<2x8x8xbf16>, vector<2x8x128xbf16>, vector<2x8x128xf32> -> vector<2x8x128xf32>
    "tpu.trace_stop"() : () -> ()
    %cst_101 = arith.constant dense<0.000000e+00> : vector<2x8xf32>
    %78 = vector.multi_reduction <add>, %77, %cst_101 [2] : vector<2x8x128xf32> to vector<2x8xf32>
    %79 = vector.shape_cast %78 : vector<2x8xf32> to vector<2x8x1xf32>
    %cst_102 = arith.constant 1.280000e+02 : f32
    %80 = vector.broadcast %cst_102 : f32 to vector<2x8x1xf32>
    %81 = arith.divf %79, %80 : vector<2x8x1xf32>
    %82 = vector.broadcast %81 : vector<2x8x1xf32> to vector<2x8x128xf32>
    %83 = arith.subf %77, %82 : vector<2x8x128xf32>
    %84 = arith.mulf %83, %83 : vector<2x8x128xf32>
    %cst_103 = arith.constant dense<0.000000e+00> : vector<2x8xf32>
    %85 = vector.multi_reduction <add>, %84, %cst_103 [2] : vector<2x8x128xf32> to vector<2x8xf32>
    %86 = vector.shape_cast %85 : vector<2x8xf32> to vector<2x8x1xf32>
    %cst_104 = arith.constant 1.280000e+02 : f32
    %87 = vector.broadcast %cst_104 : f32 to vector<2x8x1xf32>
    %88 = arith.divf %86, %87 : vector<2x8x1xf32>
    %89 = vector.broadcast %81 : vector<2x8x1xf32> to vector<2x8x128xf32>
    %90 = arith.subf %77, %89 : vector<2x8x128xf32>
    %cst_105 = arith.constant 9.99999974E-6 : f32
    %91 = vector.broadcast %cst_105 : f32 to vector<2x8x1xf32>
    %92 = arith.addf %88, %91 : vector<2x8x1xf32>
    %93 = math.rsqrt %92 : vector<2x8x1xf32>
    %94 = vector.broadcast %93 : vector<2x8x1xf32> to vector<2x8x128xf32>
    %95 = arith.mulf %90, %94 : vector<2x8x128xf32>
    %96 = vector.shape_cast %3 : vector<1x128xf32> to vector<1x1x128xf32>
    %97 = vector.broadcast %96 : vector<1x1x128xf32> to vector<2x8x128xf32>
    %98 = arith.mulf %95, %97 : vector<2x8x128xf32>
    %99 = vector.shape_cast %4 : vector<1x128xf32> to vector<1x1x128xf32>
    %100 = vector.broadcast %99 : vector<1x1x128xf32> to vector<2x8x128xf32>
    %101 = arith.addf %98, %100 : vector<2x8x128xf32>
    %102 = vector.shape_cast %101 : vector<2x8x128xf32> to vector<16x128xf32>
    %103 = arith.truncf %102 : vector<16x128xf32> to vector<16x128xbf16>
    %104 = arith.truncf %5 : vector<128x128xf32> to vector<128x128xbf16>
    %cst_106 = arith.constant dense<0.000000e+00> : vector<16x128xf32>
    %105 = tpu.matmul %103, %104, %cst_106 {dimension_numbers = #tpu.dot_dimension_numbers<[1], [0], [0], [1], [0, 0, 1, 1], [], []>} : vector<16x128xbf16>, vector<128x128xbf16>, vector<16x128xf32> -> vector<16x128xf32>
    %106 = vector.broadcast %6 : vector<1x128xf32> to vector<16x128xf32>
    %107 = arith.addf %105, %106 : vector<16x128xf32>
    %cst_107 = arith.constant 0.000000e+00 : f32
    %108 = vector.broadcast %cst_107 : f32 to vector<16x128xf32>
    %109 = arith.maximumf %107, %108 : vector<16x128xf32>
    %110 = arith.truncf %109 : vector<16x128xf32> to vector<16x128xbf16>
    %111 = arith.truncf %7 : vector<128x128xf32> to vector<128x128xbf16>
    %cst_108 = arith.constant dense<0.000000e+00> : vector<16x128xf32>
    %112 = tpu.matmul %110, %111, %cst_108 {dimension_numbers = #tpu.dot_dimension_numbers<[1], [0], [0], [1], [0, 0, 1, 1], [], []>} : vector<16x128xbf16>, vector<128x128xbf16>, vector<16x128xf32> -> vector<16x128xf32>
    %113 = vector.broadcast %8 : vector<1x128xf32> to vector<16x128xf32>
    %114 = arith.addf %112, %113 : vector<16x128xf32>
    %115 = vector.shape_cast %114 : vector<16x128xf32> to vector<2x8x128xf32>
    %116 = arith.addf %115, %77 : vector<2x8x128xf32>
    %117 = vector.shape_cast %116 : vector<2x8x128xf32> to vector<16x128xf32>
    %118 = arith.truncf %117 : vector<16x128xf32> to vector<16x128xbf16>
    %119 = arith.truncf %9 : vector<128x128xf32> to vector<128x128xbf16>
    %cst_109 = arith.constant dense<0.000000e+00> : vector<16x128xf32>
    %120 = tpu.matmul %118, %119, %cst_109 {dimension_numbers = #tpu.dot_dimension_numbers<[1], [0], [0], [1], [0, 0, 1, 1], [], []>} : vector<16x128xbf16>, vector<128x128xbf16>, vector<16x128xf32> -> vector<16x128xf32>
    %121 = vector.shape_cast %120 : vector<16x128xf32> to vector<2x8x128xf32>
    %122 = arith.truncf %117 : vector<16x128xf32> to vector<16x128xbf16>
    %123 = arith.truncf %10 : vector<128x128xf32> to vector<128x128xbf16>
    %cst_110 = arith.constant dense<0.000000e+00> : vector<16x128xf32>
    %124 = tpu.matmul %122, %123, %cst_110 {dimension_numbers = #tpu.dot_dimension_numbers<[1], [0], [0], [1], [0, 0, 1, 1], [], []>} : vector<16x128xbf16>, vector<128x128xbf16>, vector<16x128xf32> -> vector<16x128xf32>
    %125 = vector.shape_cast %124 : vector<16x128xf32> to vector<2x8x128xf32>
    %126 = arith.truncf %117 : vector<16x128xf32> to vector<16x128xbf16>
    %127 = arith.truncf %11 : vector<128x128xf32> to vector<128x128xbf16>
    %cst_111 = arith.constant dense<0.000000e+00> : vector<16x128xf32>
    %128 = tpu.matmul %126, %127, %cst_111 {dimension_numbers = #tpu.dot_dimension_numbers<[1], [0], [0], [1], [0, 0, 1, 1], [], []>} : vector<16x128xbf16>, vector<128x128xbf16>, vector<16x128xf32> -> vector<16x128xf32>
    %129 = vector.shape_cast %128 : vector<16x128xf32> to vector<2x8x128xf32>
    %cst_112 = arith.constant 0.0883883461 : f32
    %130 = vector.broadcast %cst_112 : f32 to vector<2x8x128xf32>
    %131 = arith.mulf %121, %130 : vector<2x8x128xf32>
    %132 = arith.truncf %131 : vector<2x8x128xf32> to vector<2x8x128xbf16>
    %133 = arith.truncf %125 : vector<2x8x128xf32> to vector<2x8x128xbf16>
    "tpu.trace_start"() <{level = 10 : i32, message = "bqf,bkf->bqk"}> : () -> ()
    %cst_113 = arith.constant dense<0.000000e+00> : vector<2x8x8xf32>
    %134 = tpu.matmul %132, %133, %cst_113 {dimension_numbers = #tpu.dot_dimension_numbers<[2], [2], [1], [1], [0, 0, 0, 1, 1, 1], [0], [0]>} : vector<2x8x128xbf16>, vector<2x8x128xbf16>, vector<2x8x8xf32> -> vector<2x8x8xf32>
    "tpu.trace_stop"() : () -> ()
    %cst_114 = arith.constant dense<0xFF800000> : vector<2x8xf32>
    %135 = vector.multi_reduction <maximumf>, %134, %cst_114 [2] : vector<2x8x8xf32> to vector<2x8xf32>
    %136 = vector.shape_cast %135 : vector<2x8xf32> to vector<2x8x1xf32>
    %137 = vector.broadcast %136 : vector<2x8x1xf32> to vector<2x8x8xf32>
    %138 = arith.subf %134, %137 : vector<2x8x8xf32>
    %139 = math.exp %138 : vector<2x8x8xf32>
    %cst_115 = arith.constant dense<0.000000e+00> : vector<2x8xf32>
    %140 = vector.multi_reduction <add>, %139, %cst_115 [2] : vector<2x8x8xf32> to vector<2x8xf32>
    %141 = vector.shape_cast %140 : vector<2x8xf32> to vector<2x8x1xf32>
    %142 = tpu.reciprocal %141 {approx = true} : vector<2x8x1xf32> -> vector<2x8x1xf32>
    %143 = vector.broadcast %142 : vector<2x8x1xf32> to vector<2x8x8xf32>
    %144 = arith.mulf %139, %143 : vector<2x8x8xf32>
    %145 = arith.truncf %144 : vector<2x8x8xf32> to vector<2x8x8xbf16>
    %146 = arith.truncf %129 : vector<2x8x128xf32> to vector<2x8x128xbf16>
    "tpu.trace_start"() <{level = 10 : i32, message = "bqk,bkf->bqf"}> : () -> ()
    %cst_116 = arith.constant dense<0.000000e+00> : vector<2x8x128xf32>
    %147 = tpu.matmul %145, %146, %cst_116 {dimension_numbers = #tpu.dot_dimension_numbers<[2], [1], [1], [2], [0, 0, 0, 1, 1, 2], [0], [0]>} : vector<2x8x8xbf16>, vector<2x8x128xbf16>, vector<2x8x128xf32> -> vector<2x8x128xf32>
    "tpu.trace_stop"() : () -> ()
    %cst_117 = arith.constant dense<0.000000e+00> : vector<2x8xf32>
    %148 = vector.multi_reduction <add>, %147, %cst_117 [2] : vector<2x8x128xf32> to vector<2x8xf32>
    %149 = vector.shape_cast %148 : vector<2x8xf32> to vector<2x8x1xf32>
    %cst_118 = arith.constant 1.280000e+02 : f32
    %150 = vector.broadcast %cst_118 : f32 to vector<2x8x1xf32>
    %151 = arith.divf %149, %150 : vector<2x8x1xf32>
    %152 = vector.broadcast %151 : vector<2x8x1xf32> to vector<2x8x128xf32>
    %153 = arith.subf %147, %152 : vector<2x8x128xf32>
    %154 = arith.mulf %153, %153 : vector<2x8x128xf32>
    %cst_119 = arith.constant dense<0.000000e+00> : vector<2x8xf32>
    %155 = vector.multi_reduction <add>, %154, %cst_119 [2] : vector<2x8x128xf32> to vector<2x8xf32>
    %156 = vector.shape_cast %155 : vector<2x8xf32> to vector<2x8x1xf32>
    %cst_120 = arith.constant 1.280000e+02 : f32
    %157 = vector.broadcast %cst_120 : f32 to vector<2x8x1xf32>
    %158 = arith.divf %156, %157 : vector<2x8x1xf32>
    %159 = vector.broadcast %151 : vector<2x8x1xf32> to vector<2x8x128xf32>
    %160 = arith.subf %147, %159 : vector<2x8x128xf32>
    %cst_121 = arith.constant 9.99999974E-6 : f32
    %161 = vector.broadcast %cst_121 : f32 to vector<2x8x1xf32>
    %162 = arith.addf %158, %161 : vector<2x8x1xf32>
    %163 = math.rsqrt %162 : vector<2x8x1xf32>
    %164 = vector.broadcast %163 : vector<2x8x1xf32> to vector<2x8x128xf32>
    %165 = arith.mulf %160, %164 : vector<2x8x128xf32>
    %166 = vector.shape_cast %12 : vector<1x128xf32> to vector<1x1x128xf32>
    %167 = vector.broadcast %166 : vector<1x1x128xf32> to vector<2x8x128xf32>
    %168 = arith.mulf %165, %167 : vector<2x8x128xf32>
    %169 = vector.shape_cast %13 : vector<1x128xf32> to vector<1x1x128xf32>
    %170 = vector.broadcast %169 : vector<1x1x128xf32> to vector<2x8x128xf32>
    %171 = arith.addf %168, %170 : vector<2x8x128xf32>
    %172 = vector.shape_cast %171 : vector<2x8x128xf32> to vector<16x128xf32>
    %173 = arith.truncf %172 : vector<16x128xf32> to vector<16x128xbf16>
    %174 = arith.truncf %14 : vector<128x128xf32> to vector<128x128xbf16>
    %cst_122 = arith.constant dense<0.000000e+00> : vector<16x128xf32>
    %175 = tpu.matmul %173, %174, %cst_122 {dimension_numbers = #tpu.dot_dimension_numbers<[1], [0], [0], [1], [0, 0, 1, 1], [], []>} : vector<16x128xbf16>, vector<128x128xbf16>, vector<16x128xf32> -> vector<16x128xf32>
    %176 = vector.broadcast %15 : vector<1x128xf32> to vector<16x128xf32>
    %177 = arith.addf %175, %176 : vector<16x128xf32>
    %cst_123 = arith.constant 0.000000e+00 : f32
    %178 = vector.broadcast %cst_123 : f32 to vector<16x128xf32>
    %179 = arith.maximumf %177, %178 : vector<16x128xf32>
    %180 = arith.truncf %179 : vector<16x128xf32> to vector<16x128xbf16>
    %181 = arith.truncf %16 : vector<128x128xf32> to vector<128x128xbf16>
    %cst_124 = arith.constant dense<0.000000e+00> : vector<16x128xf32>
    %182 = tpu.matmul %180, %181, %cst_124 {dimension_numbers = #tpu.dot_dimension_numbers<[1], [0], [0], [1], [0, 0, 1, 1], [], []>} : vector<16x128xbf16>, vector<128x128xbf16>, vector<16x128xf32> -> vector<16x128xf32>
    %183 = vector.broadcast %17 : vector<1x128xf32> to vector<16x128xf32>
    %184 = arith.addf %182, %183 : vector<16x128xf32>
    %185 = vector.shape_cast %184 : vector<16x128xf32> to vector<2x8x128xf32>
    %186 = arith.addf %185, %147 : vector<2x8x128xf32>
    %187 = vector.shape_cast %186 : vector<2x8x128xf32> to vector<16x128xf32>
    %188 = arith.truncf %187 : vector<16x128xf32> to vector<16x128xbf16>
    %189 = arith.truncf %18 : vector<128x128xf32> to vector<128x128xbf16>
    %cst_125 = arith.constant dense<0.000000e+00> : vector<16x128xf32>
    %190 = tpu.matmul %188, %189, %cst_125 {dimension_numbers = #tpu.dot_dimension_numbers<[1], [0], [0], [1], [0, 0, 1, 1], [], []>} : vector<16x128xbf16>, vector<128x128xbf16>, vector<16x128xf32> -> vector<16x128xf32>
    %191 = vector.shape_cast %190 : vector<16x128xf32> to vector<2x8x128xf32>
    %192 = arith.truncf %187 : vector<16x128xf32> to vector<16x128xbf16>
    %193 = arith.truncf %19 : vector<128x128xf32> to vector<128x128xbf16>
    %cst_126 = arith.constant dense<0.000000e+00> : vector<16x128xf32>
    %194 = tpu.matmul %192, %193, %cst_126 {dimension_numbers = #tpu.dot_dimension_numbers<[1], [0], [0], [1], [0, 0, 1, 1], [], []>} : vector<16x128xbf16>, vector<128x128xbf16>, vector<16x128xf32> -> vector<16x128xf32>
    %195 = vector.shape_cast %194 : vector<16x128xf32> to vector<2x8x128xf32>
    %196 = arith.truncf %187 : vector<16x128xf32> to vector<16x128xbf16>
    %197 = arith.truncf %20 : vector<128x128xf32> to vector<128x128xbf16>
    %cst_127 = arith.constant dense<0.000000e+00> : vector<16x128xf32>
    %198 = tpu.matmul %196, %197, %cst_127 {dimension_numbers = #tpu.dot_dimension_numbers<[1], [0], [0], [1], [0, 0, 1, 1], [], []>} : vector<16x128xbf16>, vector<128x128xbf16>, vector<16x128xf32> -> vector<16x128xf32>
    %199 = vector.shape_cast %198 : vector<16x128xf32> to vector<2x8x128xf32>
    %cst_128 = arith.constant 0.0883883461 : f32
    %200 = vector.broadcast %cst_128 : f32 to vector<2x8x128xf32>
    %201 = arith.mulf %191, %200 : vector<2x8x128xf32>
    %202 = arith.truncf %201 : vector<2x8x128xf32> to vector<2x8x128xbf16>
    %203 = arith.truncf %195 : vector<2x8x128xf32> to vector<2x8x128xbf16>
    "tpu.trace_start"() <{level = 10 : i32, message = "bqf,bkf->bqk"}> : () -> ()
    %cst_129 = arith.constant dense<0.000000e+00> : vector<2x8x8xf32>
    %204 = tpu.matmul %202, %203, %cst_129 {dimension_numbers = #tpu.dot_dimension_numbers<[2], [2], [1], [1], [0, 0, 0, 1, 1, 1], [0], [0]>} : vector<2x8x128xbf16>, vector<2x8x128xbf16>, vector<2x8x8xf32> -> vector<2x8x8xf32>
    "tpu.trace_stop"() : () -> ()
    %cst_130 = arith.constant dense<0xFF800000> : vector<2x8xf32>
    %205 = vector.multi_reduction <maximumf>, %204, %cst_130 [2] : vector<2x8x8xf32> to vector<2x8xf32>
    %206 = vector.shape_cast %205 : vector<2x8xf32> to vector<2x8x1xf32>
    %207 = vector.broadcast %206 : vector<2x8x1xf32> to vector<2x8x8xf32>
    %208 = arith.subf %204, %207 : vector<2x8x8xf32>
    %209 = math.exp %208 : vector<2x8x8xf32>
    %cst_131 = arith.constant dense<0.000000e+00> : vector<2x8xf32>
    %210 = vector.multi_reduction <add>, %209, %cst_131 [2] : vector<2x8x8xf32> to vector<2x8xf32>
    %211 = vector.shape_cast %210 : vector<2x8xf32> to vector<2x8x1xf32>
    %212 = tpu.reciprocal %211 {approx = true} : vector<2x8x1xf32> -> vector<2x8x1xf32>
    %213 = vector.broadcast %212 : vector<2x8x1xf32> to vector<2x8x8xf32>
    %214 = arith.mulf %209, %213 : vector<2x8x8xf32>
    %215 = arith.truncf %214 : vector<2x8x8xf32> to vector<2x8x8xbf16>
    %216 = arith.truncf %199 : vector<2x8x128xf32> to vector<2x8x128xbf16>
    "tpu.trace_start"() <{level = 10 : i32, message = "bqk,bkf->bqf"}> : () -> ()
    %cst_132 = arith.constant dense<0.000000e+00> : vector<2x8x128xf32>
    %217 = tpu.matmul %215, %216, %cst_132 {dimension_numbers = #tpu.dot_dimension_numbers<[2], [1], [1], [2], [0, 0, 0, 1, 1, 2], [0], [0]>} : vector<2x8x8xbf16>, vector<2x8x128xbf16>, vector<2x8x128xf32> -> vector<2x8x128xf32>
    "tpu.trace_stop"() : () -> ()
    %cst_133 = arith.constant dense<0.000000e+00> : vector<2x8xf32>
    %218 = vector.multi_reduction <add>, %217, %cst_133 [2] : vector<2x8x128xf32> to vector<2x8xf32>
    %219 = vector.shape_cast %218 : vector<2x8xf32> to vector<2x8x1xf32>
    %cst_134 = arith.constant 1.280000e+02 : f32
    %220 = vector.broadcast %cst_134 : f32 to vector<2x8x1xf32>
    %221 = arith.divf %219, %220 : vector<2x8x1xf32>
    %222 = vector.broadcast %221 : vector<2x8x1xf32> to vector<2x8x128xf32>
    %223 = arith.subf %217, %222 : vector<2x8x128xf32>
    %224 = arith.mulf %223, %223 : vector<2x8x128xf32>
    %cst_135 = arith.constant dense<0.000000e+00> : vector<2x8xf32>
    %225 = vector.multi_reduction <add>, %224, %cst_135 [2] : vector<2x8x128xf32> to vector<2x8xf32>
    %226 = vector.shape_cast %225 : vector<2x8xf32> to vector<2x8x1xf32>
    %cst_136 = arith.constant 1.280000e+02 : f32
    %227 = vector.broadcast %cst_136 : f32 to vector<2x8x1xf32>
    %228 = arith.divf %226, %227 : vector<2x8x1xf32>
    %229 = vector.broadcast %221 : vector<2x8x1xf32> to vector<2x8x128xf32>
    %230 = arith.subf %217, %229 : vector<2x8x128xf32>
    %cst_137 = arith.constant 9.99999974E-6 : f32
    %231 = vector.broadcast %cst_137 : f32 to vector<2x8x1xf32>
    %232 = arith.addf %228, %231 : vector<2x8x1xf32>
    %233 = math.rsqrt %232 : vector<2x8x1xf32>
    %234 = vector.broadcast %233 : vector<2x8x1xf32> to vector<2x8x128xf32>
    %235 = arith.mulf %230, %234 : vector<2x8x128xf32>
    %236 = vector.shape_cast %21 : vector<1x128xf32> to vector<1x1x128xf32>
    %237 = vector.broadcast %236 : vector<1x1x128xf32> to vector<2x8x128xf32>
    %238 = arith.mulf %235, %237 : vector<2x8x128xf32>
    %239 = vector.shape_cast %22 : vector<1x128xf32> to vector<1x1x128xf32>
    %240 = vector.broadcast %239 : vector<1x1x128xf32> to vector<2x8x128xf32>
    %241 = arith.addf %238, %240 : vector<2x8x128xf32>
    %242 = vector.shape_cast %241 : vector<2x8x128xf32> to vector<16x128xf32>
    %243 = arith.truncf %242 : vector<16x128xf32> to vector<16x128xbf16>
    %244 = arith.truncf %23 : vector<128x128xf32> to vector<128x128xbf16>
    %cst_138 = arith.constant dense<0.000000e+00> : vector<16x128xf32>
    %245 = tpu.matmul %243, %244, %cst_138 {dimension_numbers = #tpu.dot_dimension_numbers<[1], [0], [0], [1], [0, 0, 1, 1], [], []>} : vector<16x128xbf16>, vector<128x128xbf16>, vector<16x128xf32> -> vector<16x128xf32>
    %246 = vector.broadcast %24 : vector<1x128xf32> to vector<16x128xf32>
    %247 = arith.addf %245, %246 : vector<16x128xf32>
    %cst_139 = arith.constant 0.000000e+00 : f32
    %248 = vector.broadcast %cst_139 : f32 to vector<16x128xf32>
    %249 = arith.maximumf %247, %248 : vector<16x128xf32>
    %250 = arith.truncf %249 : vector<16x128xf32> to vector<16x128xbf16>
    %251 = arith.truncf %25 : vector<128x128xf32> to vector<128x128xbf16>
    %cst_140 = arith.constant dense<0.000000e+00> : vector<16x128xf32>
    %252 = tpu.matmul %250, %251, %cst_140 {dimension_numbers = #tpu.dot_dimension_numbers<[1], [0], [0], [1], [0, 0, 1, 1], [], []>} : vector<16x128xbf16>, vector<128x128xbf16>, vector<16x128xf32> -> vector<16x128xf32>
    %253 = vector.broadcast %26 : vector<1x128xf32> to vector<16x128xf32>
    %254 = arith.addf %252, %253 : vector<16x128xf32>
    %255 = vector.shape_cast %254 : vector<16x128xf32> to vector<2x8x128xf32>
    %256 = arith.addf %255, %217 : vector<2x8x128xf32>
    %257 = vector.shape_cast %256 : vector<2x8x128xf32> to vector<16x128xf32>
    %258 = arith.truncf %257 : vector<16x128xf32> to vector<16x128xbf16>
    %259 = arith.truncf %28 : vector<128x128xf32> to vector<128x128xbf16>
    %cst_141 = arith.constant dense<0.000000e+00> : vector<16x128xf32>
    %260 = tpu.matmul %258, %259, %cst_141 {dimension_numbers = #tpu.dot_dimension_numbers<[1], [0], [0], [1], [0, 0, 1, 1], [], []>} : vector<16x128xbf16>, vector<128x128xbf16>, vector<16x128xf32> -> vector<16x128xf32>
    %261 = arith.truncf %257 : vector<16x128xf32> to vector<16x128xbf16>
    %262 = arith.truncf %29 : vector<128x128xf32> to vector<128x128xbf16>
    %cst_142 = arith.constant dense<0.000000e+00> : vector<16x128xf32>
    %263 = tpu.matmul %261, %262, %cst_142 {dimension_numbers = #tpu.dot_dimension_numbers<[1], [0], [0], [1], [0, 0, 1, 1], [], []>} : vector<16x128xbf16>, vector<128x128xbf16>, vector<16x128xf32> -> vector<16x128xf32>
    %264 = vector.shape_cast %263 : vector<16x128xf32> to vector<2x8x128xf32>
    %cst_143 = arith.constant 0.0883883461 : f32
    %265 = vector.broadcast %cst_143 : f32 to vector<128x1xf32>
    %266 = arith.mulf %27, %265 : vector<128x1xf32>
    %267 = arith.truncf %260 : vector<16x128xf32> to vector<16x128xbf16>
    %268 = arith.truncf %266 : vector<128x1xf32> to vector<128x1xbf16>
    %cst_144 = arith.constant dense<0.000000e+00> : vector<16x1xf32>
    %269 = tpu.matmul %267, %268, %cst_144 {dimension_numbers = #tpu.dot_dimension_numbers<[1], [0], [0], [1], [0, 0, 1, 1], [], []>} : vector<16x128xbf16>, vector<128x1xbf16>, vector<16x1xf32> -> vector<16x1xf32>
    %270 = vector.shape_cast %269 : vector<16x1xf32> to vector<2x8x1xf32>
    %cst_145 = arith.constant dense<0xFF800000> : vector<2x1xf32>
    %271 = vector.multi_reduction <maximumf>, %270, %cst_145 [1] : vector<2x8x1xf32> to vector<2x1xf32>
    %272 = vector.shape_cast %271 : vector<2x1xf32> to vector<2x1x1xf32>
    %273 = vector.broadcast %272 : vector<2x1x1xf32> to vector<2x8x1xf32>
    %274 = arith.subf %270, %273 : vector<2x8x1xf32>
    %275 = math.exp %274 : vector<2x8x1xf32>
    %cst_146 = arith.constant dense<0.000000e+00> : vector<2x1xf32>
    %276 = vector.multi_reduction <add>, %275, %cst_146 [1] : vector<2x8x1xf32> to vector<2x1xf32>
    %277 = vector.shape_cast %276 : vector<2x1xf32> to vector<2x1x1xf32>
    %278 = tpu.reciprocal %277 {approx = true} : vector<2x1x1xf32> -> vector<2x1x1xf32>
    %279 = vector.broadcast %278 : vector<2x1x1xf32> to vector<2x8x1xf32>
    %280 = arith.mulf %275, %279 : vector<2x8x1xf32>
    %281 = vector.broadcast %280 : vector<2x8x1xf32> to vector<2x8x128xf32>
    %282 = arith.mulf %281, %264 : vector<2x8x128xf32>
    %cst_147 = arith.constant dense<0.000000e+00> : vector<2x128xf32>
    %283 = vector.multi_reduction <add>, %282, %cst_147 [1] : vector<2x8x128xf32> to vector<2x128xf32>
    %cst_148 = arith.constant dense<0.000000e+00> : vector<2xf32>
    %284 = vector.multi_reduction <add>, %283, %cst_148 [1] : vector<2x128xf32> to vector<2xf32>
    %285 = vector.shape_cast %284 : vector<2xf32> to vector<2x1xf32>
    %cst_149 = arith.constant 1.280000e+02 : f32
    %286 = vector.broadcast %cst_149 : f32 to vector<2x1xf32>
    %287 = arith.divf %285, %286 : vector<2x1xf32>
    %288 = vector.broadcast %287 : vector<2x1xf32> to vector<2x128xf32>
    %289 = arith.subf %283, %288 : vector<2x128xf32>
    %290 = arith.mulf %289, %289 : vector<2x128xf32>
    %cst_150 = arith.constant dense<0.000000e+00> : vector<2xf32>
    %291 = vector.multi_reduction <add>, %290, %cst_150 [1] : vector<2x128xf32> to vector<2xf32>
    %292 = vector.shape_cast %291 : vector<2xf32> to vector<2x1xf32>
    %cst_151 = arith.constant 1.280000e+02 : f32
    %293 = vector.broadcast %cst_151 : f32 to vector<2x1xf32>
    %294 = arith.divf %292, %293 : vector<2x1xf32>
    %295 = vector.broadcast %287 : vector<2x1xf32> to vector<2x128xf32>
    %296 = arith.subf %283, %295 : vector<2x128xf32>
    %cst_152 = arith.constant 9.99999974E-6 : f32
    %297 = vector.broadcast %cst_152 : f32 to vector<2x1xf32>
    %298 = arith.addf %294, %297 : vector<2x1xf32>
    %299 = math.rsqrt %298 : vector<2x1xf32>
    %300 = vector.broadcast %299 : vector<2x1xf32> to vector<2x128xf32>
    %301 = arith.mulf %296, %300 : vector<2x128xf32>
    %302 = vector.broadcast %30 : vector<1x128xf32> to vector<2x128xf32>
    %303 = arith.mulf %301, %302 : vector<2x128xf32>
    %304 = vector.broadcast %31 : vector<1x128xf32> to vector<2x128xf32>
    %305 = arith.addf %303, %304 : vector<2x128xf32>
    %306 = arith.truncf %305 : vector<2x128xf32> to vector<2x128xbf16>
    %307 = arith.truncf %32 : vector<128x128xf32> to vector<128x128xbf16>
    %cst_153 = arith.constant dense<0.000000e+00> : vector<2x128xf32>
    %308 = tpu.matmul %306, %307, %cst_153 {dimension_numbers = #tpu.dot_dimension_numbers<[1], [0], [0], [1], [0, 0, 1, 1], [], []>} : vector<2x128xbf16>, vector<128x128xbf16>, vector<2x128xf32> -> vector<2x128xf32>
    %309 = vector.broadcast %33 : vector<1x128xf32> to vector<2x128xf32>
    %310 = arith.addf %308, %309 : vector<2x128xf32>
    %cst_154 = arith.constant 0.000000e+00 : f32
    %311 = vector.broadcast %cst_154 : f32 to vector<2x128xf32>
    %312 = arith.maximumf %310, %311 : vector<2x128xf32>
    %313 = arith.truncf %312 : vector<2x128xf32> to vector<2x128xbf16>
    %314 = arith.truncf %34 : vector<128x128xf32> to vector<128x128xbf16>
    %cst_155 = arith.constant dense<0.000000e+00> : vector<2x128xf32>
    %315 = tpu.matmul %313, %314, %cst_155 {dimension_numbers = #tpu.dot_dimension_numbers<[1], [0], [0], [1], [0, 0, 1, 1], [], []>} : vector<2x128xbf16>, vector<128x128xbf16>, vector<2x128xf32> -> vector<2x128xf32>
    %316 = vector.broadcast %35 : vector<1x128xf32> to vector<2x128xf32>
    %317 = arith.addf %315, %316 : vector<2x128xf32>
    %318 = arith.truncf %317 : vector<2x128xf32> to vector<2x128xbf16>
    %319 = arith.truncf %36 : vector<128x64xf32> to vector<128x64xbf16>
    %cst_156 = arith.constant dense<0.000000e+00> : vector<2x64xf32>
    %320 = tpu.matmul %318, %319, %cst_156 {dimension_numbers = #tpu.dot_dimension_numbers<[1], [0], [0], [1], [0, 0, 1, 1], [], []>} : vector<2x128xbf16>, vector<128x64xbf16>, vector<2x64xf32> -> vector<2x64xf32>
    %321 = vector.broadcast %37 : vector<1x64xf32> to vector<2x64xf32>
    %322 = arith.addf %320, %321 : vector<2x64xf32>
    %cst_157 = arith.constant 0.000000e+00 : f32
    %323 = vector.broadcast %cst_157 : f32 to vector<2x64xf32>
    %324 = arith.maximumf %322, %323 : vector<2x64xf32>
    %cst_158 = arith.constant 0.000000e+00 : f32
    %325 = vector.broadcast %cst_158 : f32 to vector<2x64xf32>
    %326 = arith.minimumf %322, %325 : vector<2x64xf32>
    %327 = vector.broadcast %38 : vector<1x1xf32> to vector<2x64xf32>
    %328 = arith.mulf %327, %326 : vector<2x64xf32>
    %329 = arith.addf %324, %328 : vector<2x64xf32>
    %330 = arith.truncf %329 : vector<2x64xf32> to vector<2x64xbf16>
    %331 = arith.truncf %39 : vector<64x128xf32> to vector<64x128xbf16>
    %cst_159 = arith.constant dense<0.000000e+00> : vector<2x128xf32>
    %332 = tpu.matmul %330, %331, %cst_159 {dimension_numbers = #tpu.dot_dimension_numbers<[1], [0], [0], [1], [0, 0, 1, 1], [], []>} : vector<2x64xbf16>, vector<64x128xbf16>, vector<2x128xf32> -> vector<2x128xf32>
    %333 = vector.broadcast %40 : vector<1x128xf32> to vector<2x128xf32>
    %334 = arith.addf %332, %333 : vector<2x128xf32>
    %335 = arith.negf %334 : vector<2x128xf32>
    %336 = math.exp %335 : vector<2x128xf32>
    %cst_160 = arith.constant 1.000000e+00 : f32
    %337 = vector.broadcast %cst_160 : f32 to vector<2x128xf32>
    %338 = arith.addf %337, %336 : vector<2x128xf32>
    %339 = arith.divf %337, %338 : vector<2x128xf32>
    %340 = arith.truncf %317 : vector<2x128xf32> to vector<2x128xbf16>
    %341 = arith.truncf %41 : vector<128x128xf32> to vector<128x128xbf16>
    %cst_161 = arith.constant dense<0.000000e+00> : vector<2x128xf32>
    %342 = tpu.matmul %340, %341, %cst_161 {dimension_numbers = #tpu.dot_dimension_numbers<[1], [0], [0], [1], [0, 0, 1, 1], [], []>} : vector<2x128xbf16>, vector<128x128xbf16>, vector<2x128xf32> -> vector<2x128xf32>
    %343 = vector.broadcast %42 : vector<1x128xf32> to vector<2x128xf32>
    %344 = arith.addf %342, %343 : vector<2x128xf32>
    %cst_162 = arith.constant 0.000000e+00 : f32
    %345 = vector.broadcast %cst_162 : f32 to vector<2x128xf32>
    %346 = arith.maximumf %344, %345 : vector<2x128xf32>
    %347 = arith.truncf %346 : vector<2x128xf32> to vector<2x128xbf16>
    %348 = arith.truncf %43 : vector<128x128xf32> to vector<128x128xbf16>
    %cst_163 = arith.constant dense<0.000000e+00> : vector<2x128xf32>
    %349 = tpu.matmul %347, %348, %cst_163 {dimension_numbers = #tpu.dot_dimension_numbers<[1], [0], [0], [1], [0, 0, 1, 1], [], []>} : vector<2x128xbf16>, vector<128x128xbf16>, vector<2x128xf32> -> vector<2x128xf32>
    %350 = vector.broadcast %44 : vector<1x128xf32> to vector<2x128xf32>
    %351 = arith.addf %349, %350 : vector<2x128xf32>
    %cst_164 = arith.constant 0.000000e+00 : f32
    %352 = vector.broadcast %cst_164 : f32 to vector<2x128xf32>
    %353 = arith.maximumf %351, %352 : vector<2x128xf32>
    %354 = vector.broadcast %45 : vector<1x128xf32> to vector<2x128xf32>
    %355 = arith.mulf %339, %354 : vector<2x128xf32>
    %356 = arith.addf %355, %353 : vector<2x128xf32>
    %c0_165 = arith.constant 0 : index
    %c0_166 = arith.constant 0 : index
    %357 = vector.load %arg48[%c0_165, %c0_166] : memref<2x128xf32, #tpu.memory_space<vmem>>, vector<2x128xf32>
    tpu.vector_store %arg48[%c0_165, %c0_166], %356 {strides = array<i32>} : memref<2x128xf32, #tpu.memory_space<vmem>>, vector<2x128xf32>,
    return
  }
  func.func @transform_0(%arg0: i32) -> (i32, i32, i32) {
    %c0_i32 = arith.constant 0 : i32
    %c0_i32_0 = arith.constant 0 : i32
    %c0_i32_1 = arith.constant 0 : i32
    return %arg0, %c0_i32, %c0_i32_0 : i32, i32, i32
  }
  func.func @transform_1(%arg0: i32) -> (i32, i32) {
    %c0_i32 = arith.constant 0 : i32
    %c0_i32_0 = arith.constant 0 : i32
    %c0_i32_1 = arith.constant 0 : i32
    return %c0_i32, %c0_i32_0 : i32, i32
  }
  func.func @transform_2(%arg0: i32) -> (i32, i32) {
    %c0_i32 = arith.constant 0 : i32
    %c0_i32_0 = arith.constant 0 : i32
    %c0_i32_1 = arith.constant 0 : i32
    return %c0_i32, %c0_i32_0 : i32, i32
  }
  func.func @transform_3(%arg0: i32) -> (i32, i32) {
    %c0_i32 = arith.constant 0 : i32
    %c0_i32_0 = arith.constant 0 : i32
    %c0_i32_1 = arith.constant 0 : i32
    return %c0_i32, %c0_i32_0 : i32, i32
  }
  func.func @transform_4(%arg0: i32) -> (i32, i32) {
    %c0_i32 = arith.constant 0 : i32
    %c0_i32_0 = arith.constant 0 : i32
    %c0_i32_1 = arith.constant 0 : i32
    return %c0_i32, %c0_i32_0 : i32, i32
  }
  func.func @transform_5(%arg0: i32) -> (i32, i32) {
    %c0_i32 = arith.constant 0 : i32
    %c0_i32_0 = arith.constant 0 : i32
    %c0_i32_1 = arith.constant 0 : i32
    return %c0_i32, %c0_i32_0 : i32, i32
  }
  func.func @transform_6(%arg0: i32) -> (i32, i32) {
    %c0_i32 = arith.constant 0 : i32
    %c0_i32_0 = arith.constant 0 : i32
    %c0_i32_1 = arith.constant 0 : i32
    return %c0_i32, %c0_i32_0 : i32, i32
  }
  func.func @transform_7(%arg0: i32) -> (i32, i32) {
    %c0_i32 = arith.constant 0 : i32
    %c0_i32_0 = arith.constant 0 : i32
    %c0_i32_1 = arith.constant 0 : i32
    return %c0_i32, %c0_i32_0 : i32, i32
  }
  func.func @transform_8(%arg0: i32) -> (i32, i32) {
    %c0_i32 = arith.constant 0 : i32
    %c0_i32_0 = arith.constant 0 : i32
    %c0_i32_1 = arith.constant 0 : i32
    return %c0_i32, %c0_i32_0 : i32, i32
  }
  func.func @transform_9(%arg0: i32) -> (i32, i32) {
    %c0_i32 = arith.constant 0 : i32
    %c0_i32_0 = arith.constant 0 : i32
    %c0_i32_1 = arith.constant 0 : i32
    return %c0_i32, %c0_i32_0 : i32, i32
  }
  func.func @transform_10(%arg0: i32) -> (i32, i32) {
    %c0_i32 = arith.constant 0 : i32
    %c0_i32_0 = arith.constant 0 : i32
    %c0_i32_1 = arith.constant 0 : i32
    return %c0_i32, %c0_i32_0 : i32, i32
  }
  func.func @transform_11(%arg0: i32) -> (i32, i32) {
    %c0_i32 = arith.constant 0 : i32
    %c0_i32_0 = arith.constant 0 : i32
    %c0_i32_1 = arith.constant 0 : i32
    return %c0_i32, %c0_i32_0 : i32, i32
  }
  func.func @transform_12(%arg0: i32) -> (i32, i32) {
    %c0_i32 = arith.constant 0 : i32
    %c0_i32_0 = arith.constant 0 : i32
    %c0_i32_1 = arith.constant 0 : i32
    return %c0_i32, %c0_i32_0 : i32, i32
  }
  func.func @transform_13(%arg0: i32) -> (i32, i32) {
    %c0_i32 = arith.constant 0 : i32
    %c0_i32_0 = arith.constant 0 : i32
    %c0_i32_1 = arith.constant 0 : i32
    return %c0_i32, %c0_i32_0 : i32, i32
  }
  func.func @transform_14(%arg0: i32) -> (i32, i32) {
    %c0_i32 = arith.constant 0 : i32
    %c0_i32_0 = arith.constant 0 : i32
    %c0_i32_1 = arith.constant 0 : i32
    return %c0_i32, %c0_i32_0 : i32, i32
  }
  func.func @transform_15(%arg0: i32) -> (i32, i32) {
    %c0_i32 = arith.constant 0 : i32
    %c0_i32_0 = arith.constant 0 : i32
    %c0_i32_1 = arith.constant 0 : i32
    return %c0_i32, %c0_i32_0 : i32, i32
  }
  func.func @transform_16(%arg0: i32) -> (i32, i32) {
    %c0_i32 = arith.constant 0 : i32
    %c0_i32_0 = arith.constant 0 : i32
    %c0_i32_1 = arith.constant 0 : i32
    return %c0_i32, %c0_i32_0 : i32, i32
  }
  func.func @transform_17(%arg0: i32) -> (i32, i32) {
    %c0_i32 = arith.constant 0 : i32
    %c0_i32_0 = arith.constant 0 : i32
    %c0_i32_1 = arith.constant 0 : i32
    return %c0_i32, %c0_i32_0 : i32, i32
  }
  func.func @transform_18(%arg0: i32) -> (i32, i32) {
    %c0_i32 = arith.constant 0 : i32
    %c0_i32_0 = arith.constant 0 : i32
    %c0_i32_1 = arith.constant 0 : i32
    return %c0_i32, %c0_i32_0 : i32, i32
  }
  func.func @transform_19(%arg0: i32) -> (i32, i32) {
    %c0_i32 = arith.constant 0 : i32
    %c0_i32_0 = arith.constant 0 : i32
    %c0_i32_1 = arith.constant 0 : i32
    return %c0_i32, %c0_i32_0 : i32, i32
  }
  func.func @transform_20(%arg0: i32) -> (i32, i32) {
    %c0_i32 = arith.constant 0 : i32
    %c0_i32_0 = arith.constant 0 : i32
    %c0_i32_1 = arith.constant 0 : i32
    return %c0_i32, %c0_i32_0 : i32, i32
  }
  func.func @transform_21(%arg0: i32) -> (i32, i32) {
    %c0_i32 = arith.constant 0 : i32
    %c0_i32_0 = arith.constant 0 : i32
    %c0_i32_1 = arith.constant 0 : i32
    return %c0_i32, %c0_i32_0 : i32, i32
  }
  func.func @transform_22(%arg0: i32) -> (i32, i32) {
    %c0_i32 = arith.constant 0 : i32
    %c0_i32_0 = arith.constant 0 : i32
    %c0_i32_1 = arith.constant 0 : i32
    return %c0_i32, %c0_i32_0 : i32, i32
  }
  func.func @transform_23(%arg0: i32) -> (i32, i32) {
    %c0_i32 = arith.constant 0 : i32
    %c0_i32_0 = arith.constant 0 : i32
    %c0_i32_1 = arith.constant 0 : i32
    return %c0_i32, %c0_i32_0 : i32, i32
  }
  func.func @transform_24(%arg0: i32) -> (i32, i32) {
    %c0_i32 = arith.constant 0 : i32
    %c0_i32_0 = arith.constant 0 : i32
    %c0_i32_1 = arith.constant 0 : i32
    return %c0_i32, %c0_i32_0 : i32, i32
  }
  func.func @transform_25(%arg0: i32) -> (i32, i32) {
    %c0_i32 = arith.constant 0 : i32
    %c0_i32_0 = arith.constant 0 : i32
    %c0_i32_1 = arith.constant 0 : i32
    return %c0_i32, %c0_i32_0 : i32, i32
  }
  func.func @transform_26(%arg0: i32) -> (i32, i32) {
    %c0_i32 = arith.constant 0 : i32
    %c0_i32_0 = arith.constant 0 : i32
    %c0_i32_1 = arith.constant 0 : i32
    return %c0_i32, %c0_i32_0 : i32, i32
  }
  func.func @transform_27(%arg0: i32) -> (i32, i32) {
    %c0_i32 = arith.constant 0 : i32
    %c0_i32_0 = arith.constant 0 : i32
    %c0_i32_1 = arith.constant 0 : i32
    return %c0_i32, %c0_i32_0 : i32, i32
  }
  func.func @transform_28(%arg0: i32) -> (i32, i32) {
    %c0_i32 = arith.constant 0 : i32
    %c0_i32_0 = arith.constant 0 : i32
    %c0_i32_1 = arith.constant 0 : i32
    return %c0_i32, %c0_i32_0 : i32, i32
  }
  func.func @transform_29(%arg0: i32) -> (i32, i32) {
    %c0_i32 = arith.constant 0 : i32
    %c0_i32_0 = arith.constant 0 : i32
    %c0_i32_1 = arith.constant 0 : i32
    return %c0_i32, %c0_i32_0 : i32, i32
  }
  func.func @transform_30(%arg0: i32) -> (i32, i32) {
    %c0_i32 = arith.constant 0 : i32
    %c0_i32_0 = arith.constant 0 : i32
    %c0_i32_1 = arith.constant 0 : i32
    return %c0_i32, %c0_i32_0 : i32, i32
  }
  func.func @transform_31(%arg0: i32) -> (i32, i32) {
    %c0_i32 = arith.constant 0 : i32
    %c0_i32_0 = arith.constant 0 : i32
    %c0_i32_1 = arith.constant 0 : i32
    return %c0_i32, %c0_i32_0 : i32, i32
  }
  func.func @transform_32(%arg0: i32) -> (i32, i32) {
    %c0_i32 = arith.constant 0 : i32
    %c0_i32_0 = arith.constant 0 : i32
    %c0_i32_1 = arith.constant 0 : i32
    return %c0_i32, %c0_i32_0 : i32, i32
  }
  func.func @transform_33(%arg0: i32) -> (i32, i32) {
    %c0_i32 = arith.constant 0 : i32
    %c0_i32_0 = arith.constant 0 : i32
    %c0_i32_1 = arith.constant 0 : i32
    return %c0_i32, %c0_i32_0 : i32, i32
  }
  func.func @transform_34(%arg0: i32) -> (i32, i32) {
    %c0_i32 = arith.constant 0 : i32
    %c0_i32_0 = arith.constant 0 : i32
    %c0_i32_1 = arith.constant 0 : i32
    return %c0_i32, %c0_i32_0 : i32, i32
  }
  func.func @transform_35(%arg0: i32) -> (i32, i32) {
    %c0_i32 = arith.constant 0 : i32
    %c0_i32_0 = arith.constant 0 : i32
    %c0_i32_1 = arith.constant 0 : i32
    return %c0_i32, %c0_i32_0 : i32, i32
  }
  func.func @transform_36(%arg0: i32) -> (i32, i32) {
    %c0_i32 = arith.constant 0 : i32
    %c0_i32_0 = arith.constant 0 : i32
    %c0_i32_1 = arith.constant 0 : i32
    return %c0_i32, %c0_i32_0 : i32, i32
  }
  func.func @transform_37(%arg0: i32) -> (i32, i32) {
    %c0_i32 = arith.constant 0 : i32
    %c0_i32_0 = arith.constant 0 : i32
    %c0_i32_1 = arith.constant 0 : i32
    return %c0_i32, %c0_i32_0 : i32, i32
  }
  func.func @transform_38(%arg0: i32) -> (i32, i32) {
    %c0_i32 = arith.constant 0 : i32
    %c0_i32_0 = arith.constant 0 : i32
    %c0_i32_1 = arith.constant 0 : i32
    return %c0_i32, %c0_i32_0 : i32, i32
  }
  func.func @transform_39(%arg0: i32) -> (i32, i32) {
    %c0_i32 = arith.constant 0 : i32
    %c0_i32_0 = arith.constant 0 : i32
    %c0_i32_1 = arith.constant 0 : i32
    return %c0_i32, %c0_i32_0 : i32, i32
  }
  func.func @transform_40(%arg0: i32) -> (i32, i32) {
    %c0_i32 = arith.constant 0 : i32
    %c0_i32_0 = arith.constant 0 : i32
    %c0_i32_1 = arith.constant 0 : i32
    return %c0_i32, %c0_i32_0 : i32, i32
  }
  func.func @transform_41(%arg0: i32) -> (i32, i32) {
    %c0_i32 = arith.constant 0 : i32
    %c0_i32_0 = arith.constant 0 : i32
    %c0_i32_1 = arith.constant 0 : i32
    return %c0_i32, %c0_i32_0 : i32, i32
  }
  func.func @transform_42(%arg0: i32) -> (i32, i32) {
    %c0_i32 = arith.constant 0 : i32
    %c0_i32_0 = arith.constant 0 : i32
    %c0_i32_1 = arith.constant 0 : i32
    return %c0_i32, %c0_i32_0 : i32, i32
  }
  func.func @transform_43(%arg0: i32) -> (i32, i32) {
    %c0_i32 = arith.constant 0 : i32
    %c0_i32_0 = arith.constant 0 : i32
    %c0_i32_1 = arith.constant 0 : i32
    return %c0_i32, %c0_i32_0 : i32, i32
  }
  func.func @transform_44(%arg0: i32) -> (i32, i32) {
    %c0_i32 = arith.constant 0 : i32
    %c0_i32_0 = arith.constant 0 : i32
    %c0_i32_1 = arith.constant 0 : i32
    return %c0_i32, %c0_i32_0 : i32, i32
  }
  func.func @transform_45(%arg0: i32) -> (i32, i32) {
    %c0_i32 = arith.constant 0 : i32
    %c0_i32_0 = arith.constant 0 : i32
    %c0_i32_1 = arith.constant 0 : i32
    return %c0_i32, %c0_i32_0 : i32, i32
  }
  func.func @transform_46(%arg0: i32) -> (i32, i32) {
    %c0_i32 = arith.constant 0 : i32
    %c0_i32_0 = arith.constant 0 : i32
    %c0_i32_1 = arith.constant 0 : i32
    return %c0_i32, %c0_i32_0 : i32, i32
  }
  func.func @transform_47(%arg0: i32) -> (i32, i32) {
    %c0_i32 = arith.constant 0 : i32
    %c0_i32_0 = arith.constant 0 : i32
    return %arg0, %c0_i32 : i32, i32
  }
}

</mosaic_0001>

<bundles_post_ra>
// kernel: bilstm_forward.1
= control target key start
LH: loop header
LB: loop body
LE: loop exit
PB: predicated region body
PF: predicated region fallthrough
CT: control target
= control target key end

     0   :  { %s2445_s6 = smov 1   ;;  %s2446_s10 = smov 2   ;;  %s3150_s0 = inlined_call_operand.smem [shape: u32[48], index: -1, kind: input, shape index: {}] }
   0x1   :  { %s2516_s5 = sld [smem:[%s3150_s0]]   ;;  %s2447_s14 = smov 3  }
   0x2   :  { %s2521_s9 = sld [smem:[%s3150_s0 + %s2445_s6]]   ;;  %s2448_s18 = smov 4  }
   0x3   :  { %s2526_s13 = sld [smem:[%s3150_s0 + %s2446_s10]]   ;;  %s2449_s22 = smov 5  }
   0x4   :  { %s2531_s17 = sld [smem:[%s3150_s0 + %s2447_s14]]   ;;  %s2450_s26 = smov 6  }
   0x5   :  { %s2536_s21 = sld [smem:[%s3150_s0 + %s2448_s18]]   ;;  %s2451_s30 = smov 7  }
   0x6   :  { %s2541_s25 = sld [smem:[%s3150_s0 + %s2449_s22]]   ;;  %s2452_s4 = smov 8  }
   0x7   :  { %s2546_s29 = sld [smem:[%s3150_s0 + %s2450_s26]]   ;;  %s2453_s10 = smov 9  }
   0x8   :  { %s2551_s3 = sld [smem:[%s3150_s0 + %s2451_s30]]   ;;  %s2454_s15 = smov 10  }
   0x9   :  { %s2556_s8 = sld [smem:[%s3150_s0 + %s2452_s4]]   ;;  %s2455_s20 = smov 11  }
   0xa   :  { %3161 = sst [smem:[#allocation29_spill]] %s2531_s17  ;;  %s2456_s26 = smov 12  }
   0xb   :  { %3162 = sst [smem:[#allocation30_spill]] %s2536_s21  ;;  %s2457_s1 = smov 13  }
   0xc   :  { %3163 = sst [smem:[#allocation31_spill]] %s2541_s25  ;;  %s2458_s7 = smov 14  }
   0xd   :  { %3164 = sst [smem:[#allocation32_spill]] %s2546_s29  ;;  %s2460_s22 = smov 16  }
   0xe   :  { %3165 = sst [smem:[#allocation33_spill]] %s2551_s3  ;;  %s2461_s28 = smov 17  }
   0xf   :  { %3166 = sst [smem:[#allocation34_spill]] %s2556_s8  ;;  %s2484_s23 = smov 40  }
  0x10   :  { %s2561_s14 = sld [smem:[%s3150_s0 + %s2453_s10]]   ;;  %s2486_s10 = smov 42  }
  0x11   :  { %s2566_s19 = sld [smem:[%s3150_s0 + %s2454_s15]]   ;;  %s2459_s15 = smov 15  }
  0x12   :  { %s2571_s24 = sld [smem:[%s3150_s0 + %s2455_s20]]   ;;  %s2487_s16 = smov 43  }
  0x13   :  { %s2576_s30 = sld [smem:[%s3150_s0 + %s2456_s26]]  }
  0x14   :  { %s2581_s6 = sld [smem:[%s3150_s0 + %s2457_s1]]   ;;  %s2485_s1 = smov 41  }
  0x15   :  { %s2586_s12 = sld [smem:[%s3150_s0 + %s2458_s7]]   ;;  %s2462_s7 = smov 18  }
  0x16   :  { %3167 = sst [smem:[#allocation35_spill]] %s2561_s14 }
  0x17   :  { %3168 = sst [smem:[#allocation36_spill]] %s2566_s19 }
  0x18   :  { %3169 = sst [smem:[#allocation37_spill]] %s2571_s24 }
  0x19   :  { %3170 = sst [smem:[#allocation38_spill]] %s2576_s30 }
  0x1a   :  { %3171 = sst [smem:[#allocation39_spill]] %s2581_s6 }
  0x1b   :  { %3172 = sst [smem:[#allocation40_spill]] %s2586_s12 }
  0x1c   :  { %s2591_s20 = sld [smem:[%s3150_s0 + %s2459_s15]]   ;;  %s2463_s15 = smov 19  }
  0x1d   :  { %s2596_s27 = sld [smem:[%s3150_s0 + %s2460_s22]]   ;;  %s2464_s22 = smov 20  }
  0x1e   :  { %s2601_s4 = sld [smem:[%s3150_s0 + %s2461_s28]]   ;;  %s2465_s28 = smov 21  }
  0x1f   :  { %s2606_s12 = sld [smem:[%s3150_s0 + %s2462_s7]]   ;;  %s2466_s7 = smov 22  }
  0x20   :  { %s2611_s6 = sld [smem:[%s3150_s0 + %s2463_s15]]   ;;  %s2467_s15 = smov 23  }
  0x21   :  { %s2631_s14 = sld [smem:[%s3150_s0 + %s2467_s15]]   ;;  %s2471_s15 = smov 27  }
  0x22   :  { %3173 = sst [smem:[#allocation41_spill]] %s2591_s20 }
  0x23   :  { %3174 = sst [smem:[#allocation42_spill]] %s2596_s27 }
  0x24   :  { %s2616_s27 = sld [smem:[%s3150_s0 + %s2464_s22]]   ;;  %s2468_s22 = smov 24  }
  0x25   :  { %3175 = sst [smem:[#allocation43_spill]] %s2606_s12 }
  0x26   :  { %s2621_s20 = sld [smem:[%s3150_s0 + %s2465_s28]]   ;;  %s2469_s28 = smov 25  }
  0x27   :  { %s2626_s12 = sld [smem:[%s3150_s0 + %s2466_s7]]   ;;  %s2470_s7 = smov 26  }
  0x28   :  { %3177 = sst [smem:[#allocation45_spill]] %s2631_s14 }
  0x29   :  { %s2636_s3 = sld [smem:[%s3150_s0 + %s2468_s22]]   ;;  %s2472_s22 = smov 28  }
  0x2a   :  { %s2641_s30 = sld [smem:[%s3150_s0 + %s2469_s28]]   ;;  %s2473_s28 = smov 29  }
  0x2b   :  { %s2651_s14 = sld [smem:[%s3150_s0 + %s2471_s15]]   ;;  %s2475_s15 = smov 31  }
  0x2c   :  { %s2656_s24 = sld [smem:[%s3150_s0 + %s2472_s22]]   ;;  %s2476_s22 = smov 32  }
  0x2d   :  { %3176 = sst [smem:[#allocation44_spill]] %s2626_s12 }
  0x2e   :  { %s2646_s12 = sld [smem:[%s3150_s0 + %s2470_s7]]   ;;  %s2474_s7 = smov 30  }
  0x2f   :  { %s2666_s19 = sld [smem:[%s3150_s0 + %s2474_s7]]   ;;  %s2478_s7 = smov 34  }
  0x30   :  { %3178 = sst [smem:[#allocation46_spill]] %s2641_s30 }
  0x31   :  { %3179 = sst [smem:[#allocation47_spill]] %s2651_s14 }
  0x32   :  { %3180 = sst [smem:[#allocation48_spill]] %s2656_s24 }
  0x33   :  { %s2661_s30 = sld [smem:[%s3150_s0 + %s2473_s28]]   ;;  %s2477_s28 = smov 33  }
  0x34   :  { %s2671_s14 = sld [smem:[%s3150_s0 + %s2475_s15]]   ;;  %s2479_s15 = smov 35  }
  0x35   :  { %s2676_s24 = sld [smem:[%s3150_s0 + %s2476_s22]]   ;;  %s2480_s22 = smov 36  }
  0x36   :  { %s2681_s25 = sld [smem:[%s3150_s0 + %s2477_s28]]   ;;  %s2481_s28 = smov 37  }
  0x37   :  { %s2686_s21 = sld [smem:[%s3150_s0 + %s2478_s7]]   ;;  %s2482_s7 = smov 38  }
  0x38   :  { %s2701_s8 = sld [smem:[%s3150_s0 + %s2481_s28]]  }
  0x39   :  { %s2729_s17 = sld [smem:[%s3150_s0 + %s2487_s16]]   ;;  %s2491_s16 = smov 47  }
  0x3a   :  { %3181 = sst [smem:[#allocation49_spill]] %s2671_s14 }
  0x3b   :  { %3182 = sst [smem:[#allocation50_spill]] %s2676_s24 }
  0x3c   :  { %s2691_s14 = sld [smem:[%s3150_s0 + %s2479_s15]]   ;;  %s2483_s15 = smov 39  }
  0x3d   :  { %3183 = sst [smem:[#allocation51_spill]] %s2686_s21 }
  0x3e   :  { %s2696_s24 = sld [smem:[%s3150_s0 + %s2480_s22]]  }
  0x3f   :  { %3185 = sst [smem:[#allocation53_spill]] %s2701_s8 }
  0x40   :  { %s2706_s21 = sld [smem:[%s3150_s0 + %s2482_s7]]  }
  0x41   :  { %s1983_s29 = sld [smem:[%s3150_s0 + %s2483_s15]]  }
  0x42   :  { %s2719_s8 = sld [smem:[%s3150_s0 + %s2485_s1]]   ;;  %s2489_s1 = smov 45  }
  0x43   :  { %3189 = sst [smem:[#allocation57_spill]] %s2729_s17 }
  0x44   :  { %3184 = sst [smem:[#allocation52_spill]] %s2696_s24 }
  0x45   :  { %s2714_s24 = sld [smem:[%s3150_s0 + %s2484_s23]]   ;;  %s2488_s23 = smov 44  }
  0x46   :  { %3186 = sst [smem:[#allocation54_spill]] %s2706_s21 }
  0x47   :  { %s2724_s21 = sld [smem:[%s3150_s0 + %s2486_s10]]   ;;  %v100_v0 = vstv %s1983_s29  ;;  %s2490_s10 = smov 46  }
  0x48   :  { %3188 = sst [smem:[#allocation56_spill]] %s2719_s8  ;;  %101 = vst [vmem:[#allocation2] sm:$0x1] %v100_v0 }
  0x49   :  { %s2739_s8 = sld [smem:[%s3150_s0 + %s2489_s1]]  }
  0x4a   :  { %s2744_s15 = sld [smem:[%s3150_s0 + %s2490_s10]]  }
  0x4b   :  { %3187 = sst [smem:[#allocation55_spill]] %s2714_s24 }
  0x4c   :  { %s2734_s24 = sld [smem:[%s3150_s0 + %s2488_s23]]  }
  0x4d   :  { %s2749_s23 = sld [smem:[%s3150_s0 + %s2491_s16]]  }
  0x4e   :  { %102 = vsyncpa [#allocation4], 0 }
  0x4f   :  { %103 = vsyncpa [#allocation7], 0 }
  0x50   :  { %104 = vsyncpa [#allocation10], 0 }
  0x51   :  { %105 = vsyncpa [#allocation13], 0 }
  0x52   :  { %106 = vsyncpa [#allocation16], 0 }
  0x53   :  { %107 = vsyncpa [#allocation19], 0 }
  0x54   :  { %108 = vsyncpa [#allocation5], 0  ;;  %s162_s29 = sshll.u32 %s2611_s6, 4  ;;  %s2492_s22 = smov [#allocation6]   ;;  %s163_s29 = int_to_ptr.hbm [resolvable:$true] %s162_s29 }
  0x55   :  { %s164_s26 = sshll.u32 %s2492_s22, 4  ;;  %s188_s1 = sshll.u32 %s2621_s20, 4  ;;  %s165_s26 = int_to_ptr.vmem [resolvable:$true] %s164_s26  ;;  %s189_s1 = int_to_ptr.hbm [resolvable:$true] %s188_s1 }
  0x56   :  { %s2143_s17 = sshra.s32 %s163_s29, 4  ;;  %s2147_s28 = scalar_lea.hbm %s2611_s6, 128  ;;  %s2144_s17 = int_to_ptr.hbm [resolvable:$true] %s2143_s17 }
  0x57   :  { %s2145_s0 = scalar_lea.hbm %s2144_s17, 128  ;;  %p2148_p1 = scmp.lt.s32.totalorder %s2144_s17, %s2611_s6 }
  0x58   :  { %p2146_p0 = scmp.ne.s32.totalorder %s2144_s17, %s2145_s0  ;;  %p2149_p2 = scmp.lt.s32.totalorder %s2147_s28, %s2145_s0 }
  0x5a   :  { %p2150_p3 = por %p2149_p2, %p2148_p1 }
  0x5c   :  { %p2151_p4 = pnand %p2150_p3, %p2146_p0 }
  0x5e   :  { %2154 = shalt.err (!%p2151_p4)
}
  0x5f   :  { %s2493_s2 = smov 128   ;;  %s2494_s10 = smov 8  }
  0x60   :  { %170 = dma.hbm_to_vmem [thread:$0]  %s163_s29, 2048, %s165_s26, [#allocation7], %s2493_s2, %s2493_s2, %s2494_s10  }
  0x61   :  { %s2495_s7 = smov [#allocation9]   ;;  %s220_s16 = sshll.u32 %s2646_s12, 4  ;;  %s2759_s16 = int_to_ptr.hbm [resolvable:$true] %s220_s16 }
  0x62   :  { %s190_s11 = sshll.u32 %s2495_s7, 4  ;;  %s2167_s6 = sshra.s32 %s189_s1, 4  ;;  %s191_s11 = int_to_ptr.vmem [resolvable:$true] %s190_s11  ;;  %s2168_s6 = int_to_ptr.hbm [resolvable:$true] %s2167_s6 }
  0x63   :  { %s2169_s18 = scalar_lea.hbm %s2168_s6, 128  ;;  %s2171_s22 = scalar_lea.hbm %s2621_s20, 128 }
  0x64   :  { %p2170_p5 = scmp.ne.s32.totalorder %s2168_s6, %s2169_s18  ;;  %p2172_p6 = scmp.lt.s32.totalorder %s2168_s6, %s2621_s20 }
  0x65   :  { %p2173_p7 = scmp.lt.s32.totalorder %s2171_s22, %s2169_s18 }
  0x67   :  { %p2174_p8 = por %p2173_p7, %p2172_p6 }
  0x69   :  { %p2175_p9 = pnand %p2174_p8, %p2170_p5 }
  0x6b   :  { %2178 = shalt.err (!%p2175_p9)
}
  0x6c   :  { %196 = dma.hbm_to_vmem [thread:$0]  %s189_s1, 2048, %s191_s11, [#allocation10], %s2493_s2, %s2493_s2, %s2494_s10  }
  0x6d   :  { %s250_s29 = sshll.u32 %s2666_s19, 4  ;;  %s2496_s26 = smov [#allocation12]   ;;  %s2767_s29 = int_to_ptr.hbm [resolvable:$true] %s250_s29 }
  0x6e   :  { %s222_s17 = sshll.u32 %s2496_s26, 4  ;;  %s2191_s0 = sshra.s32 %s2759_s16, 4  ;;  %s223_s17 = int_to_ptr.vmem [resolvable:$true] %s222_s17  ;;  %s2192_s0 = int_to_ptr.hbm [resolvable:$true] %s2191_s0 }
  0x6f   :  { %s2193_s20 = scalar_lea.hbm %s2192_s0, 128  ;;  %s2195_s28 = scalar_lea.hbm %s2646_s12, 128 }
  0x70   :  { %p2194_p10 = scmp.ne.s32.totalorder %s2192_s0, %s2193_s20  ;;  %p2196_p11 = scmp.lt.s32.totalorder %s2192_s0, %s2646_s12 }
  0x71   :  { %p2197_p12 = scmp.lt.s32.totalorder %s2195_s28, %s2193_s20 }
  0x73   :  { %p2198_p13 = por %p2197_p12, %p2196_p11 }
  0x75   :  { %p2199_p0 = pnand %p2198_p13, %p2194_p10 }
  0x77   :  { %2202 = shalt.err (!%p2199_p0)
}
  0x78   :  { %228 = dma.hbm_to_vmem [thread:$0]  %s2759_s16, 2048, %s223_s17, [#allocation13], %s2493_s2, %s2493_s2, %s2494_s10  }
  0x79   :  { %s2497_s1 = smov [#allocation15]   ;;  %s282_s11 = sshll.u32 %s2691_s14, 4  ;;  %s2777_s11 = int_to_ptr.hbm [resolvable:$true] %s282_s11 }
  0x7a   :  { %s252_s7 = sshll.u32 %s2497_s1, 4  ;;  %s2215_s12 = sshra.s32 %s2767_s29, 4  ;;  %s253_s7 = int_to_ptr.vmem [resolvable:$true] %s252_s7  ;;  %s2216_s12 = int_to_ptr.hbm [resolvable:$true] %s2215_s12 }
  0x7b   :  { %s2217_s6 = scalar_lea.hbm %s2216_s12, 128  ;;  %s2219_s18 = scalar_lea.hbm %s2666_s19, 128 }
  0x7c   :  { %p2218_p1 = scmp.ne.s32.totalorder %s2216_s12, %s2217_s6  ;;  %p2220_p2 = scmp.lt.s32.totalorder %s2216_s12, %s2666_s19 }
  0x7d   :  { %p2221_p3 = scmp.lt.s32.totalorder %s2219_s18, %s2217_s6 }
  0x7f   :  { %p2222_p4 = por %p2221_p3, %p2220_p2 }
  0x81   :  { %p2223_p5 = pnand %p2222_p4, %p2218_p1 }
  0x83   :  { %2226 = shalt.err (!%p2223_p5)
}
  0x84   :  { %258 = dma.hbm_to_vmem [thread:$0]  %s2767_s29, 2048, %s253_s7, [#allocation16], %s2493_s2, %s2493_s2, %s2494_s10  }
  0x85   :  { %s147_s16 = sshll.u32 %s2601_s4, 4  ;;  %s2498_s22 = smov [#allocation18]   ;;  %s2787_s16 = int_to_ptr.hbm [resolvable:$true] %s147_s16 }
  0x86   :  { %s284_s26 = sshll.u32 %s2498_s22, 4  ;;  %s2239_s19 = sshra.s32 %s2777_s11, 4  ;;  %s285_s26 = int_to_ptr.vmem [resolvable:$true] %s284_s26  ;;  %s2240_s19 = int_to_ptr.hbm [resolvable:$true] %s2239_s19 }
  0x87   :  { %s2241_s17 = scalar_lea.hbm %s2240_s19, 128  ;;  %s2243_s0 = scalar_lea.hbm %s2691_s14, 128 }
  0x88   :  { %p2242_p6 = scmp.ne.s32.totalorder %s2240_s19, %s2241_s17  ;;  %p2244_p7 = scmp.lt.s32.totalorder %s2240_s19, %s2691_s14 }
  0x89   :  { %p2245_p8 = scmp.lt.s32.totalorder %s2243_s0, %s2241_s17 }
  0x8b   :  { %p2246_p9 = por %p2245_p8, %p2244_p7 }
  0x8d   :  { %p2247_p10 = pnand %p2246_p9, %p2242_p6 }
  0x8f   :  { %2250 = shalt.err (!%p2247_p10)
}
  0x90   :  { %290 = dma.hbm_to_vmem [thread:$0]  %s2777_s11, 2048, %s285_s26, [#allocation19], %s2493_s2, %s2493_s2, %s2494_s10  }
  0x91   :  { %s2499_s29 = smov [#allocation3]   ;;  %s175_s28 = sshll.u32 %s2616_s27, 4  ;;  %s2797_s28 = int_to_ptr.hbm [resolvable:$true] %s175_s28 }
  0x92   :  { %s149_s20 = sshll.u32 %s2499_s29, 4  ;;  %s2263_s14 = sshra.s32 %s2787_s16, 4  ;;  %s150_s20 = int_to_ptr.vmem [resolvable:$true] %s149_s20  ;;  %s2264_s14 = int_to_ptr.hbm [resolvable:$true] %s2263_s14 }
  0x93   :  { %s2265_s1 = scalar_lea.hbm %s2264_s14, 128  ;;  %s2267_s7 = scalar_lea.hbm %s2601_s4, 128 }
  0x94   :  { %p2266_p11 = scmp.ne.s32.totalorder %s2264_s14, %s2265_s1  ;;  %p2268_p12 = scmp.lt.s32.totalorder %s2264_s14, %s2601_s4 }
  0x95   :  { %p2269_p13 = scmp.lt.s32.totalorder %s2267_s7, %s2265_s1 }
  0x97   :  { %p2270_p0 = por %p2269_p13, %p2268_p12 }
  0x99   :  { %p2271_p1 = pnand %p2270_p0, %p2266_p11 }
  0x9b   :  { %2274 = shalt.err (!%p2271_p1)
}
  0x9c   :  { %155 = dma.hbm_to_vmem [thread:$0]  %s2787_s16, 2048, %s150_s20, [#allocation4], %s2493_s2, %s2493_s2, %s2494_s10  }
  0x9d   :  { %s205_s11 = sshll.u32 %s2636_s3, 4  ;;  %s2500_s12 = smov [#allocation8]   ;;  %s2807_s11 = int_to_ptr.hbm [resolvable:$true] %s205_s11 }
  0x9e   :  { %s177_s6 = sshll.u32 %s2500_s12, 4  ;;  %s2287_s4 = sshra.s32 %s2797_s28, 4  ;;  %s178_s6 = int_to_ptr.vmem [resolvable:$true] %s177_s6  ;;  %s2288_s4 = int_to_ptr.hbm [resolvable:$true] %s2287_s4 }
  0x9f   :  { %s2289_s18 = scalar_lea.hbm %s2288_s4, 128  ;;  %s2291_s22 = scalar_lea.hbm %s2616_s27, 128 }
  0xa0   :  { %p2290_p2 = scmp.ne.s32.totalorder %s2288_s4, %s2289_s18  ;;  %p2292_p3 = scmp.lt.s32.totalorder %s2288_s4, %s2616_s27 }
  0xa1   :  { %p2293_p4 = scmp.lt.s32.totalorder %s2291_s22, %s2289_s18 }
  0xa3   :  { %p2294_p5 = por %p2293_p4, %p2292_p3 }
  0xa5   :  { %p2295_p6 = pnand %p2294_p5, %p2290_p2 }
  0xa7   :  { %2298 = shalt.err (!%p2295_p6)
}
  0xa8   :  { %183 = dma.hbm_to_vmem [thread:$0]  %s2797_s28, 2048, %s178_s6, [#allocation7], %s2493_s2, %s2493_s2, %s2494_s10  }
  0xa9   :  { %s2501_s16 = smov [#allocation11]   ;;  %s237_s19 = sshll.u32 %s2661_s30, 4  ;;  %s2817_s19 = int_to_ptr.hbm [resolvable:$true] %s237_s19 }
  0xaa   :  { %s207_s26 = sshll.u32 %s2501_s16, 4  ;;  %s2311_s27 = sshra.s32 %s2807_s11, 4  ;;  %s208_s26 = int_to_ptr.vmem [resolvable:$true] %s207_s26  ;;  %s2312_s27 = int_to_ptr.hbm [resolvable:$true] %s2311_s27 }
  0xab   :  { %s2313_s17 = scalar_lea.hbm %s2312_s27, 128  ;;  %s2315_s0 = scalar_lea.hbm %s2636_s3, 128 }
  0xac   :  { %p2314_p7 = scmp.ne.s32.totalorder %s2312_s27, %s2313_s17  ;;  %p2316_p8 = scmp.lt.s32.totalorder %s2312_s27, %s2636_s3 }
  0xad   :  { %p2317_p9 = scmp.lt.s32.totalorder %s2315_s0, %s2313_s17 }
  0xaf   :  { %p2318_p10 = por %p2317_p9, %p2316_p8 }
  0xb1   :  { %p2319_p11 = pnand %p2318_p10, %p2314_p7 }
  0xb3   :  { %2322 = shalt.err (!%p2319_p11)
}
  0xb4   :  { %213 = dma.hbm_to_vmem [thread:$0]  %s2807_s11, 2048, %s208_s26, [#allocation10], %s2493_s2, %s2493_s2, %s2494_s10  }
  0xb5   :  { %s267_s29 = sshll.u32 %s2681_s25, 4  ;;  %s2502_s20 = smov [#allocation14]   ;;  %s2827_s29 = int_to_ptr.hbm [resolvable:$true] %s267_s29 }
  0xb6   :  { %s239_s28 = sshll.u32 %s2502_s20, 4  ;;  %s2335_s3 = sshra.s32 %s2817_s19, 4  ;;  %s240_s28 = int_to_ptr.vmem [resolvable:$true] %s239_s28  ;;  %s2336_s3 = int_to_ptr.hbm [resolvable:$true] %s2335_s3 }
  0xb7   :  { %s2337_s14 = scalar_lea.hbm %s2336_s3, 128  ;;  %s2339_s1 = scalar_lea.hbm %s2661_s30, 128 }
  0xb8   :  { %p2338_p12 = scmp.ne.s32.totalorder %s2336_s3, %s2337_s14  ;;  %p2340_p13 = scmp.lt.s32.totalorder %s2336_s3, %s2661_s30 }
  0xb9   :  { %p2341_p0 = scmp.lt.s32.totalorder %s2339_s1, %s2337_s14 }
  0xbb   :  { %p2342_p1 = por %p2341_p0, %p2340_p13 }
  0xbd   :  { %p2343_p2 = pnand %p2342_p1, %p2338_p12 }
  0xbf   :  { %2346 = shalt.err (!%p2343_p2)
}
  0xc0   :  { %245 = dma.hbm_to_vmem [thread:$0]  %s2817_s19, 2048, %s240_s28, [#allocation13], %s2493_s2, %s2493_s2, %s2494_s10  }
  0xc1   :  { %s2503_s7 = smov [#allocation17]   ;;  %s307_s12 = sshll.u32 %s2724_s21, 4  ;;  %s308_s12 = int_to_ptr.hbm [resolvable:$true] %s307_s12 }
  0xc2   :  { %s269_s11 = sshll.u32 %s2503_s7, 4  ;;  %s2359_s6 = sshra.s32 %s2827_s29, 4  ;;  %s270_s11 = int_to_ptr.vmem [resolvable:$true] %s269_s11  ;;  %s2360_s6 = int_to_ptr.hbm [resolvable:$true] %s2359_s6 }
  0xc3   :  { %s2361_s30 = scalar_lea.hbm %s2360_s6, 128  ;;  %s2363_s4 = scalar_lea.hbm %s2681_s25, 128 }
  0xc4   :  { %p2362_p3 = scmp.ne.s32.totalorder %s2360_s6, %s2361_s30  ;;  %p2364_p4 = scmp.lt.s32.totalorder %s2360_s6, %s2681_s25 }
  0xc5   :  { %p2365_p5 = scmp.lt.s32.totalorder %s2363_s4, %s2361_s30 }
  0xc7   :  { %p2366_p6 = por %p2365_p5, %p2364_p4 }
  0xc9   :  { %p2367_p7 = pnand %p2366_p6, %p2362_p3 }
  0xcb   :  { %2370 = shalt.err (!%p2367_p7)
}
  0xcc   :  { %275 = dma.hbm_to_vmem [thread:$0]  %s2827_s29, 2048, %s270_s11, [#allocation16], %s2493_s2, %s2493_s2, %s2494_s10  }
  0xcd   :  { %s2504_s18 = smov [#allocation20]   ;;  %s2383_s16 = sshra.s32 %s308_s12, 4  ;;  %s2384_s16 = int_to_ptr.hbm [resolvable:$true] %s2383_s16 }
  0xce   :  { %s309_s22 = sshll.u32 %s2504_s18, 4  ;;  %s2385_s26 = scalar_lea.hbm %s2384_s16, 128  ;;  %s310_s22 = int_to_ptr.vmem [resolvable:$true] %s309_s22 }
  0xcf   :  { %p2386_p8 = scmp.ne.s32.totalorder %s2384_s16, %s2385_s26  ;;  %s2387_s25 = scalar_lea.hbm %s2724_s21, 128 }
  0xd0   :  { %p2388_p9 = scmp.lt.s32.totalorder %s2384_s16, %s2724_s21  ;;  %p2389_p10 = scmp.lt.s32.totalorder %s2387_s25, %s2385_s26 }
  0xd2   :  { %p2390_p11 = por %p2389_p10, %p2388_p9 }
  0xd4   :  { %p2391_p12 = pnand %p2390_p11, %p2386_p8 }
  0xd6   :  { %2394 = shalt.err (!%p2391_p12)
}
  0xd7   :  { %315 = dma.hbm_to_vmem [thread:$0]  %s308_s12, 2048, %s310_s22, [#allocation19], %s2493_s2, %s2493_s2, %s2494_s10  }
  0xd8   :  { %2431 = dma.done.wait [#allocation4], 2048  }
  0xd9   :  { %2432 = vsyncadd [#allocation4], 4294965248 }
  0xda   :  { %2433 = dma.done.wait [#allocation7], 4096  }
  0xdb   :  { %2434 = vsyncadd [#allocation7], 4294963200 }
  0xdc   :  { %2435 = dma.done.wait [#allocation10], 4096  }
  0xdd   :  { %2436 = vsyncadd [#allocation10], 4294963200 }
  0xde   :  { %2437 = dma.done.wait [#allocation13], 4096  }
  0xdf   :  { %2438 = vsyncadd [#allocation13], 4294963200 }
  0xe0   :  { %2439 = dma.done.wait [#allocation16], 4096  }
  0xe1   :  { %2440 = vsyncadd [#allocation16], 4294963200 }
  0xe2   :  { %2441 = dma.done.wait [#allocation19], 4096  }
  0xe3   :  { %2442 = vsyncadd [#allocation19], 4294963200  ;;  %s3190_s21 = sld [smem:[#allocation29_spill]]  ;;  %v371_v1 = vld [vmem:[%s2526_s13] sm:$0xff]  ;;  %v372_v2 = vld [vmem:[%s2526_s13 + $0x8] sm:$0xff]  ;;  %vm729_vm0 = vcmask 130048  }
  0xe4   :  { %v369_v3 = vld [vmem:[%s2521_s9] sm:$0xff]  ;;  %v747_v4 = vpack.c.bf16 %v372_v2, %v371_v1  ;;  %v370_v5 = vld [vmem:[%s2521_s9 + $0x8] sm:$0xff]  ;;  %vm839_vm1 = vcmask 1043456   ;;  %vm809_vm2 = vcmask 64512   ;;  %v2505_v57 = vmov 128.0   ;;  %s3192_s9 = sld [smem:[#allocation34_spill]] }
  0xe5   :  { %v725_v6 = vld [vmem:[%s2516_s5] sm:$0xff]  ;;  %v726_v7 = vld [vmem:[%s2516_s5 + $0x8] sm:$0xff]  ;;  %v728_v8 = vpack.c.bf16 %v370_v5, %v369_v3  ;;  %s3191_s5 = sld [smem:[#allocation32_spill]] }
  0xe6   :  { %v727_v9 = vpack.c.bf16 %v726_v7, %v725_v6  ;;  %755 = vmatpush.bf16.msra.mxu3 %v747_v4  ;;  %s3193_s13 = sld [smem:[#allocation30_spill]] }
  0xe7   :  { %740 = vmatpush.bf16.msra.mxu0 %v728_v8  ;;  %s3194_s2 = sld [smem:[#allocation31_spill]] }
  0xe8   :  { %s3195_s10 = sld [smem:[#allocation36_spill]] }
  0xe9   :  { %v373_v10 = vld [vmem:[%s3190_s21] sm:$0xff]  ;;  %v374_v11 = vld [vmem:[%s3190_s21 + $0x8] sm:$0xff]  ;;  %1993 = vmatmul.msk.bf16.vlgmr.msra.gmra.mxu3 %vm729_vm0, %v727_v9  ;;  %s3196_s19 = sld [smem:[#allocation37_spill]] }
  0xea   :  { %v762_v12 = vpack.c.bf16 %v374_v11, %v373_v10  ;;  %1992 = vmatmul.msk.bf16.vlgmr.msra.gmra.mxu0 %vm729_vm0, %v727_v9  ;;  %s3197_s27 = sld [smem:[#allocation38_spill]] }
  0xeb   :  { %v391_v8 = vld [vmem:[%s3191_s5 + $0x70] sm:$0xff]  ;;  %v389_v11 = vld [vmem:[%s3191_s5 + $0x60] sm:$0xff]  ;;  %s3198_s17 = sld [smem:[#allocation33_spill]] }
  0xec   :  { %770 = vmatpush.bf16.msra.mxu2 %v762_v12  ;;  %v390_v12 = vld [vmem:[%s3191_s5 + $0x68] sm:$0xff]  ;;  %s3199_s0 = sld [smem:[#allocation35_spill]] }
  0xed   :  { %s3200_s29 = sld [smem:[#allocation41_spill]] }
  0xee   :  { %s3201_s20 = sld [smem:[#allocation39_spill]] }
  0xef   :  { %1994 = vmatmul.msk.bf16.vlgmr.msra.gmra.mxu2 %vm729_vm0, %v727_v9  ;;  %v392_v9 = vld [vmem:[%s3191_s5 + $0x78] sm:$0xff]  ;;  %s3202_s28 = sld [smem:[#allocation40_spill]] }
  0xf0   :  { %v940_v10 = vpack.c.bf16 %v392_v9, %v391_v8  ;;  %v2070_v9 = vld [vmem:[%s3194_s2] ss:$0 sm:$0xff]  ;;  %s3203_s3 = sld [smem:[#allocation42_spill]] }
  0xf1   :  { %s3204_s14 = sld [smem:[#allocation43_spill]] }
  0xf2   :  { %s3205_s1 = sld [smem:[#allocation44_spill]] }
  0xf3   :  { %s3206_s7 = sld [smem:[#allocation45_spill]] }
  0xf4   :  { %s3207_s11 = sld [smem:[#allocation46_spill]] }
  0xf5   :  { %s3208_s12 = sld [smem:[#allocation48_spill]] }
  0xf6   :  { %s3209_s6 = sld [smem:[#allocation47_spill]] }
  0xf7   :  { %s3210_s30 = sld [smem:[#allocation49_spill]] }
  0xf8   :  { %s3211_s4 = sld [smem:[#allocation50_spill]] }
  0xf9   :  { %s3212_s18 = sld [smem:[#allocation53_spill]] }
  0xfa   :  { %s3213_s22 = sld [smem:[#allocation51_spill]] }
  0xfb   :  { %s3214_s16 = sld [smem:[#allocation52_spill]] }
  0xfc   :  { %s3215_s26 = sld [smem:[#allocation55_spill]] }
  0xfd   :  { %s3216_s25 = sld [smem:[#allocation57_spill]] }
  0xfe   :  { %s3217_s21 = sld [smem:[#allocation54_spill]] }
 0x167   :  { %v742_v13 = vpop.f32.mrf.mxu0 }
 0x168   :  { %v777_v16 = vmul.f32 0.088388346, %v742_v13  ;;  %v939_v13 = vpack.c.bf16 %v390_v12, %v389_v11 }
 0x16a   :  { %v779_v20 = vpack.c.bf16 %v777_v16, %v777_v16 }
 0x16c   :  { %v757_v14 = vpop.f32.mrf.mxu3 }
 0x16d   :  { %v781_v15 = vpack.c.bf16 %v757_v14, %v757_v14  ;;  %v387_v14 = vld [vmem:[%s3191_s5 + $0x50] sm:$0xff] }
 0x16f   :  { %790 = vmatpush.bf16.xpose.msrb.mxu3 %v781_v15  ;;  %v744_v22 = vpop.f32.mrf.mxu0  ;;  %v388_v15 = vld [vmem:[%s3191_s5 + $0x58] sm:$0xff] }
 0x170   :  { %v778_v26 = vmul.f32 0.088388346, %v744_v22  ;;  %v938_v16 = vpack.c.bf16 %v388_v15, %v387_v14  ;;  %v401_v14 = vld [vmem:[%s3192_s9 + $0x38] sm:$0xff] }
 0x172   :  { %v772_v17 = vpop.f32.mrf.mxu2  ;;  %v780_v28 = vpack.c.bf16 %v778_v26, %v778_v26  ;;  %v379_v26 = vld [vmem:[%s3191_s5 + $0x10] sm:$0xff] }
 0x173   :  { %v834_v18 = vpack.c.bf16 %v772_v17, %v772_v17  ;;  %v385_v17 = vld [vmem:[%s3191_s5 + $0x40] sm:$0xff] }
 0x174   :  { %v759_v21 = vpop.f32.mrf.mxu3 }
 0x175   :  { %v841_v19 = vsel %vm839_vm1, %v834_v18, 0  ;;  %v782_v23 = vpack.c.bf16 %v759_v21, %v759_v21  ;;  %v386_v18 = vld [vmem:[%s3191_s5 + $0x48] sm:$0xff]  ;;  %v384_v21 = vld [vmem:[%s3191_s5 + $0x38] sm:$0xff] }
 0x176   :  { %850 = vmatpush.bf16.msra.mxu1 %v841_v19  ;;  %791 = vmatmul.bf16.vlgmr.msrb.gmra.mxu3 %v779_v20  ;;  %v937_v19 = vpack.c.bf16 %v386_v18, %v385_v17  ;;  %v383_v20 = vld [vmem:[%s3191_s5 + $0x30] sm:$0xff] }
 0x177   :  { %803 = vmatpush.bf16.xpose.msrb.mxu2 %v782_v23  ;;  %944 = vmatpush.bf16.msra.mxu3 %v940_v10  ;;  %v936_v22 = vpack.c.bf16 %v384_v21, %v383_v20  ;;  %v381_v23 = vld [vmem:[%s3191_s5 + $0x20] sm:$0xff]  ;;  %v396_v18 = vld [vmem:[%s3192_s9 + $0x10] sm:$0xff] }
 0x178   :  { %v394_v21 = vld [vmem:[%s3192_s9] sm:$0xff] }
 0x17a   :  { %v774_v24 = vpop.f32.mrf.mxu2 }
 0x17b   :  { %v835_v25 = vpack.c.bf16 %v774_v24, %v774_v24  ;;  %945 = vmatpush.bf16.msra.mxu3 %v939_v13  ;;  %v382_v24 = vld [vmem:[%s3191_s5 + $0x28] sm:$0xff] }
 0x17d   :  { %v860_v27 = vsel %vm839_vm1, %v835_v25, 0  ;;  %v935_v25 = vpack.c.bf16 %v382_v24, %v381_v23  ;;  %v425_v24 = vld [vmem:[%s3195_s10 + $0x70] sm:$0xff] }
 0x17e   :  { %804 = vmatmul.bf16.vlgmr.msrb.gmra.mxu2 %v780_v28 }
 0x17f   :  { %869 = vmatpush.bf16.msra.mxu2 %v860_v27  ;;  %946 = vmatpush.bf16.msra.mxu3 %v938_v16  ;;  %v380_v27 = vld [vmem:[%s3191_s5 + $0x18] sm:$0xff]  ;;  %v398_v16 = vld [vmem:[%s3192_s9 + $0x20] sm:$0xff] }
 0x180   :  { %v934_v28 = vpack.c.bf16 %v380_v27, %v379_v26  ;;  %v441_v26 = vld [vmem:[%s3196_s19 + $0x70] sm:$0xff] }
 0x183   :  { %947 = vmatpush.bf16.msra.mxu3 %v937_v19  ;;  %v397_v19 = vld [vmem:[%s3192_s9 + $0x18] sm:$0xff] }
 0x184   :  { %v962_v20 = vpack.c.bf16 %v397_v19, %v396_v18  ;;  %v431_v18 = vld [vmem:[%s3196_s19 + $0x20] sm:$0xff] }
 0x187   :  { %948 = vmatpush.bf16.msra.mxu3 %v936_v22  ;;  %v395_v22 = vld [vmem:[%s3192_s9 + $0x8] sm:$0xff] }
 0x188   :  { %v961_v23 = vpack.c.bf16 %v395_v22, %v394_v21  ;;  %v447_v21 = vld [vmem:[%s3197_s27 + $0x20] sm:$0xff]  ;;  %v448_v22 = vld [vmem:[%s3197_s27 + $0x28] sm:$0xff] }
 0x18b   :  { %949 = vmatpush.bf16.msra.mxu3 %v935_v25  ;;  %v426_v25 = vld [vmem:[%s3195_s10 + $0x78] sm:$0xff] }
 0x18c   :  { %v996_v27 = vpack.c.bf16 %v426_v25, %v425_v24  ;;  %v1035_v24 = vpack.c.bf16 %v448_v22, %v447_v21  ;;  %v413_v25 = vld [vmem:[%s3195_s10 + $0x10] sm:$0xff] }
 0x18e   :  { %997 = vmatpush.bf16.msrb.mxu1 %v996_v27  ;;  %v429_v27 = vld [vmem:[%s3196_s19 + $0x10] sm:$0xff] }
 0x18f   :  { %950 = vmatpush.bf16.msra.mxu3 %v934_v28  ;;  %v442_v28 = vld [vmem:[%s3196_s19 + $0x78] sm:$0xff] }
 0x1f9   :  { %v792_v29 = vpop.f32.mrf.mxu3 }
 0x1fa   :  { %v810_v34 = vsel %vm809_vm2, %v792_v29, -inf }
 0x201   :  { %v794_v30 = vpop.f32.mrf.mxu3  ;;  %v805_v31 = vpop.f32.mrf.mxu2 }
 0x202   :  { %v813_v32 = vsel %vm809_vm2, %v805_v31, -inf  ;;  %v378_v30 = vld [vmem:[%s3191_s5 + $0x8] sm:$0xff] }
 0x203   :  { %814 = vmax.xlane.f32.xlu0 %v813_v32 }
 0x209   :  { %v807_v33 = vpop.f32.mrf.mxu2 }
 0x20b   :  { %811 = vmax.xlane.f32.xlu0 %v810_v34 }
 0x276   :  { %v815_v35 = vpop.xlane.xlu0 %814 }
 0x277   :  { %v817_v36 = vsub.f32 %v805_v31, %v815_v35  ;;  %v408_v35 = vld [vmem:[%s3192_s9 + $0x70] sm:$0xff] }
 0x279   :  { %v820_v37 = vmul.f32 1.442695, %v817_v36  ;;  %v409_v36 = vld [vmem:[%s3192_s9 + $0x78] sm:$0xff] }
 0x27b   :  { %2091 = vpow2.f32 %v820_v37  ;;  %v406_v37 = vld [vmem:[%s3192_s9 + $0x60] sm:$0xff] }
 0x27e   :  { %v812_v38 = vpop.xlane.xlu0 %811 }
 0x27f   :  { %v816_v39 = vsub.f32 %v792_v29, %v812_v38  ;;  %v377_v29 = vld [vmem:[%s3191_s5] sm:$0xff]  ;;  %s2507_s5 = smov [#allocation21]  }
 0x280   :  { %v933_v32 = vpack.c.bf16 %v378_v30, %v377_v29  ;;  %v457_v29 = vld [vmem:[%s3197_s27 + $0x70] sm:$0xff]  ;;  %v458_v30 = vld [vmem:[%s3197_s27 + $0x78] sm:$0xff] }
 0x281   :  { %v2092_v40 = vpop.eup %2091  ;;  %v818_v41 = vmul.f32 1.442695, %v816_v39  ;;  %v968_v39 = vpack.c.bf16 %v409_v36, %v408_v35  ;;  %v439_v35 = vld [vmem:[%s3196_s19 + $0x60] sm:$0xff] }
 0x282   :  { %v825_v42 = vsel %vm809_vm2, %v2092_v40, 0.0  ;;  %951 = vmatpush.bf16.msra.mxu3 %v933_v32  ;;  %v1040_v32 = vpack.c.bf16 %v458_v30, %v457_v29  ;;  %v430_v29 = vld [vmem:[%s3196_s19 + $0x18] sm:$0xff]  ;;  %v445_v30 = vld [vmem:[%s3197_s27 + $0x10] sm:$0xff] }
 0x283   :  { %2093 = vpow2.f32 %v818_v41  ;;  %826 = vadd.xlane.f32.xlu1 %v825_v42  ;;  %972 = vmatpush.bf16.msrb.mxu0 %v968_v39  ;;  %v456_v39 = vld [vmem:[%s3197_s27 + $0x68] sm:$0xff] }
 0x286   :  { %1041 = vmatpush.bf16.msrb.mxu3 %v1040_v32  ;;  %v1012_v32 = vpack.c.bf16 %v430_v29, %v429_v27 }
 0x289   :  { %v2094_v43 = vpop.eup %2093 }
 0x28a   :  { %v822_v44 = vsel %vm809_vm2, %v2094_v43, 0.0 }
 0x28b   :  { %823 = vadd.xlane.f32.xlu1 %v822_v44 }
 0x2f6   :  { %v827_v45 = vpop.xlane.xlu1 %826 }
 0x2f7   :  { %2095 = vrcp.f32 %v827_v45  ;;  %v404_v45 = vld [vmem:[%s3192_s9 + $0x50] sm:$0xff] }
 0x2fd   :  { %v2096_v46 = vpop.eup %2095 }
 0x2fe   :  { %v831_v47 = vmul.f32 %v2096_v46, %v2092_v40  ;;  %v824_v48 = vpop.xlane.xlu1 %823  ;;  %v407_v40 = vld [vmem:[%s3192_s9 + $0x68] sm:$0xff]  ;;  %v405_v46 = vld [vmem:[%s3192_s9 + $0x58] sm:$0xff] }
 0x2ff   :  { %2097 = vrcp.f32 %v824_v48  ;;  %v967_v42 = vpack.c.bf16 %v407_v40, %v406_v37  ;;  %v440_v37 = vld [vmem:[%s3196_s19 + $0x68] sm:$0xff] }
 0x300   :  { %v833_v49 = vpack.c.bf16 %v831_v47, %v831_v47  ;;  %2099 = vrcp.f32 %v2505_v57  ;;  %v1017_v40 = vpack.c.bf16 %v440_v37, %v439_v35  ;;  %v412_v35 = vld [vmem:[%s3195_s10 + $0x8] sm:$0xff] }
 0x301   :  { %973 = vmatpush.bf16.msrb.mxu0 %v967_v42  ;;  %v421_v42 = vld [vmem:[%s3195_s10 + $0x50] sm:$0xff] }
 0x302   :  { %1996 = vmatmul.msk.bf16.vlgmr.msra.gmra.mxu2 %vm809_vm2, %v833_v49  ;;  %v966_v49 = vpack.c.bf16 %v405_v46, %v404_v45  ;;  %v438_v45 = vld [vmem:[%s3196_s19 + $0x58] sm:$0xff]  ;;  %v453_v46 = vld [vmem:[%s3197_s27 + $0x50] sm:$0xff] }
 0x305   :  { %v2098_v50 = vpop.eup %2097  ;;  %974 = vmatpush.bf16.msrb.mxu0 %v966_v49 }
 0x306   :  { %v830_v51 = vmul.f32 %v2098_v50, %v2094_v43  ;;  %v2100_v58 = vpop.eup %2099  ;;  %v402_v50 = vld [vmem:[%s3192_s9 + $0x40] sm:$0xff] }
 0x307   :  { %v880_v59 = vmul.f32 128.0, %v2100_v58  ;;  %vm884_vm3 = vweird.f32 %v2100_v58 }
 0x308   :  { %v832_v52 = vpack.c.bf16 %v830_v51, %v830_v51  ;;  %v403_v51 = vld [vmem:[%s3192_s9 + $0x48] sm:$0xff] }
 0x309   :  { %v881_v60 = vsub.f32 1.0, %v880_v59 }
 0x30a   :  { %1995 = vmatmul.msk.bf16.vlgmr.msra.gmra.mxu1 %vm809_vm2, %v832_v52 }
 0x30b   :  { %v882_v61 = vmul.f32 %v2100_v58, %v881_v60 }
 0x30d   :  { %v883_v62 = vadd.f32 %v2100_v58, %v882_v61 }
 0x30f   :  { %v2871_v63 = vsel %vm884_vm3, %v2100_v58, %v883_v62 }
 0x385   :  { %v2865_v53 = vpop.f32.mrf.mxu2 }
 0x387   :  { %v2867_v54 = vpop.f32.mrf.mxu1 }
 0x388   :  { %875 = vadd.xlane.f32.xlu2 %v2867_v54 }
 0x38d   :  { %v873_v55 = vpop.f32.mrf.mxu2 }
 0x38f   :  { %v854_v56 = vpop.f32.mrf.mxu1 }
 0x390   :  { %877 = vadd.xlane.f32.xlu2 %v2865_v53  ;;  %v965_v56 = vpack.c.bf16 %v403_v51, %v402_v50  ;;  %v419_v51 = vld [vmem:[%s3195_s10 + $0x40] sm:$0xff] }
 0x392   :  { %975 = vmatpush.bf16.msrb.mxu0 %v965_v56  ;;  %v436_v56 = vld [vmem:[%s3196_s19 + $0x48] sm:$0xff] }
 0x3fb   :  { %v876_v0 = vpop.xlane.xlu2 %875 }
 0x3fc   :  { %v886_v1 = vmul.f32 %v2871_v63, %v876_v0 }
 0x3fe   :  { %v2875_v2 = vsub.f32 %v2867_v54, %v886_v1 }
 0x400   :  { %v890_v3 = vmul.f32 %v2875_v2, %v2875_v2 }
 0x402   :  { %892 = vadd.xlane.f32.xlu0 %v890_v3  ;;  %v2069_v3 = vld [vmem:[%s3193_s13] ss:$0 sm:$0xff] }
 0x403   :  { %v878_v4 = vpop.xlane.xlu2 %877 }
 0x404   :  { %v887_v5 = vmul.f32 %v2871_v63, %v878_v4 }
 0x406   :  { %v2881_v6 = vsub.f32 %v2865_v53, %v887_v5 }
 0x408   :  { %v891_v7 = vmul.f32 %v2881_v6, %v2881_v6 }
 0x40a   :  { %894 = vadd.xlane.f32.xlu1 %v891_v7 }
 0x475   :  { %v893_v31 = vpop.xlane.xlu0 %892 }
 0x476   :  { %v896_v33 = vmul.f32 %v893_v31, %v2871_v63  ;;  %v1018_v31 = vpack.c.bf16 %v442_v28, %v441_v26  ;;  %v414_v26 = vld [vmem:[%s3195_s10 + $0x18] sm:$0xff] }
 0x477   :  { %v990_v28 = vpack.c.bf16 %v414_v26, %v413_v25 }
 0x478   :  { %v898_v34 = vadd.f32 1e-05, %v896_v33  ;;  %v423_v33 = vld [vmem:[%s3195_s10 + $0x60] sm:$0xff]  ;;  %1019 = vmatpush.bf16.msrb.mxu2 %v1018_v31  ;;  %v446_v31 = vld [vmem:[%s3197_s27 + $0x18] sm:$0xff] }
 0x47a   :  { %2101 = vrsqrt.f32 %v898_v34  ;;  %vm906_vm5 = vweird.f32 %v898_v34 }
 0x47c   :  { %1020 = vmatpush.bf16.msrb.mxu2 %v1017_v40  ;;  %v444_v40 = vld [vmem:[%s3197_s27 + $0x8] sm:$0xff] }
 0x47d   :  { %v895_v38 = vpop.xlane.xlu1 %894 }
 0x47e   :  { %v897_v41 = vmul.f32 %v895_v38, %v2871_v63  ;;  %v455_v38 = vld [vmem:[%s3197_s27 + $0x60] sm:$0xff] }
 0x480   :  { %v2102_v43 = vpop.eup %2101  ;;  %v899_v44 = vadd.f32 1e-05, %v897_v41  ;;  %v1039_v41 = vpack.c.bf16 %v456_v39, %v455_v38  ;;  %v428_v38 = vld [vmem:[%s3196_s19 + $0x8] sm:$0xff]  ;;  %v443_v39 = vld [vmem:[%s3197_s27] sm:$0xff] }
 0x481   :  { %v901_v47 = vmul.f32 %v2102_v43, %v898_v34  ;;  %vm907_vm4 = vweird.f32 %v2102_v43  ;;  %v424_v34 = vld [vmem:[%s3195_s10 + $0x68] sm:$0xff] }
 0x482   :  { %2103 = vrsqrt.f32 %v899_v44  ;;  %vm908_vm6 = vmor %vm906_vm5, %vm907_vm4  ;;  %vm916_vm8 = vweird.f32 %v899_v44  ;;  %v995_v36 = vpack.c.bf16 %v424_v34, %v423_v33  ;;  %1042 = vmatpush.bf16.msrb.mxu3 %v1039_v41  ;;  %v1034_v33 = vpack.c.bf16 %v446_v31, %v445_v30  ;;  %v411_v34 = vld [vmem:[%s3195_s10] sm:$0xff] }
 0x483   :  { %v902_v48 = vmul.f32 %v2102_v43, %v901_v47  ;;  %v454_v47 = vld [vmem:[%s3197_s27 + $0x58] sm:$0xff]  ;;  %v989_v37 = vpack.c.bf16 %v412_v35, %v411_v34 }
 0x484   :  { %998 = vmatpush.bf16.msrb.mxu1 %v995_v36  ;;  %v1038_v50 = vpack.c.bf16 %v454_v47, %v453_v46  ;;  %v427_v36 = vld [vmem:[%s3196_s19] sm:$0xff] }
 0x485   :  { %v903_v52 = vmul.f32 0.5, %v902_v48  ;;  %v1011_v41 = vpack.c.bf16 %v428_v38, %v427_v36 }
 0x486   :  { %1043 = vmatpush.bf16.msrb.mxu3 %v1038_v50 }
 0x487   :  { %v904_v55 = vsub.f32 1.5, %v903_v52  ;;  %v420_v52 = vld [vmem:[%s3195_s10 + $0x48] sm:$0xff] }
 0x488   :  { %v2104_v57 = vpop.eup %2103 }
 0x489   :  { %v905_v58 = vmul.f32 %v2102_v43, %v904_v55  ;;  %v911_v59 = vmul.f32 %v2104_v57, %v899_v44  ;;  %vm917_vm7 = vweird.f32 %v2104_v57  ;;  %v437_v44 = vld [vmem:[%s3196_s19 + $0x50] sm:$0xff]  ;;  %v435_v55 = vld [vmem:[%s3196_s19 + $0x40] sm:$0xff] }
 0x48a   :  { %vm918_vm9 = vmor %vm916_vm8, %vm917_vm7  ;;  %v1016_v49 = vpack.c.bf16 %v438_v45, %v437_v44  ;;  %v2072_v44 = vld [vmem:[%s3199_s0] ss:$0 sm:$0xff]  ;;  %vm1675_vm7 = vcmask 1041409   ;;  %vm1678_vm8 = vcmask 1041408  }
 0x48b   :  { %v912_v60 = vmul.f32 %v2104_v57, %v911_v59  ;;  %v909_v61 = vsel %vm908_vm6, %v2102_v43, %v905_v58  ;;  %v422_v43 = vld [vmem:[%s3195_s10 + $0x58] sm:$0xff]  ;;  %v452_v58 = vld [vmem:[%s3197_s27 + $0x48] sm:$0xff]  ;;  %v993_v59 = vpack.c.bf16 %v420_v52, %v419_v51  ;;  %vm1610_vm6 = vcmask 7168  }
 0x48c   :  { %v920_v1 = vmul.f32 %v909_v61, %v2875_v2  ;;  %v400_v2 = vld [vmem:[%s3192_s9 + $0x30] sm:$0xff]  ;;  %v994_v48 = vpack.c.bf16 %v422_v43, %v421_v42  ;;  %1021 = vmatpush.bf16.msrb.mxu2 %v1016_v49  ;;  %v1033_v42 = vpack.c.bf16 %v444_v40, %v443_v39 }
 0x48d   :  { %v913_v62 = vmul.f32 0.5, %v912_v60  ;;  %v964_v15 = vpack.c.bf16 %v401_v14, %v400_v2  ;;  %v1015_v60 = vpack.c.bf16 %v436_v56, %v435_v55  ;;  %v449_v2 = vld [vmem:[%s3197_s27 + $0x30] sm:$0xff]  ;;  %v450_v14 = vld [vmem:[%s3197_s27 + $0x38] sm:$0xff] }
 0x48e   :  { %v925_v8 = vmul.f32 %v2069_v3, %v920_v1  ;;  %999 = vmatpush.bf16.msrb.mxu1 %v994_v48  ;;  %v475_v40 = vld [vmem:[%s3200_s29 + $0x70] sm:$0xff] }
 0x48f   :  { %v914_v0 = vsub.f32 1.5, %v913_v62  ;;  %976 = vmatpush.bf16.msrb.mxu0 %v964_v15 }
 0x490   :  { %v930_v11 = vadd.f32 %v2070_v9, %v925_v8  ;;  %1022 = vmatpush.bf16.msrb.mxu2 %v1015_v60 }
 0x491   :  { %v915_v4 = vmul.f32 %v2104_v57, %v914_v0  ;;  %v2071_v0 = vld [vmem:[%s3198_s17] ss:$0 sm:$0xff] }
 0x492   :  { %1000 = vmatpush.bf16.msrb.mxu1 %v993_v59 }
 0x493   :  { %v919_v5 = vsel %vm918_vm9, %v2104_v57, %v915_v4  ;;  %v451_v57 = vld [vmem:[%s3197_s27 + $0x40] sm:$0xff] }
 0x494   :  { %v921_v7 = vmul.f32 %v919_v5, %v2881_v6  ;;  %v399_v6 = vld [vmem:[%s3192_s9 + $0x28] sm:$0xff]  ;;  %v1037_v61 = vpack.c.bf16 %v452_v58, %v451_v57  ;;  %s1928_s9 = sshll.u32 %s2507_s5, 4  ;;  %s1929_s9 = int_to_ptr.vmem [resolvable:$true] %s1928_s9 }
 0x495   :  { %v963_v17 = vpack.c.bf16 %v399_v6, %v398_v16  ;;  %v1036_v16 = vpack.c.bf16 %v450_v14, %v449_v2  ;;  %v415_v6 = vld [vmem:[%s3195_s10 + $0x20] sm:$0xff] }
 0x496   :  { %v926_v10 = vmul.f32 %v2069_v3, %v921_v7  ;;  %1044 = vmatpush.bf16.msrb.mxu3 %v1037_v61 }
 0x497   :  { %977 = vmatpush.bf16.msrb.mxu0 %v963_v17  ;;  %v416_v17 = vld [vmem:[%s3195_s10 + $0x28] sm:$0xff] }
 0x498   :  { %v931_v12 = vadd.f32 %v2070_v9, %v926_v10  ;;  %v417_v9 = vld [vmem:[%s3195_s10 + $0x30] sm:$0xff]  ;;  %v418_v10 = vld [vmem:[%s3195_s10 + $0x38] sm:$0xff]  ;;  %v991_v19 = vpack.c.bf16 %v416_v17, %v415_v6 }
 0x49a   :  { %v932_v13 = vpack.c.bf16 %v931_v12, %v930_v11  ;;  %v433_v11 = vld [vmem:[%s3196_s19 + $0x30] sm:$0xff]  ;;  %v992_v12 = vpack.c.bf16 %v418_v10, %v417_v9  ;;  %1045 = vmatpush.bf16.msrb.mxu3 %v1036_v16 }
 0x49b   :  { %978 = vmatpush.bf16.msrb.mxu0 %v962_v20  ;;  %v432_v20 = vld [vmem:[%s3196_s19 + $0x28] sm:$0xff] }
 0x49c   :  { %952 = vmatmul.bf16.vlgmr.msra.gmra.mxu3 %v932_v13  ;;  %v434_v13 = vld [vmem:[%s3196_s19 + $0x38] sm:$0xff]  ;;  %1001 = vmatpush.bf16.msrb.mxu1 %v992_v12 }
 0x49d   :  { %v1014_v15 = vpack.c.bf16 %v434_v13, %v433_v11 }
 0x49e   :  { %1046 = vmatpush.bf16.msrb.mxu3 %v1035_v24 }
 0x49f   :  { %979 = vmatpush.bf16.msrb.mxu0 %v961_v23  ;;  %1023 = vmatpush.bf16.msrb.mxu2 %v1014_v15  ;;  %v1013_v23 = vpack.c.bf16 %v432_v20, %v431_v18 }
 0x4a0   :  { %1002 = vmatpush.bf16.msrb.mxu1 %v991_v19 }
 0x4a2   :  { %1047 = vmatpush.bf16.msrb.mxu3 %v1034_v33 }
 0x4a3   :  { %1024 = vmatpush.bf16.msrb.mxu2 %v1013_v23 }
 0x4a4   :  { %1003 = vmatpush.bf16.msrb.mxu1 %v990_v28 }
 0x4a6   :  { %1048 = vmatpush.bf16.msrb.mxu3 %v1033_v42 }
 0x4a7   :  { %1025 = vmatpush.bf16.msrb.mxu2 %v1012_v32 }
 0x4a8   :  { %1004 = vmatpush.bf16.msrb.mxu1 %v989_v37 }
 0x4ab   :  { %1026 = vmatpush.bf16.msrb.mxu2 %v1011_v41  ;;  %v476_v41 = vld [vmem:[%s3200_s29 + $0x78] sm:$0xff] }
 0x4ac   :  { %v1209_v42 = vpack.c.bf16 %v476_v41, %v475_v40  ;;  %v2074_v41 = vld [vmem:[%s3202_s28] ss:$0 sm:$0xff] }
 0x51f   :  { %v953_v62 = vpop.f32.mrf.mxu3 }
 0x520   :  { %v954_v1 = vadd.f32 %v2071_v0, %v953_v62 }
 0x522   :  { %v958_v5 = vmax.f32 %v954_v1, 0.0 }
 0x527   :  { %v955_v3 = vpop.f32.mrf.mxu3 }
 0x528   :  { %v956_v4 = vadd.f32 %v2071_v0, %v955_v3 }
 0x52a   :  { %v959_v7 = vmax.f32 %v956_v4, 0.0 }
 0x52c   :  { %v960_v8 = vpack.c.bf16 %v959_v7, %v958_v5 }
 0x52e   :  { %980 = vmatmul.bf16.vlgmr.msrb.gmra.mxu0 %v960_v8 }
 0x5ab   :  { %v981_v43 = vpop.f32.mrf.mxu0 }
 0x5ac   :  { %v982_v45 = vadd.f32 %v2072_v44, %v981_v43  ;;  %v473_v43 = vld [vmem:[%s3200_s29 + $0x60] sm:$0xff] }
 0x5ae   :  { %v986_v48 = vadd.f32 %v982_v45, %v2867_v54 }
 0x5b3   :  { %v983_v46 = vpop.f32.mrf.mxu0 }
 0x5b4   :  { %v984_v47 = vadd.f32 %v2072_v44, %v983_v46  ;;  %v474_v44 = vld [vmem:[%s3200_s29 + $0x68] sm:$0xff]  ;;  %v471_v46 = vld [vmem:[%s3200_s29 + $0x50] sm:$0xff] }
 0x5b5   :  { %v1208_v45 = vpack.c.bf16 %v474_v44, %v473_v43 }
 0x5b6   :  { %v987_v49 = vadd.f32 %v984_v47, %v2865_v53  ;;  %v472_v47 = vld [vmem:[%s3200_s29 + $0x58] sm:$0xff] }
 0x5b8   :  { %v988_v50 = vpack.c.bf16 %v987_v49, %v986_v48  ;;  %v1207_v48 = vpack.c.bf16 %v472_v47, %v471_v46  ;;  %v469_v49 = vld [vmem:[%s3200_s29 + $0x40] sm:$0xff]  ;;  %v484_v46 = vld [vmem:[#allocation3 + $0x30] sm:$0xff] }
 0x5b9   :  { %v485_v47 = vld [vmem:[#allocation3 + $0x38] sm:$0xff] }
 0x5ba   :  { %1005 = vmatmul.bf16.vlgmr.msrb.gmra.mxu1 %v988_v50  ;;  %1027 = vmatmul.bf16.vlgmr.msrb.gmra.mxu2 %v988_v50 }
 0x5bb   :  { %1049 = vmatmul.bf16.vlgmr.msrb.gmra.mxu3 %v988_v50  ;;  %v470_v50 = vld [vmem:[%s3200_s29 + $0x48] sm:$0xff] }
 0x637   :  { %v1006_v51 = vpop.f32.mrf.mxu1 }
 0x638   :  { %v1055_v58 = vmul.f32 0.088388346, %v1006_v51  ;;  %v1206_v51 = vpack.c.bf16 %v470_v50, %v469_v49  ;;  %v482_v49 = vld [vmem:[#allocation3 + $0x20] sm:$0xff]  ;;  %v483_v50 = vld [vmem:[#allocation3 + $0x28] sm:$0xff] }
 0x63a   :  { %v1057_v60 = vpack.c.bf16 %v1055_v58, %v1055_v58  ;;  %v466_v58 = vld [vmem:[%s3200_s29 + $0x28] sm:$0xff] }
 0x63d   :  { %v1028_v52 = vpop.f32.mrf.mxu2 }
 0x63e   :  { %v1059_v55 = vpack.c.bf16 %v1028_v52, %v1028_v52  ;;  %v1050_v56 = vpop.f32.mrf.mxu3  ;;  %v467_v52 = vld [vmem:[%s3200_s29 + $0x30] sm:$0xff] }
 0x63f   :  { %v1111_v57 = vpack.c.bf16 %v1050_v56, %v1050_v56  ;;  %v1008_v62 = vpop.f32.mrf.mxu1 }
 0x640   :  { %1068 = vmatpush.bf16.xpose.msra.mxu0 %v1059_v55  ;;  %v1056_v1 = vmul.f32 0.088388346, %v1008_v62  ;;  %v468_v55 = vld [vmem:[%s3200_s29 + $0x38] sm:$0xff] }
 0x641   :  { %v1117_v59 = vsel %vm839_vm1, %v1111_v57, 0  ;;  %v1205_v56 = vpack.c.bf16 %v468_v55, %v467_v52  ;;  %v465_v57 = vld [vmem:[%s3200_s29 + $0x20] sm:$0xff] }
 0x642   :  { %1126 = vmatpush.bf16.msra.mxu2 %v1117_v59  ;;  %v1058_v4 = vpack.c.bf16 %v1056_v1, %v1056_v1  ;;  %v1204_v59 = vpack.c.bf16 %v466_v58, %v465_v57  ;;  %v481_v52 = vld [vmem:[#allocation3 + $0x18] sm:$0xff]  ;;  %v509_v58 = vld [vmem:[#allocation6 + $0x70] sm:$0xff] }
 0x645   :  { %v1030_v61 = vpop.f32.mrf.mxu2 }
 0x646   :  { %v1060_v54 = vpack.c.bf16 %v1030_v61, %v1030_v61  ;;  %v1052_v0 = vpop.f32.mrf.mxu3  ;;  %v464_v61 = vld [vmem:[%s3200_s29 + $0x18] sm:$0xff] }
 0x647   :  { %v1112_v53 = vpack.c.bf16 %v1052_v0, %v1052_v0  ;;  %1069 = vmatmul.bf16.vlgmr.msra.gmra.mxu0 %v1057_v60  ;;  %v463_v60 = vld [vmem:[%s3200_s29 + $0x10] sm:$0xff]  ;;  %v462_v0 = vld [vmem:[%s3200_s29 + $0x8] sm:$0xff] }
 0x648   :  { %1081 = vmatpush.bf16.xpose.msra.mxu1 %v1060_v54  ;;  %v1203_v62 = vpack.c.bf16 %v464_v61, %v463_v60  ;;  %v461_v54 = vld [vmem:[%s3200_s29] sm:$0xff]  ;;  %v525_v60 = vld [vmem:[#allocation8 + $0x70] sm:$0xff] }
 0x649   :  { %v1136_v3 = vsel %vm839_vm1, %v1112_v53, 0  ;;  %v1202_v53 = vpack.c.bf16 %v462_v0, %v461_v54  ;;  %v541_v54 = vld [vmem:[#allocation9 + $0x70] sm:$0xff]  ;;  %v542_v0 = vld [vmem:[#allocation9 + $0x78] sm:$0xff] }
 0x64a   :  { %1145 = vmatpush.bf16.msrb.mxu0 %v1136_v3 }
 0x64f   :  { %1082 = vmatmul.bf16.vlgmr.msra.gmra.mxu1 %v1058_v4  ;;  %v492_v4 = vld [vmem:[#allocation3 + $0x70] sm:$0xff] }
 0x650   :  { %1213 = vmatpush.bf16.msrb.mxu1 %v1209_v42 }
 0x654   :  { %1214 = vmatpush.bf16.msrb.mxu1 %v1208_v45 }
 0x658   :  { %1215 = vmatpush.bf16.msrb.mxu1 %v1207_v48  ;;  %v1233_v48 = vpack.c.bf16 %v485_v47, %v484_v46  ;;  %v533_v46 = vld [vmem:[#allocation9 + $0x30] sm:$0xff]  ;;  %v534_v47 = vld [vmem:[#allocation9 + $0x38] sm:$0xff] }
 0x65c   :  { %1216 = vmatpush.bf16.msrb.mxu1 %v1206_v51  ;;  %v1232_v51 = vpack.c.bf16 %v483_v50, %v482_v49  ;;  %v1305_v49 = vpack.c.bf16 %v534_v47, %v533_v46  ;;  %v499_v50 = vld [vmem:[#allocation6 + $0x20] sm:$0xff] }
 0x660   :  { %1217 = vmatpush.bf16.msrb.mxu1 %v1205_v56  ;;  %v479_v56 = vld [vmem:[#allocation3 + $0x8] sm:$0xff] }
 0x664   :  { %1218 = vmatpush.bf16.msrb.mxu1 %v1204_v59  ;;  %v510_v59 = vld [vmem:[#allocation6 + $0x78] sm:$0xff] }
 0x665   :  { %v1265_v61 = vpack.c.bf16 %v510_v59, %v509_v58  ;;  %v497_v59 = vld [vmem:[#allocation6 + $0x10] sm:$0xff] }
 0x667   :  { %1266 = vmatpush.bf16.msra.mxu3 %v1265_v61  ;;  %v513_v61 = vld [vmem:[#allocation8 + $0x10] sm:$0xff] }
 0x668   :  { %1219 = vmatpush.bf16.msrb.mxu1 %v1203_v62  ;;  %v526_v62 = vld [vmem:[#allocation8 + $0x78] sm:$0xff] }
 0x66c   :  { %1220 = vmatpush.bf16.msrb.mxu1 %v1202_v53  ;;  %v1287_v53 = vpack.c.bf16 %v526_v62, %v525_v60  ;;  %v498_v60 = vld [vmem:[#allocation6 + $0x18] sm:$0xff] }
 0x66d   :  { %v1259_v62 = vpack.c.bf16 %v498_v60, %v497_v59 }
 0x66e   :  { %1288 = vmatpush.bf16.msra.mxu0 %v1287_v53  ;;  %v530_v53 = vld [vmem:[#allocation9 + $0x18] sm:$0xff] }
 0x6c4   :  { %v1070_v5 = vpop.f32.mrf.mxu0 }
 0x6c5   :  { %v1087_v7 = vsel %vm809_vm2, %v1070_v5, -inf }
 0x6c6   :  { %1088 = vmax.xlane.f32.xlu2 %v1087_v7  ;;  %v490_v7 = vld [vmem:[#allocation3 + $0x60] sm:$0xff] }
 0x6cc   :  { %v1072_v8 = vpop.f32.mrf.mxu0  ;;  %v1083_v9 = vpop.f32.mrf.mxu1 }
 0x6cd   :  { %v1090_v10 = vsel %vm809_vm2, %v1083_v9, -inf }
 0x6ce   :  { %1091 = vmax.xlane.f32.xlu0 %v1090_v10  ;;  %v491_v10 = vld [vmem:[#allocation3 + $0x68] sm:$0xff] }
 0x6d4   :  { %v1085_v11 = vpop.f32.mrf.mxu1 }
 0x739   :  { %v1089_v12 = vpop.xlane.xlu2 %1088 }
 0x73a   :  { %v1093_v13 = vsub.f32 %v1070_v5, %v1089_v12  ;;  %v493_v5 = vld [vmem:[#allocation3 + $0x78] sm:$0xff] }
 0x73c   :  { %v1095_v2 = vmul.f32 1.442695, %v1093_v13  ;;  %v1236_v13 = vpack.c.bf16 %v491_v10, %v490_v7  ;;  %v540_v10 = vld [vmem:[#allocation9 + $0x68] sm:$0xff] }
 0x73e   :  { %2105 = vpow2.f32 %v1095_v2 }
 0x741   :  { %v1092_v14 = vpop.xlane.xlu0 %1091 }
 0x742   :  { %v1094_v15 = vsub.f32 %v1083_v9, %v1092_v14  ;;  %v1237_v9 = vpack.c.bf16 %v493_v5, %v492_v4  ;;  %v488_v14 = vld [vmem:[#allocation3 + $0x50] sm:$0xff]  ;;  %v508_v4 = vld [vmem:[#allocation6 + $0x68] sm:$0xff]  ;;  %v523_v5 = vld [vmem:[#allocation8 + $0x60] sm:$0xff] }
 0x744   :  { %v2106_v16 = vpop.eup %2105  ;;  %v1097_v6 = vmul.f32 1.442695, %v1094_v15  ;;  %1241 = vmatpush.bf16.msrb.mxu2 %v1237_v9  ;;  %v489_v15 = vld [vmem:[#allocation3 + $0x58] sm:$0xff]  ;;  %v539_v9 = vld [vmem:[#allocation9 + $0x60] sm:$0xff] }
 0x745   :  { %v1099_v17 = vsel %vm809_vm2, %v2106_v16, 0.0 }
 0x746   :  { %2107 = vpow2.f32 %v1097_v6  ;;  %1100 = vadd.xlane.f32.xlu1 %v1099_v17  ;;  %v486_v6 = vld [vmem:[#allocation3 + $0x40] sm:$0xff]  ;;  %v487_v17 = vld [vmem:[#allocation3 + $0x48] sm:$0xff] }
 0x748   :  { %1242 = vmatpush.bf16.msrb.mxu2 %v1236_v13  ;;  %v505_v13 = vld [vmem:[#allocation6 + $0x50] sm:$0xff] }
 0x74c   :  { %v2108_v18 = vpop.eup %2107 }
 0x74d   :  { %v1102_v19 = vsel %vm809_vm2, %v2108_v18, 0.0 }
 0x74e   :  { %1103 = vadd.xlane.f32.xlu2 %v1102_v19 }
 0x7b9   :  { %v1101_v20 = vpop.xlane.xlu1 %1100 }
 0x7ba   :  { %2109 = vrcp.f32 %v1101_v20  ;;  %v1234_v20 = vpack.c.bf16 %v487_v17, %v486_v6  ;;  %v538_v6 = vld [vmem:[#allocation9 + $0x58] sm:$0xff] }
 0x7c0   :  { %v2110_v21 = vpop.eup %2109 }
 0x7c1   :  { %v1107_v22 = vmul.f32 %v2110_v21, %v2106_v16  ;;  %v1104_v23 = vpop.xlane.xlu2 %1103  ;;  %v1235_v16 = vpack.c.bf16 %v489_v15, %v488_v14  ;;  %v521_v14 = vld [vmem:[#allocation8 + $0x50] sm:$0xff]  ;;  %v522_v15 = vld [vmem:[#allocation8 + $0x58] sm:$0xff] }
 0x7c2   :  { %2111 = vrcp.f32 %v1104_v23 }
 0x7c3   :  { %v1109_v24 = vpack.c.bf16 %v1107_v22, %v1107_v22  ;;  %1243 = vmatpush.bf16.msrb.mxu2 %v1235_v16  ;;  %v537_v16 = vld [vmem:[#allocation9 + $0x50] sm:$0xff] }
 0x7c5   :  { %1997 = vmatmul.msk.bf16.vlgmr.msra.gmra.mxu2 %vm809_vm2, %v1109_v24 }
 0x7c7   :  { %1244 = vmatpush.bf16.msrb.mxu2 %v1234_v20  ;;  %v503_v20 = vld [vmem:[#allocation6 + $0x40] sm:$0xff] }
 0x7c8   :  { %v2112_v25 = vpop.eup %2111 }
 0x7c9   :  { %v1108_v26 = vmul.f32 %v2112_v25, %v2108_v18 }
 0x7cb   :  { %v1110_v27 = vpack.c.bf16 %v1108_v26, %v1108_v26  ;;  %1245 = vmatpush.bf16.msrb.mxu2 %v1233_v48 }
 0x7cd   :  { %1998 = vmatmul.msk.bf16.vlgmr.msrb.gmra.mxu0 %vm809_vm2, %v1110_v27 }
 0x7cf   :  { %1246 = vmatpush.bf16.msrb.mxu2 %v1232_v51  ;;  %v500_v51 = vld [vmem:[#allocation6 + $0x28] sm:$0xff] }
 0x848   :  { %v2983_v28 = vpop.f32.mrf.mxu2 }
 0x849   :  { %1151 = vadd.xlane.f32.xlu0 %v2983_v28 }
 0x84a   :  { %v2986_v29 = vpop.f32.mrf.mxu0 }
 0x84b   :  { %1153 = vadd.xlane.f32.xlu1 %v2986_v29 }
 0x850   :  { %v1130_v30 = vpop.f32.mrf.mxu2 }
 0x852   :  { %v1149_v31 = vpop.f32.mrf.mxu0 }
 0x8bc   :  { %v1152_v32 = vpop.xlane.xlu0 %1151 }
 0x8bd   :  { %v1155_v33 = vmul.f32 %v1152_v32, %v2871_v63  ;;  %v2073_v32 = vld [vmem:[%s3201_s20] ss:$0 sm:$0xff] }
 0x8be   :  { %v1154_v34 = vpop.xlane.xlu1 %1153 }
 0x8bf   :  { %v2991_v35 = vsub.f32 %v2983_v28, %v1155_v33  ;;  %v1156_v36 = vmul.f32 %v1154_v34, %v2871_v63 }
 0x8c1   :  { %v2995_v37 = vsub.f32 %v2986_v29, %v1156_v36  ;;  %v1159_v38 = vmul.f32 %v2991_v35, %v2991_v35 }
 0x8c3   :  { %1161 = vadd.xlane.f32.xlu2 %v1159_v38  ;;  %v1160_v39 = vmul.f32 %v2995_v37, %v2995_v37 }
 0x8c5   :  { %1163 = vadd.xlane.f32.xlu0 %v1160_v39 }
 0x936   :  { %v1162_v1 = vpop.xlane.xlu2 %1161 }
 0x937   :  { %v1165_v3 = vmul.f32 %v1162_v1, %v2871_v63  ;;  %v1309_v1 = vpack.c.bf16 %v542_v0, %v541_v54  ;;  %v514_v54 = vld [vmem:[#allocation8 + $0x18] sm:$0xff]  ;;  %v529_v0 = vld [vmem:[#allocation9 + $0x10] sm:$0xff] }
 0x938   :  { %v1164_v8 = vpop.xlane.xlu0 %1163 }
 0x939   :  { %v1167_v11 = vadd.f32 1e-05, %v1165_v3  ;;  %v1166_v12 = vmul.f32 %v1164_v8, %v2871_v63  ;;  %v507_v3 = vld [vmem:[#allocation6 + $0x60] sm:$0xff]  ;;  %v524_v8 = vld [vmem:[#allocation8 + $0x68] sm:$0xff]  ;;  %1310 = vmatpush.bf16.msra.mxu1 %v1309_v1  ;;  %v1281_v1 = vpack.c.bf16 %v514_v54, %v513_v61 }
 0x93a   :  { %v1264_v7 = vpack.c.bf16 %v508_v4, %v507_v3  ;;  %v1303_v3 = vpack.c.bf16 %v530_v53, %v529_v0  ;;  %v495_v4 = vld [vmem:[#allocation6] sm:$0xff] }
 0x93b   :  { %2113 = vrsqrt.f32 %v1167_v11  ;;  %v1168_v2 = vadd.f32 1e-05, %v1166_v12  ;;  %vm1175_vm11 = vweird.f32 %v1167_v11  ;;  %v1308_v12 = vpack.c.bf16 %v540_v10, %v539_v9  ;;  %v512_v9 = vld [vmem:[#allocation8 + $0x8] sm:$0xff]  ;;  %v527_v10 = vld [vmem:[#allocation9] sm:$0xff] }
 0x93c   :  { %1267 = vmatpush.bf16.msra.mxu3 %v1264_v7  ;;  %v511_v7 = vld [vmem:[#allocation8] sm:$0xff] }
 0x93d   :  { %2115 = vrsqrt.f32 %v1168_v2  ;;  %vm1185_vm14 = vweird.f32 %v1168_v2  ;;  %1311 = vmatpush.bf16.msra.mxu1 %v1308_v12  ;;  %v1280_v12 = vpack.c.bf16 %v512_v9, %v511_v7 }
 0x941   :  { %v2114_v18 = vpop.eup %2113 }
 0x942   :  { %v1170_v19 = vmul.f32 %v2114_v18, %v1167_v11  ;;  %vm1176_vm10 = vweird.f32 %v2114_v18  ;;  %v1286_v11 = vpack.c.bf16 %v524_v8, %v523_v5  ;;  %v496_v5 = vld [vmem:[#allocation6 + $0x8] sm:$0xff] }
 0x943   :  { %v2116_v21 = vpop.eup %2115  ;;  %vm1177_vm13 = vmor %vm1175_vm11, %vm1176_vm10  ;;  %v1258_v8 = vpack.c.bf16 %v496_v5, %v495_v4 }
 0x944   :  { %v1171_v22 = vmul.f32 %v2114_v18, %v1170_v19  ;;  %v1180_v23 = vmul.f32 %v2116_v21, %v1168_v2  ;;  %vm1186_vm12 = vweird.f32 %v2116_v21  ;;  %v506_v2 = vld [vmem:[#allocation6 + $0x58] sm:$0xff]  ;;  %1289 = vmatpush.bf16.msra.mxu0 %v1286_v11  ;;  %v1307_v19 = vpack.c.bf16 %v538_v6, %v537_v16  ;;  %v528_v11 = vld [vmem:[#allocation9 + $0x8] sm:$0xff] }
 0x945   :  { %vm1187_vm15 = vmor %vm1185_vm14, %vm1186_vm12  ;;  %v1263_v17 = vpack.c.bf16 %v506_v2, %v505_v13  ;;  %v1302_v13 = vpack.c.bf16 %v528_v11, %v527_v10  ;;  %v559_v11 = vld [vmem:[#allocation11 + $0x70] sm:$0xff]  ;;  %vm1830_vm12 = vcmask 523264  }
 0x946   :  { %v1172_v24 = vmul.f32 0.5, %v1171_v22  ;;  %v1181_v25 = vmul.f32 %v2116_v21, %v1180_v23  ;;  %v519_v22 = vld [vmem:[#allocation8 + $0x40] sm:$0xff]  ;;  %v520_v23 = vld [vmem:[#allocation8 + $0x48] sm:$0xff]  ;;  %1312 = vmatpush.bf16.msra.mxu1 %v1307_v19 }
 0x947   :  { %1268 = vmatpush.bf16.msra.mxu3 %v1263_v17 }
 0x948   :  { %v1173_v26 = vsub.f32 1.5, %v1172_v24  ;;  %v1182_v27 = vmul.f32 0.5, %v1181_v25  ;;  %v535_v24 = vld [vmem:[#allocation9 + $0x40] sm:$0xff]  ;;  %v536_v25 = vld [vmem:[#allocation9 + $0x48] sm:$0xff] }
 0x94a   :  { %v1174_v30 = vmul.f32 %v2114_v18, %v1173_v26  ;;  %v1183_v31 = vsub.f32 1.5, %v1182_v27  ;;  %v1284_v27 = vpack.c.bf16 %v520_v23, %v519_v22 }
 0x94c   :  { %v1178_v33 = vsel %vm1177_vm13, %v2114_v18, %v1174_v30  ;;  %v1184_v34 = vmul.f32 %v2116_v21, %v1183_v31  ;;  %v1285_v18 = vpack.c.bf16 %v522_v15, %v521_v14  ;;  %v1306_v30 = vpack.c.bf16 %v536_v25, %v535_v24  ;;  %v2076_v14 = vld [vmem:[%s3204_s14] ss:$0 sm:$0xff] }
 0x94d   :  { %v1189_v36 = vmul.f32 %v1178_v33, %v2991_v35  ;;  %v480_v35 = vld [vmem:[#allocation3 + $0x10] sm:$0xff] }
 0x94e   :  { %v1188_v38 = vsel %vm1187_vm15, %v2116_v21, %v1184_v34  ;;  %v1231_v55 = vpack.c.bf16 %v481_v52, %v480_v35  ;;  %v504_v21 = vld [vmem:[#allocation6 + $0x48] sm:$0xff]  ;;  %1290 = vmatpush.bf16.msra.mxu0 %v1285_v18  ;;  %1313 = vmatpush.bf16.msra.mxu1 %v1306_v30  ;;  %v515_v35 = vld [vmem:[#allocation8 + $0x20] sm:$0xff]  ;;  %v1260_v52 = vpack.c.bf16 %v500_v51, %v499_v50 }
 0x94f   :  { %v1190_v39 = vmul.f32 %v1188_v38, %v2995_v37  ;;  %v1194_v40 = vmul.f32 %v2073_v32, %v1189_v36  ;;  %v478_v37 = vld [vmem:[#allocation3] sm:$0xff]  ;;  %v1262_v26 = vpack.c.bf16 %v504_v21, %v503_v20 }
 0x950   :  { %1247 = vmatpush.bf16.msrb.mxu2 %v1231_v55  ;;  %v1230_v57 = vpack.c.bf16 %v479_v56, %v478_v37  ;;  %v516_v55 = vld [vmem:[#allocation8 + $0x28] sm:$0xff]  ;;  %v531_v37 = vld [vmem:[#allocation9 + $0x20] sm:$0xff] }
 0x951   :  { %v1195_v42 = vmul.f32 %v2073_v32, %v1190_v39  ;;  %v1199_v43 = vadd.f32 %v2074_v41, %v1194_v40  ;;  %1269 = vmatpush.bf16.msra.mxu3 %v1262_v26  ;;  %v2075_v32 = vld [vmem:[%s3203_s3] ss:$0 sm:$0xff]  ;;  %v532_v56 = vld [vmem:[#allocation9 + $0x28] sm:$0xff] }
 0x952   :  { %1291 = vmatpush.bf16.msra.mxu0 %v1284_v27  ;;  %1314 = vmatpush.bf16.msra.mxu1 %v1305_v49  ;;  %v1304_v58 = vpack.c.bf16 %v532_v56, %v531_v37 }
 0x953   :  { %v1200_v44 = vadd.f32 %v2074_v41, %v1195_v42  ;;  %v501_v41 = vld [vmem:[#allocation6 + $0x30] sm:$0xff]  ;;  %v502_v42 = vld [vmem:[#allocation6 + $0x38] sm:$0xff] }
 0x954   :  { %1248 = vmatpush.bf16.msrb.mxu2 %v1230_v57  ;;  %v1282_v57 = vpack.c.bf16 %v516_v55, %v515_v35 }
 0x955   :  { %v1201_v45 = vpack.c.bf16 %v1200_v44, %v1199_v43  ;;  %v517_v43 = vld [vmem:[#allocation8 + $0x30] sm:$0xff]  ;;  %v1261_v44 = vpack.c.bf16 %v502_v42, %v501_v41 }
 0x956   :  { %1315 = vmatpush.bf16.msra.mxu1 %v1304_v58 }
 0x957   :  { %1221 = vmatmul.bf16.vlgmr.msrb.gmra.mxu1 %v1201_v45  ;;  %v518_v45 = vld [vmem:[#allocation8 + $0x38] sm:$0xff]  ;;  %1270 = vmatpush.bf16.msra.mxu3 %v1261_v44 }
 0x958   :  { %v1283_v48 = vpack.c.bf16 %v518_v45, %v517_v43 }
 0x95a   :  { %1292 = vmatpush.bf16.msra.mxu0 %v1283_v48  ;;  %1316 = vmatpush.bf16.msra.mxu1 %v1303_v3 }
 0x95b   :  { %1271 = vmatpush.bf16.msra.mxu3 %v1260_v52 }
 0x95e   :  { %1293 = vmatpush.bf16.msra.mxu0 %v1282_v57  ;;  %1317 = vmatpush.bf16.msra.mxu1 %v1302_v13 }
 0x95f   :  { %1272 = vmatpush.bf16.msra.mxu3 %v1259_v62 }
 0x962   :  { %1294 = vmatpush.bf16.msra.mxu0 %v1281_v1 }
 0x963   :  { %1273 = vmatpush.bf16.msra.mxu3 %v1258_v8 }
 0x966   :  { %1295 = vmatpush.bf16.msra.mxu0 %v1280_v12  ;;  %v560_v12 = vld [vmem:[#allocation11 + $0x78] sm:$0xff] }
 0x967   :  { %v1478_v13 = vpack.c.bf16 %v560_v12, %v559_v11  ;;  %v2078_v12 = vld [vmem:[%s3206_s7] ss:$0 sm:$0xff] }
 0x9d4   :  { %v1222_v31 = vpop.f32.mrf.mxu1 }
 0x9d5   :  { %v1223_v33 = vadd.f32 %v2075_v32, %v1222_v31 }
 0x9d7   :  { %v1227_v38 = vmax.f32 %v1223_v33, 0.0 }
 0x9dc   :  { %v1224_v34 = vpop.f32.mrf.mxu1 }
 0x9dd   :  { %v1225_v36 = vadd.f32 %v2075_v32, %v1224_v34 }
 0x9df   :  { %v1228_v39 = vmax.f32 %v1225_v36, 0.0 }
 0x9e1   :  { %v1229_v40 = vpack.c.bf16 %v1228_v39, %v1227_v38 }
 0x9e3   :  { %1249 = vmatmul.bf16.vlgmr.msrb.gmra.mxu2 %v1229_v40 }
 0xa66   :  { %v1250_v2 = vpop.f32.mrf.mxu2 }
 0xa67   :  { %v1251_v15 = vadd.f32 %v2076_v14, %v1250_v2  ;;  %v557_v2 = vld [vmem:[#allocation11 + $0x60] sm:$0xff] }
 0xa69   :  { %v1255_v17 = vadd.f32 %v1251_v15, %v2983_v28 }
 0xa6e   :  { %v1252_v16 = vpop.f32.mrf.mxu2 }
 0xa6f   :  { %v1253_v6 = vadd.f32 %v2076_v14, %v1252_v16  ;;  %v558_v14 = vld [vmem:[#allocation11 + $0x68] sm:$0xff]  ;;  %v555_v16 = vld [vmem:[#allocation11 + $0x50] sm:$0xff] }
 0xa70   :  { %v1477_v15 = vpack.c.bf16 %v558_v14, %v557_v2 }
 0xa71   :  { %v1256_v18 = vadd.f32 %v1253_v6, %v2986_v29  ;;  %v556_v6 = vld [vmem:[#allocation11 + $0x58] sm:$0xff] }
 0xa73   :  { %v1257_v19 = vpack.c.bf16 %v1256_v18, %v1255_v17  ;;  %v1476_v17 = vpack.c.bf16 %v556_v6, %v555_v16  ;;  %v553_v18 = vld [vmem:[#allocation11 + $0x40] sm:$0xff]  ;;  %v568_v16 = vld [vmem:[#allocation12 + $0x30] sm:$0xff]  ;;  %v569_v6 = vld [vmem:[#allocation12 + $0x38] sm:$0xff] }
 0xa75   :  { %1274 = vmatmul.bf16.vlgmr.msra.gmra.mxu3 %v1257_v19  ;;  %1296 = vmatmul.bf16.vlgmr.msra.gmra.mxu0 %v1257_v19 }
 0xa76   :  { %1318 = vmatmul.bf16.vlgmr.msra.gmra.mxu1 %v1257_v19  ;;  %v554_v19 = vld [vmem:[#allocation11 + $0x48] sm:$0xff] }
 0xaf2   :  { %v1297_v20 = vpop.f32.mrf.mxu0 }
 0xaf3   :  { %v1328_v21 = vpack.c.bf16 %v1297_v20, %v1297_v20  ;;  %v1319_v22 = vpop.f32.mrf.mxu1  ;;  %v1475_v20 = vpack.c.bf16 %v554_v19, %v553_v18  ;;  %v566_v18 = vld [vmem:[#allocation12 + $0x20] sm:$0xff] }
 0xaf4   :  { %v1380_v23 = vpack.c.bf16 %v1319_v22, %v1319_v22  ;;  %v552_v22 = vld [vmem:[#allocation11 + $0x38] sm:$0xff] }
 0xaf5   :  { %1337 = vmatpush.bf16.xpose.msra.mxu2 %v1328_v21  ;;  %v551_v21 = vld [vmem:[#allocation11 + $0x30] sm:$0xff] }
 0xaf6   :  { %v1386_v24 = vsel %vm839_vm1, %v1380_v23, 0  ;;  %v1474_v23 = vpack.c.bf16 %v552_v22, %v551_v21  ;;  %v565_v21 = vld [vmem:[#allocation12 + $0x18] sm:$0xff] }
 0xaf7   :  { %1395 = vmatpush.bf16.msrb.mxu0 %v1386_v24 }
 0xaf8   :  { %v1275_v25 = vpop.f32.mrf.mxu3 }
 0xaf9   :  { %v1324_v26 = vmul.f32 0.088388346, %v1275_v25  ;;  %v549_v25 = vld [vmem:[#allocation11 + $0x20] sm:$0xff] }
 0xafa   :  { %v1299_v27 = vpop.f32.mrf.mxu0 }
 0xafb   :  { %v1326_v30 = vpack.c.bf16 %v1324_v26, %v1324_v26  ;;  %v1329_v31 = vpack.c.bf16 %v1299_v27, %v1299_v27  ;;  %v1321_v28 = vpop.f32.mrf.mxu1  ;;  %v550_v26 = vld [vmem:[#allocation11 + $0x28] sm:$0xff] }
 0xafc   :  { %v1381_v32 = vpack.c.bf16 %v1321_v28, %v1321_v28  ;;  %v547_v28 = vld [vmem:[#allocation11 + $0x10] sm:$0xff] }
 0xafd   :  { %1338 = vmatmul.bf16.vlgmr.msra.gmra.mxu2 %v1326_v30  ;;  %1350 = vmatpush.bf16.xpose.msrb.mxu3 %v1329_v31  ;;  %v1473_v30 = vpack.c.bf16 %v550_v26, %v549_v25  ;;  %v609_v25 = vld [vmem:[#allocation14 + $0x70] sm:$0xff]  ;;  %v610_v26 = vld [vmem:[#allocation14 + $0x78] sm:$0xff] }
 0xafe   :  { %v1405_v29 = vsel %vm839_vm1, %v1381_v32, 0  ;;  %v548_v32 = vld [vmem:[#allocation11 + $0x18] sm:$0xff] }
 0xaff   :  { %1414 = vmatpush.bf16.msrb.mxu2 %v1405_v29  ;;  %v1472_v29 = vpack.c.bf16 %v548_v32, %v547_v28  ;;  %v607_v28 = vld [vmem:[#allocation14 + $0x60] sm:$0xff]  ;;  %v608_v32 = vld [vmem:[#allocation14 + $0x68] sm:$0xff] }
 0xb00   :  { %v1277_v33 = vpop.f32.mrf.mxu3 }
 0xb01   :  { %v1325_v34 = vmul.f32 0.088388346, %v1277_v33  ;;  %v545_v33 = vld [vmem:[#allocation11] sm:$0xff] }
 0xb03   :  { %v1327_v36 = vpack.c.bf16 %v1325_v34, %v1325_v34  ;;  %v546_v34 = vld [vmem:[#allocation11 + $0x8] sm:$0xff] }
 0xb05   :  { %1351 = vmatmul.bf16.vlgmr.msrb.gmra.mxu3 %v1327_v36  ;;  %v1471_v36 = vpack.c.bf16 %v546_v34, %v545_v33  ;;  %v623_v33 = vld [vmem:[#allocation15 + $0x60] sm:$0xff]  ;;  %v624_v34 = vld [vmem:[#allocation15 + $0x68] sm:$0xff] }
 0xb06   :  { %1482 = vmatpush.bf16.msra.mxu3 %v1478_v13 }
 0xb0a   :  { %1483 = vmatpush.bf16.msra.mxu3 %v1477_v15 }
 0xb0e   :  { %1484 = vmatpush.bf16.msra.mxu3 %v1476_v17  ;;  %v1502_v17 = vpack.c.bf16 %v569_v6, %v568_v16  ;;  %v595_v6 = vld [vmem:[#allocation14] sm:$0xff] }
 0xb12   :  { %1485 = vmatpush.bf16.msra.mxu3 %v1475_v20  ;;  %v564_v20 = vld [vmem:[#allocation12 + $0x10] sm:$0xff] }
 0xb13   :  { %v1500_v22 = vpack.c.bf16 %v565_v21, %v564_v20  ;;  %v593_v21 = vld [vmem:[%s3208_s12 + $0x70] sm:$0xff] }
 0xb16   :  { %1486 = vmatpush.bf16.msra.mxu3 %v1474_v23  ;;  %v563_v23 = vld [vmem:[#allocation12 + $0x8] sm:$0xff] }
 0xb1a   :  { %1487 = vmatpush.bf16.msra.mxu3 %v1473_v30  ;;  %v1534_v30 = vpack.c.bf16 %v610_v26, %v609_v25  ;;  %v592_v25 = vld [vmem:[%s3208_s12 + $0x68] sm:$0xff] }
 0xb1c   :  { %1535 = vmatpush.bf16.msrb.mxu1 %v1534_v30  ;;  %v589_v30 = vld [vmem:[%s3208_s12 + $0x50] sm:$0xff] }
 0xb1e   :  { %1488 = vmatpush.bf16.msra.mxu3 %v1472_v29 }
 0xb22   :  { %1489 = vmatpush.bf16.msra.mxu3 %v1471_v36  ;;  %v1533_v36 = vpack.c.bf16 %v608_v32, %v607_v28 }
 0xb24   :  { %1536 = vmatpush.bf16.msrb.mxu1 %v1533_v36  ;;  %v588_v36 = vld [vmem:[%s3208_s12 + $0x48] sm:$0xff] }
 0xb80   :  { %v1339_v38 = vpop.f32.mrf.mxu2 }
 0xb81   :  { %v1356_v39 = vsel %vm809_vm2, %v1339_v38, -inf }
 0xb82   :  { %1357 = vmax.xlane.f32.xlu2 %v1356_v39 }
 0xb88   :  { %v1341_v40 = vpop.f32.mrf.mxu2  ;;  %v1352_v41 = vpop.f32.mrf.mxu3 }
 0xb89   :  { %v1359_v42 = vsel %vm809_vm2, %v1352_v41, -inf  ;;  %v576_v40 = vld [vmem:[#allocation12 + $0x70] sm:$0xff] }
 0xb8a   :  { %1360 = vmax.xlane.f32.xlu1 %v1359_v42 }
 0xb90   :  { %v1354_v43 = vpop.f32.mrf.mxu3 }
 0xbf5   :  { %v1358_v44 = vpop.xlane.xlu2 %1357 }
 0xbf6   :  { %v1362_v45 = vsub.f32 %v1339_v38, %v1358_v44 }
 0xbf8   :  { %v1364_v46 = vmul.f32 1.442695, %v1362_v45  ;;  %v574_v45 = vld [vmem:[#allocation12 + $0x60] sm:$0xff] }
 0xbfa   :  { %2117 = vpow2.f32 %v1364_v46  ;;  %v575_v46 = vld [vmem:[#allocation12 + $0x68] sm:$0xff] }
 0xbfd   :  { %v1361_v47 = vpop.xlane.xlu1 %1360 }
 0xbfe   :  { %v1363_v48 = vsub.f32 %v1352_v41, %v1361_v47  ;;  %v577_v41 = vld [vmem:[#allocation12 + $0x78] sm:$0xff] }
 0xbff   :  { %v1506_v44 = vpack.c.bf16 %v577_v41, %v576_v40  ;;  %v606_v40 = vld [vmem:[#allocation14 + $0x58] sm:$0xff]  ;;  %v621_v41 = vld [vmem:[#allocation15 + $0x50] sm:$0xff] }
 0xc00   :  { %v2118_v49 = vpop.eup %2117  ;;  %v1366_v50 = vmul.f32 1.442695, %v1363_v48  ;;  %v1505_v48 = vpack.c.bf16 %v575_v46, %v574_v45  ;;  %v603_v45 = vld [vmem:[#allocation14 + $0x40] sm:$0xff]  ;;  %v604_v46 = vld [vmem:[#allocation14 + $0x48] sm:$0xff] }
 0xc01   :  { %v1368_v51 = vsel %vm809_vm2, %v2118_v49, 0.0  ;;  %1510 = vmatpush.bf16.msra.mxu0 %v1506_v44 }
 0xc02   :  { %2119 = vpow2.f32 %v1366_v50  ;;  %1369 = vadd.xlane.f32.xlu1 %v1368_v51  ;;  %v572_v50 = vld [vmem:[#allocation12 + $0x50] sm:$0xff]  ;;  %v573_v51 = vld [vmem:[#allocation12 + $0x58] sm:$0xff] }
 0xc05   :  { %1511 = vmatpush.bf16.msra.mxu0 %v1505_v48  ;;  %v620_v48 = vld [vmem:[#allocation15 + $0x48] sm:$0xff] }
 0xc08   :  { %v2120_v35 = vpop.eup %2119 }
 0xc09   :  { %v1371_v52 = vsel %vm809_vm2, %v2120_v35, 0.0 }
 0xc0a   :  { %1372 = vadd.xlane.f32.xlu0 %v1371_v52  ;;  %v1504_v52 = vpack.c.bf16 %v573_v51, %v572_v50 }
 0xc0c   :  { %1512 = vmatpush.bf16.msra.mxu0 %v1504_v52 }
 0xc75   :  { %v1370_v55 = vpop.xlane.xlu1 %1369 }
 0xc76   :  { %2121 = vrcp.f32 %v1370_v55  ;;  %v570_v55 = vld [vmem:[#allocation12 + $0x40] sm:$0xff] }
 0xc7c   :  { %v2122_v37 = vpop.eup %2121 }
 0xc7d   :  { %v1376_v56 = vmul.f32 %v2122_v37, %v2118_v49  ;;  %v1373_v57 = vpop.xlane.xlu0 %1372  ;;  %v571_v37 = vld [vmem:[#allocation12 + $0x48] sm:$0xff] }
 0xc7e   :  { %2123 = vrcp.f32 %v1373_v57  ;;  %v1503_v57 = vpack.c.bf16 %v571_v37, %v570_v55 }
 0xc7f   :  { %v1378_v58 = vpack.c.bf16 %v1376_v56, %v1376_v56 }
 0xc80   :  { %1513 = vmatpush.bf16.msra.mxu0 %v1503_v57 }
 0xc81   :  { %1999 = vmatmul.msk.bf16.vlgmr.msrb.gmra.mxu0 %vm809_vm2, %v1378_v58 }
 0xc84   :  { %v2124_v59 = vpop.eup %2123  ;;  %1514 = vmatpush.bf16.msra.mxu0 %v1502_v17  ;;  %v596_v17 = vld [vmem:[#allocation14 + $0x8] sm:$0xff] }
 0xc85   :  { %v1377_v60 = vmul.f32 %v2124_v59, %v2120_v35 }
 0xc87   :  { %v1379_v61 = vpack.c.bf16 %v1377_v60, %v1377_v60 }
 0xc89   :  { %2000 = vmatmul.msk.bf16.vlgmr.msrb.gmra.mxu2 %vm809_vm2, %v1379_v61 }
 0xcfe   :  { %v3035_v62 = vpop.f32.mrf.mxu0 }
 0xcff   :  { %1420 = vadd.xlane.f32.xlu2 %v3035_v62 }
 0xd06   :  { %v1399_v54 = vpop.f32.mrf.mxu0 }
 0xd0c   :  { %v3038_v0 = vpop.f32.mrf.mxu2 }
 0xd0d   :  { %1422 = vadd.xlane.f32.xlu0 %v3038_v0 }
 0xd14   :  { %v1418_v53 = vpop.f32.mrf.mxu2 }
 0xd72   :  { %v1421_v1 = vpop.xlane.xlu2 %1420 }
 0xd73   :  { %v1424_v3 = vmul.f32 %v1421_v1, %v2871_v63 }
 0xd75   :  { %v3043_v4 = vsub.f32 %v3035_v62, %v1424_v3 }
 0xd77   :  { %v1428_v5 = vmul.f32 %v3043_v4, %v3043_v4 }
 0xd79   :  { %1430 = vadd.xlane.f32.xlu1 %v1428_v5  ;;  %v2077_v5 = vld [vmem:[%s3205_s1] ss:$0 sm:$0xff] }
 0xd80   :  { %v1423_v7 = vpop.xlane.xlu0 %1422 }
 0xd81   :  { %v1425_v8 = vmul.f32 %v1423_v7, %v2871_v63 }
 0xd83   :  { %v3049_v9 = vsub.f32 %v3038_v0, %v1425_v8 }
 0xd85   :  { %v1429_v10 = vmul.f32 %v3049_v9, %v3049_v9 }
 0xd87   :  { %1432 = vadd.xlane.f32.xlu2 %v1429_v10 }
 0xdec   :  { %v1431_v24 = vpop.xlane.xlu1 %1430 }
 0xded   :  { %v1434_v27 = vmul.f32 %v1431_v24, %v2871_v63 }
 0xdef   :  { %v1436_v31 = vadd.f32 1e-05, %v1434_v27  ;;  %v625_v27 = vld [vmem:[#allocation15 + $0x70] sm:$0xff] }
 0xdf1   :  { %2125 = vrsqrt.f32 %v1436_v31  ;;  %vm1444_vm1 = vweird.f32 %v1436_v31 }
 0xdf7   :  { %v2126_v38 = vpop.eup %2125 }
 0xdf8   :  { %v1439_v39 = vmul.f32 %v2126_v38, %v1436_v31  ;;  %vm1445_vm0 = vweird.f32 %v2126_v38  ;;  %v626_v31 = vld [vmem:[#allocation15 + $0x78] sm:$0xff] }
 0xdf9   :  { %vm1446_vm2 = vmor %vm1444_vm1, %vm1445_vm0  ;;  %v1556_v29 = vpack.c.bf16 %v626_v31, %v625_v27  ;;  %v1584_v27 = vmul.f32 0.088388346, %v592_v25  ;;  %v590_v31 = vld [vmem:[%s3208_s12 + $0x58] sm:$0xff] }
 0xdfa   :  { %v1440_v42 = vmul.f32 %v2126_v38, %v1439_v39  ;;  %v1433_v43 = vpop.xlane.xlu2 %1432  ;;  %v605_v39 = vld [vmem:[#allocation14 + $0x50] sm:$0xff] }
 0xdfb   :  { %v1435_v47 = vmul.f32 %v1433_v43, %v2871_v63  ;;  %1557 = vmatpush.bf16.msra.mxu2 %v1556_v29  ;;  %v1532_v43 = vpack.c.bf16 %v606_v40, %v605_v39  ;;  %v1581_v29 = vmul.f32 0.088388346, %v589_v30  ;;  %v1580_v40 = vmul.f32 0.088388346, %v588_v36 }
 0xdfc   :  { %v1441_v35 = vmul.f32 0.5, %v1440_v42  ;;  %v622_v42 = vld [vmem:[#allocation15 + $0x58] sm:$0xff] }
 0xdfd   :  { %v1437_v49 = vadd.f32 1e-05, %v1435_v47  ;;  %v1554_v44 = vpack.c.bf16 %v622_v42, %v621_v41  ;;  %v619_v47 = vld [vmem:[#allocation15 + $0x40] sm:$0xff]  ;;  %1537 = vmatpush.bf16.msrb.mxu1 %v1532_v43  ;;  %v585_v41 = vld [vmem:[%s3208_s12 + $0x30] sm:$0xff]  ;;  %v586_v42 = vld [vmem:[%s3208_s12 + $0x38] sm:$0xff] }
 0xdfe   :  { %v1442_v56 = vsub.f32 1.5, %v1441_v35  ;;  %v1553_v50 = vpack.c.bf16 %v620_v48, %v619_v47  ;;  %v2079_v35 = vld [vmem:[%s3207_s11] ss:$0 sm:$0xff] }
 0xdff   :  { %2127 = vrsqrt.f32 %v1437_v49  ;;  %vm1454_vm4 = vweird.f32 %v1437_v49  ;;  %v2080_v48 = vld [vmem:[%s3209_s6] ss:$0 sm:$0xff] }
 0xe00   :  { %v1443_v59 = vmul.f32 %v2126_v38, %v1442_v56 }
 0xe02   :  { %v1447_v54 = vsel %vm1446_vm2, %v2126_v38, %v1443_v59  ;;  %v1555_v38 = vpack.c.bf16 %v624_v34, %v623_v33  ;;  %v601_v59 = vld [vmem:[#allocation14 + $0x30] sm:$0xff]  ;;  %v1582_v33 = vmul.f32 0.088388346, %v590_v31  ;;  %v587_v34 = vld [vmem:[%s3208_s12 + $0x40] sm:$0xff] }
 0xe03   :  { %v1458_v3 = vmul.f32 %v1447_v54, %v3043_v4  ;;  %v567_v4 = vld [vmem:[#allocation12 + $0x28] sm:$0xff]  ;;  %v1579_v39 = vmul.f32 0.088388346, %v587_v34 }
 0xe04   :  { %v1501_v19 = vpack.c.bf16 %v567_v4, %v566_v18  ;;  %1558 = vmatpush.bf16.msra.mxu2 %v1555_v38  ;;  %v611_v18 = vld [vmem:[#allocation15] sm:$0xff]  ;;  %v1527_v4 = vpack.c.bf16 %v596_v17, %v595_v6  ;;  %v1593_v38 = vpack.c.bf16 %v1582_v33, %v1581_v29 }
 0xe05   :  { %v2128_v58 = vpop.eup %2127  ;;  %v1463_v11 = vmul.f32 %v2077_v5, %v1458_v3  ;;  %v599_v3 = vld [vmem:[#allocation14 + $0x20] sm:$0xff]  ;;  %v1592_v43 = vpack.c.bf16 %v1580_v40, %v1579_v39 }
 0xe06   :  { %v1449_v60 = vmul.f32 %v2128_v58, %v1437_v49  ;;  %vm1455_vm3 = vweird.f32 %v2128_v58  ;;  %1515 = vmatpush.bf16.msra.mxu0 %v1501_v19  ;;  %v1531_v49 = vpack.c.bf16 %v604_v46, %v603_v45  ;;  %v612_v19 = vld [vmem:[#allocation15 + $0x8] sm:$0xff]  ;;  %v1578_v45 = vmul.f32 0.088388346, %v586_v42 }
 0xe07   :  { %vm1456_vm5 = vmor %vm1454_vm4, %vm1455_vm3  ;;  %v1468_v2 = vadd.f32 %v2078_v12, %v1463_v11  ;;  %v1549_v20 = vpack.c.bf16 %v612_v19, %v611_v18  ;;  %v2506_v18 = vmov 0  }
 0xe08   :  { %v1450_v61 = vmul.f32 %v2128_v58, %v1449_v60  ;;  %1559 = vmatpush.bf16.msra.mxu2 %v1554_v44  ;;  %1538 = vmatpush.bf16.msrb.mxu1 %v1531_v49  ;;  %v602_v60 = vld [vmem:[#allocation14 + $0x38] sm:$0xff]  ;;  %v1577_v44 = vmul.f32 0.088388346, %v585_v41 }
 0xe09   :  { %v1530_v54 = vpack.c.bf16 %v602_v60, %v601_v59  ;;  %v581_v60 = vld [vmem:[%s3208_s12 + $0x10] sm:$0xff]  ;;  %2066 = vset.pattern.permute.xlu0 %v2506_v18  ;;  %2067 = vset.pattern.permute.xlu1 %v2506_v18 }
 0xe0a   :  { %v1451_v53 = vmul.f32 0.5, %v1450_v61  ;;  %1516 = vmatpush.bf16.msra.mxu0 %v1500_v22  ;;  %v617_v61 = vld [vmem:[#allocation15 + $0x30] sm:$0xff]  ;;  %v1591_v47 = vpack.c.bf16 %v1578_v45, %v1577_v44  ;;  %2068 = vset.pattern.permute.xlu2 %v2506_v18 }
 0xe0b   :  { %v594_v22 = vld [vmem:[%s3208_s12 + $0x78] sm:$0xff] }
 0xe0c   :  { %v1452_v1 = vsub.f32 1.5, %v1451_v53  ;;  %1560 = vmatpush.bf16.msra.mxu2 %v1553_v50  ;;  %v618_v53 = vld [vmem:[#allocation15 + $0x38] sm:$0xff]  ;;  %1539 = vmatpush.bf16.msrb.mxu1 %v1530_v54  ;;  %v1573_v54 = vmul.f32 0.088388346, %v581_v60  ;;  %v643_v18 = vld [vmem:[#allocation17 + $0x70] sm:$0xff] }
 0xe0e   :  { %v1453_v7 = vmul.f32 %v2128_v58, %v1452_v1  ;;  %v1552_v1 = vpack.c.bf16 %v618_v53, %v617_v61  ;;  %v582_v61 = vld [vmem:[%s3208_s12 + $0x18] sm:$0xff] }
 0xe0f   :  { %v1574_v53 = vmul.f32 0.088388346, %v582_v61 }
 0xe10   :  { %v1457_v8 = vsel %vm1456_vm5, %v2128_v58, %v1453_v7  ;;  %1561 = vmatpush.bf16.msra.mxu2 %v1552_v1  ;;  %v615_v7 = vld [vmem:[#allocation15 + $0x20] sm:$0xff] }
 0xe11   :  { %v1459_v10 = vmul.f32 %v1457_v8, %v3049_v9  ;;  %v562_v9 = vld [vmem:[#allocation12] sm:$0xff]  ;;  %v1589_v1 = vpack.c.bf16 %v1574_v53, %v1573_v54 }
 0xe12   :  { %v1499_v24 = vpack.c.bf16 %v563_v23, %v562_v9  ;;  %v591_v9 = vld [vmem:[%s3208_s12 + $0x60] sm:$0xff]  ;;  %v1585_v23 = vmul.f32 0.088388346, %v593_v21 }
 0xe13   :  { %v1464_v13 = vmul.f32 %v2077_v5, %v1459_v10  ;;  %v600_v5 = vld [vmem:[#allocation14 + $0x28] sm:$0xff]  ;;  %v1583_v26 = vmul.f32 0.088388346, %v591_v9 }
 0xe14   :  { %1517 = vmatpush.bf16.msra.mxu0 %v1499_v24  ;;  %v1529_v8 = vpack.c.bf16 %v600_v5, %v599_v3  ;;  %v616_v10 = vld [vmem:[#allocation15 + $0x28] sm:$0xff]  ;;  %v1586_v24 = vmul.f32 0.088388346, %v594_v22  ;;  %v579_v3 = vld [vmem:[%s3208_s12] sm:$0xff] }
 0xe15   :  { %v1469_v14 = vadd.f32 %v2078_v12, %v1464_v13  ;;  %v1551_v11 = vpack.c.bf16 %v616_v10, %v615_v7  ;;  %v597_v12 = vld [vmem:[#allocation14 + $0x10] sm:$0xff]  ;;  %v598_v13 = vld [vmem:[#allocation14 + $0x18] sm:$0xff]  ;;  %v1594_v32 = vpack.c.bf16 %v1584_v27, %v1583_v26  ;;  %v1571_v5 = vmul.f32 0.088388346, %v579_v3 }
 0xe16   :  { %1540 = vmatpush.bf16.msrb.mxu1 %v1529_v8  ;;  %v1595_v28 = vpack.c.bf16 %v1586_v24, %v1585_v23 }
 0xe17   :  { %v1470_v15 = vpack.c.bf16 %v1469_v14, %v1468_v2  ;;  %1562 = vmatpush.bf16.msra.mxu2 %v1551_v11  ;;  %v613_v2 = vld [vmem:[#allocation15 + $0x10] sm:$0xff]  ;;  %v1528_v14 = vpack.c.bf16 %v598_v13, %v597_v12 }
 0xe18   :  { %1596 = vmatpush.bf16.msrb.mxu3 %v1595_v28 }
 0xe19   :  { %1490 = vmatmul.bf16.vlgmr.msra.gmra.mxu3 %v1470_v15  ;;  %v614_v15 = vld [vmem:[#allocation15 + $0x18] sm:$0xff] }
 0xe1a   :  { %v1550_v16 = vpack.c.bf16 %v614_v15, %v613_v2  ;;  %1541 = vmatpush.bf16.msrb.mxu1 %v1528_v14 }
 0xe1c   :  { %1563 = vmatpush.bf16.msra.mxu2 %v1550_v16  ;;  %1597 = vmatpush.bf16.msrb.mxu3 %v1594_v32 }
 0xe1e   :  { %1542 = vmatpush.bf16.msrb.mxu1 %v1527_v4 }
 0xe20   :  { %1564 = vmatpush.bf16.msra.mxu2 %v1549_v20  ;;  %1598 = vmatpush.bf16.msrb.mxu3 %v1593_v38 }
 0xe24   :  { %1599 = vmatpush.bf16.msrb.mxu3 %v1592_v43 }
 0xe28   :  { %1600 = vmatpush.bf16.msrb.mxu3 %v1591_v47 }
 0xe9c   :  { %v1491_v51 = vpop.f32.mrf.mxu3 }
 0xe9d   :  { %v1492_v52 = vadd.f32 %v2079_v35, %v1491_v51 }
 0xe9f   :  { %v1496_v56 = vmax.f32 %v1492_v52, 0.0 }
 0xea4   :  { %v1493_v55 = vpop.f32.mrf.mxu3 }
 0xea5   :  { %v1494_v37 = vadd.f32 %v2079_v35, %v1493_v55 }
 0xea7   :  { %v1497_v57 = vmax.f32 %v1494_v37, 0.0  ;;  %v583_v37 = vld [vmem:[%s3208_s12 + $0x20] sm:$0xff] }
 0xea9   :  { %v1498_v58 = vpack.c.bf16 %v1497_v57, %v1496_v56  ;;  %v584_v56 = vld [vmem:[%s3208_s12 + $0x28] sm:$0xff]  ;;  %v1575_v57 = vmul.f32 0.088388346, %v583_v37 }
 0xeab   :  { %1518 = vmatmul.bf16.vlgmr.msra.gmra.mxu0 %v1498_v58  ;;  %v1576_v58 = vmul.f32 0.088388346, %v584_v56 }
 0xead   :  { %v1590_v59 = vpack.c.bf16 %v1576_v58, %v1575_v57 }
 0xeaf   :  { %1601 = vmatpush.bf16.msrb.mxu3 %v1590_v59 }
 0xeb3   :  { %1602 = vmatpush.bf16.msrb.mxu3 %v1589_v1 }
 0xf28   :  { %v1519_v46 = vpop.f32.mrf.mxu0 }
 0xf29   :  { %v1520_v49 = vadd.f32 %v2080_v48, %v1519_v46 }
 0xf2b   :  { %v1524_v35 = vadd.f32 %v1520_v49, %v3035_v62  ;;  %v580_v62 = vld [vmem:[%s3208_s12 + $0x8] sm:$0xff] }
 0xf30   :  { %v1521_v50 = vpop.f32.mrf.mxu0 }
 0xf31   :  { %v1522_v51 = vadd.f32 %v2080_v48, %v1521_v50 }
 0xf33   :  { %v1525_v52 = vadd.f32 %v1522_v51, %v3038_v0  ;;  %v1572_v0 = vmul.f32 0.088388346, %v580_v62 }
 0xf35   :  { %v1526_v55 = vpack.c.bf16 %v1525_v52, %v1524_v35  ;;  %v1588_v7 = vpack.c.bf16 %v1572_v0, %v1571_v5 }
 0xf37   :  { %1543 = vmatmul.bf16.vlgmr.msrb.gmra.mxu1 %v1526_v55  ;;  %1565 = vmatmul.bf16.vlgmr.msra.gmra.mxu2 %v1526_v55 }
 0xf38   :  { %1603 = vmatpush.bf16.msrb.mxu3 %v1588_v7 }
 0xfb4   :  { %v1544_v8 = vpop.f32.mrf.mxu1 }
 0xfba   :  { %v1566_v51 = vpop.f32.mrf.mxu2 }
 0xfbc   :  { %v1546_v10 = vpop.f32.mrf.mxu1 }
 0xfbd   :  { %v1587_v11 = vpack.c.bf16 %v1546_v10, %v1544_v8 }
 0xfbf   :  { %1604 = vmatmul.bf16.vlgmr.msrb.gmra.mxu3 %v1587_v11 }
 0xfc2   :  { %v1568_v56 = vpop.f32.mrf.mxu2 }
0x1042   :  { %v1605_v12 = vpop.f32.mrf.mxu3 }
0x1043   :  { %v1611_v13 = vsel %vm1610_vm6, %v1605_v12, -inf }
0x1044   :  { %v1612_v2 = vrot.slane %v1611_v13, 4 }
0x1046   :  { %v1613_v14 = vmax.f32 %v1611_v13, %v1612_v2 }
0x1048   :  { %v1614_v15 = vrot.slane %v1613_v14, 2 }
0x104a   :  { %v1615_v16 = vmax.f32 %v1613_v14, %v1614_v15  ;;  %v1607_v6 = vpop.f32.mrf.mxu3 }
0x104b   :  { %v1618_v17 = vsel %vm1610_vm6, %v1607_v6, -inf }
0x104c   :  { %v1616_v4 = vrot.slane %v1615_v16, 1  ;;  %v1619_v19 = vrot.slane %v1618_v17, 4 }
0x104e   :  { %v1617_v20 = vmax.f32 %v1615_v16, %v1616_v4  ;;  %v1620_v21 = vmax.f32 %v1618_v17, %v1619_v19  ;;  %v644_v4 = vld [vmem:[#allocation17 + $0x78] sm:$0xff] }
0x104f   :  { %v1736_v19 = vpack.c.bf16 %v644_v4, %v643_v18 }
0x1050   :  { %v1625_v22 = vsub.f32 %v1605_v12, %v1617_v20  ;;  %v1621_v9 = vrot.slane %v1620_v21, 2  ;;  %v641_v20 = vld [vmem:[#allocation17 + $0x60] sm:$0xff] }
0x1051   :  { %1748 = vmatpush.bf16.msrb.mxu0 %v1736_v19 }
0x1052   :  { %v1627_v23 = vmul.f32 1.442695, %v1625_v22  ;;  %v1622_v24 = vmax.f32 %v1620_v21, %v1621_v9  ;;  %v642_v21 = vld [vmem:[#allocation17 + $0x68] sm:$0xff]  ;;  %v639_v9 = vld [vmem:[#allocation17 + $0x50] sm:$0xff] }
0x1053   :  { %v1735_v22 = vpack.c.bf16 %v642_v21, %v641_v20 }
0x1054   :  { %2129 = vpow2.f32 %v1627_v23  ;;  %v1623_v25 = vrot.slane %v1622_v24, 1  ;;  %v640_v23 = vld [vmem:[#allocation17 + $0x58] sm:$0xff] }
0x1055   :  { %1749 = vmatpush.bf16.msrb.mxu0 %v1735_v22  ;;  %v649_v22 = vld [vmem:[#allocation18 + $0x18] sm:$0xff] }
0x1056   :  { %v1624_v26 = vmax.f32 %v1622_v24, %v1623_v25  ;;  %v1734_v24 = vpack.c.bf16 %v640_v23, %v639_v9  ;;  %v637_v25 = vld [vmem:[#allocation17 + $0x40] sm:$0xff] }
0x1057   :  { %v646_v23 = vld [vmem:[#allocation18] sm:$0xff] }
0x1058   :  { %v1626_v27 = vsub.f32 %v1607_v6, %v1624_v26  ;;  %v638_v26 = vld [vmem:[#allocation17 + $0x48] sm:$0xff] }
0x1059   :  { %1750 = vmatpush.bf16.msrb.mxu0 %v1734_v24  ;;  %v647_v24 = vld [vmem:[#allocation18 + $0x8] sm:$0xff] }
0x105a   :  { %v2130_v30 = vpop.eup %2129  ;;  %v1629_v31 = vmul.f32 1.442695, %v1626_v27  ;;  %v1733_v27 = vpack.c.bf16 %v638_v26, %v637_v25  ;;  %v1763_v25 = vpack.c.bf16 %v647_v24, %v646_v23  ;;  %v677_v26 = vld [vmem:[%s3212_s18 + $0x70] sm:$0xff]  ;;  %v718_v24 = vld [vmem:[%s2734_s24 + $0x58] sm:$0xff] }
0x105b   :  { %v1631_v28 = vsel %vm1610_vm6, %v2130_v30, 0.0  ;;  %v717_v23 = vld [vmem:[%s2734_s24 + $0x50] sm:$0xff] }
0x105c   :  { %v1632_v32 = vrot.slane %v1631_v28, 4  ;;  %2131 = vpow2.f32 %v1629_v31  ;;  %v636_v31 = vld [vmem:[#allocation17 + $0x38] sm:$0xff] }
0x105d   :  { %1751 = vmatpush.bf16.msrb.mxu0 %v1733_v27  ;;  %v678_v27 = vld [vmem:[%s3212_s18 + $0x78] sm:$0xff] }
0x105e   :  { %v1633_v29 = vadd.f32 %v1632_v32, %v1631_v28  ;;  %v633_v32 = vld [vmem:[#allocation17 + $0x20] sm:$0xff] }
0x1060   :  { %v1634_v33 = vrot.slane %v1633_v29, 2 }
0x1062   :  { %v2132_v34 = vpop.eup %2131  ;;  %v1635_v36 = vadd.f32 %v1634_v33, %v1633_v29  ;;  %v634_v29 = vld [vmem:[#allocation17 + $0x28] sm:$0xff]  ;;  %v631_v33 = vld [vmem:[#allocation17 + $0x10] sm:$0xff] }
0x1063   :  { %v1638_v38 = vsel %vm1610_vm6, %v2132_v34, 0.0 }
0x1064   :  { %v1639_v39 = vrot.slane %v1638_v38, 4  ;;  %v1636_v40 = vrot.slane %v1635_v36, 1 }
0x1066   :  { %v1640_v41 = vadd.f32 %v1639_v39, %v1638_v38  ;;  %v1637_v42 = vadd.f32 %v1636_v40, %v1635_v36  ;;  %v632_v36 = vld [vmem:[#allocation17 + $0x18] sm:$0xff]  ;;  %v629_v39 = vld [vmem:[#allocation17] sm:$0xff]  ;;  %v630_v40 = vld [vmem:[#allocation17 + $0x8] sm:$0xff] }
0x1067   :  { %v1730_v38 = vpack.c.bf16 %v632_v36, %v631_v33  ;;  %v703_v36 = vld [vmem:[#allocation20 + $0x68] sm:$0xff] }
0x1068   :  { %v1641_v43 = vrot.slane %v1640_v41, 2  ;;  %2133 = vrcp.f32 %v1637_v42 }
0x106a   :  { %v1642_v44 = vadd.f32 %v1641_v43, %v1640_v41  ;;  %v1729_v43 = vpack.c.bf16 %v630_v40, %v629_v39  ;;  %v673_v40 = vld [vmem:[%s3212_s18 + $0x50] sm:$0xff] }
0x106c   :  { %v1643_v45 = vrot.slane %v1642_v44, 1 }
0x106e   :  { %v2134_v46 = vpop.eup %2133  ;;  %v1644_v47 = vadd.f32 %v1643_v45, %v1642_v44  ;;  %v660_v45 = vld [vmem:[#allocation18 + $0x70] sm:$0xff] }
0x106f   :  { %v1647_v48 = vmul.f32 %v2134_v46, %v2130_v30  ;;  %v635_v30 = vld [vmem:[#allocation17 + $0x30] sm:$0xff]  ;;  %v661_v46 = vld [vmem:[#allocation18 + $0x78] sm:$0xff] }
0x1070   :  { %2135 = vrcp.f32 %v1644_v47  ;;  %v1732_v28 = vpack.c.bf16 %v636_v31, %v635_v30  ;;  %v658_v47 = vld [vmem:[#allocation18 + $0x60] sm:$0xff]  ;;  %v704_v30 = vld [vmem:[#allocation20 + $0x70] sm:$0xff]  ;;  %v1795_v31 = vpack.c.bf16 %v678_v27, %v677_v26 }
0x1071   :  { %1651 = vperm.xlu0 %2066, %v1647_v48   ;;  %v1770_v48 = vpack.c.bf16 %v661_v46, %v660_v45  ;;  %v671_v46 = vld [vmem:[%s3212_s18 + $0x40] sm:$0xff]  ;;  %v716_v27 = vld [vmem:[%s2734_s24 + $0x48] sm:$0xff] }
0x1072   :  { %1752 = vmatpush.bf16.msrb.mxu0 %v1732_v28  ;;  %v705_v28 = vld [vmem:[#allocation20 + $0x78] sm:$0xff]  ;;  %1799 = vmatpush.bf16.msrb.mxu2 %v1795_v31  ;;  %v713_v31 = vld [vmem:[%s2734_s24 + $0x30] sm:$0xff] }
0x1073   :  { %1774 = vmatpush.bf16.msra.mxu1 %v1770_v48  ;;  %v1873_v33 = vpack.c.bf16 %v705_v28, %v704_v30  ;;  %v698_v48 = vld [vmem:[#allocation20 + $0x40] sm:$0xff]  ;;  %v714_v28 = vld [vmem:[%s2734_s24 + $0x38] sm:$0xff] }
0x1074   :  { %v715_v26 = vld [vmem:[%s2734_s24 + $0x40] sm:$0xff] }
0x1075   :  { %v1896_v30 = vpack.c.bf16 %v716_v27, %v715_v26 }
0x1076   :  { %v2136_v49 = vpop.eup %2135 }
0x1077   :  { %v1648_v50 = vmul.f32 %v2136_v49, %v2132_v34  ;;  %v1731_v34 = vpack.c.bf16 %v634_v29, %v633_v32  ;;  %v659_v49 = vld [vmem:[#allocation18 + $0x68] sm:$0xff]  ;;  %v675_v32 = vld [vmem:[%s3212_s18 + $0x60] sm:$0xff] }
0x1078   :  { %v676_v29 = vld [vmem:[%s3212_s18 + $0x68] sm:$0xff] }
0x1079   :  { %1656 = vperm.xlu1 %2067, %v1648_v50   ;;  %1753 = vmatpush.bf16.msrb.mxu0 %v1731_v34  ;;  %v702_v34 = vld [vmem:[#allocation20 + $0x60] sm:$0xff] }
0x107a   :  { %v1872_v39 = vpack.c.bf16 %v703_v36, %v702_v34  ;;  %v2084_v36 = vld [vmem:[%s3214_s16] ss:$0 sm:$0xff] }
0x107d   :  { %1754 = vmatpush.bf16.msrb.mxu0 %v1730_v38  ;;  %v1794_v38 = vpack.c.bf16 %v676_v29, %v675_v32  ;;  %v1895_v32 = vpack.c.bf16 %v714_v28, %v713_v31  ;;  %v711_v29 = vld [vmem:[%s2734_s24 + $0x20] sm:$0xff] }
0x107f   :  { %1800 = vmatpush.bf16.msrb.mxu2 %v1794_v38 }
0x1081   :  { %1755 = vmatpush.bf16.msrb.mxu0 %v1729_v43  ;;  %v701_v43 = vld [vmem:[#allocation20 + $0x58] sm:$0xff] }
0x1085   :  { %1877 = vmatpush.bf16.msra.mxu0 %v1873_v33  ;;  %v712_v33 = vld [vmem:[%s2734_s24 + $0x28] sm:$0xff] }
0x1086   :  { %v1894_v34 = vpack.c.bf16 %v712_v33, %v711_v29 }
0x1089   :  { %1878 = vmatpush.bf16.msra.mxu0 %v1872_v39 }
0x10e3   :  { %v1652_v35 = vpop.permute.xlu0 %1651 }
0x10e4   :  { %v1659_v52 = vmul.f32 %v1652_v35, %v1566_v51  ;;  %v1769_v51 = vpack.c.bf16 %v659_v49, %v658_v47  ;;  %v672_v47 = vld [vmem:[%s3212_s18 + $0x48] sm:$0xff] }
0x10e5   :  { %v699_v49 = vld [vmem:[#allocation20 + $0x48] sm:$0xff] }
0x10e6   :  { %v1661_v55 = vrot.slane %v1659_v52, 4  ;;  %1775 = vmatpush.bf16.msra.mxu1 %v1769_v51  ;;  %v1870_v51 = vpack.c.bf16 %v699_v49, %v698_v48  ;;  %v707_v48 = vld [vmem:[%s2734_s24] sm:$0xff]  ;;  %v708_v49 = vld [vmem:[%s2734_s24 + $0x8] sm:$0xff] }
0x10e8   :  { %v1662_v37 = vadd.f32 %v1661_v55, %v1659_v52  ;;  %v656_v52 = vld [vmem:[#allocation18 + $0x50] sm:$0xff]  ;;  %v657_v55 = vld [vmem:[#allocation18 + $0x58] sm:$0xff] }
0x10ea   :  { %v1663_v58 = vrot.slane %v1662_v37, 2 }
0x10eb   :  { %v1657_v57 = vpop.permute.xlu1 %1656 }
0x10ec   :  { %v1660_v59 = vmul.f32 %v1657_v57, %v1568_v56  ;;  %v1664_v61 = vadd.f32 %v1663_v58, %v1662_v37  ;;  %v654_v57 = vld [vmem:[#allocation18 + $0x40] sm:$0xff]  ;;  %v655_v58 = vld [vmem:[#allocation18 + $0x48] sm:$0xff] }
0x10ee   :  { %v1667_v60 = vrot.slane %v1660_v59, 4  ;;  %v1665_v1 = vrot.slane %v1664_v61, 1 }
0x10f0   :  { %v1668_v54 = vadd.f32 %v1667_v60, %v1660_v59  ;;  %v1666_v5 = vadd.f32 %v1665_v1, %v1664_v61  ;;  %v1767_v60 = vpack.c.bf16 %v655_v58, %v654_v57  ;;  %v2081_v1 = vld [vmem:[%s3210_s30] ss:$0 sm:$0xff]  ;;  %v668_v58 = vld [vmem:[%s3212_s18 + $0x28] sm:$0xff] }
0x10f1   :  { %v667_v57 = vld [vmem:[%s3212_s18 + $0x20] sm:$0xff] }
0x10f2   :  { %v1669_v53 = vrot.slane %v1668_v54, 2 }
0x10f4   :  { %v1670_v3 = vadd.f32 %v1669_v53, %v1668_v54  ;;  %v652_v54 = vld [vmem:[#allocation18 + $0x30] sm:$0xff]  ;;  %v653_v53 = vld [vmem:[#allocation18 + $0x38] sm:$0xff] }
0x10f6   :  { %v1671_v62 = vrot.slane %v1670_v3, 1 }
0x10f8   :  { %v1672_v0 = vadd.f32 %v1671_v62, %v1670_v3 }
0x10fa   :  { %v1676_v7 = vsel %vm1675_vm7, %v1672_v0, %v1666_v5 }
0x10fb   :  { %v1679_v8 = vsel %vm1678_vm8, %v1676_v7, 0.0  ;;  %v1766_v7 = vpack.c.bf16 %v653_v53, %v652_v54  ;;  %v665_v53 = vld [vmem:[%s3212_s18 + $0x10] sm:$0xff] }
0x10fc   :  { %1680 = vadd.xlane.f32.xlu2 %v1679_v8  ;;  %v650_v8 = vld [vmem:[#allocation18 + $0x20] sm:$0xff] }
0x116f   :  { %v1681_v10 = vpop.xlane.xlu2 %1680 }
0x1170   :  { %v1682_v11 = vmul.f32 %v1681_v10, %v2871_v63  ;;  %v651_v10 = vld [vmem:[#allocation18 + $0x28] sm:$0xff] }
0x1172   :  { %v1684_v12 = vrot.slane %v1682_v11, 1  ;;  %v3085_v13 = vsub.f32 %v1666_v5, %v1682_v11 }
0x1174   :  { %v3087_v2 = vsub.f32 %v1672_v0, %v1684_v12  ;;  %v1689_v15 = vmul.f32 %v3085_v13, %v3085_v13  ;;  %v2082_v0 = vld [vmem:[%s3211_s4] ss:$0 sm:$0xff] }
0x1176   :  { %v1690_v14 = vmul.f32 %v3087_v2, %v3087_v2 }
0x1178   :  { %v1693_v16 = vrot.slane %v1690_v14, 7 }
0x117a   :  { %v1694_v6 = vsel %vm1675_vm7, %v1693_v16, %v1689_v15  ;;  %v1765_v16 = vpack.c.bf16 %v651_v10, %v650_v8 }
0x117b   :  { %v1696_v17 = vsel %vm1678_vm8, %v1694_v6, 0.0 }
0x117c   :  { %1697 = vadd.xlane.f32.xlu2 %v1696_v17 }
0x11ef   :  { %v1698_v41 = vpop.xlane.xlu2 %1697 }
0x11f0   :  { %v1699_v42 = vmul.f32 %v1698_v41, %v2871_v63  ;;  %v1768_v63 = vpack.c.bf16 %v657_v55, %v656_v52  ;;  %v674_v41 = vld [vmem:[%s3212_s18 + $0x58] sm:$0xff] }
0x11f1   :  { %v670_v52 = vld [vmem:[%s3212_s18 + $0x38] sm:$0xff] }
0x11f2   :  { %v1700_v44 = vadd.f32 1e-05, %v1699_v42  ;;  %1776 = vmatpush.bf16.msra.mxu1 %v1768_v63  ;;  %v700_v42 = vld [vmem:[#allocation20 + $0x50] sm:$0xff] }
0x11f3   :  { %v1871_v45 = vpack.c.bf16 %v701_v43, %v700_v42  ;;  %v696_v55 = vld [vmem:[#allocation20 + $0x30] sm:$0xff] }
0x11f4   :  { %2137 = vrsqrt.f32 %v1700_v44  ;;  %vm1707_vm10 = vweird.f32 %v1700_v44  ;;  %v709_v42 = vld [vmem:[%s2734_s24 + $0x10] sm:$0xff]  ;;  %v710_v43 = vld [vmem:[%s2734_s24 + $0x18] sm:$0xff] }
0x11f5   :  { %1879 = vmatpush.bf16.msra.mxu0 %v1871_v45  ;;  %v687_v45 = vld [vmem:[%s3215_s26 + $0x30] sm:$0xff] }
0x11f6   :  { %1777 = vmatpush.bf16.msra.mxu1 %v1767_v60  ;;  %v695_v60 = vld [vmem:[#allocation20 + $0x28] sm:$0xff] }
0x11f9   :  { %1880 = vmatpush.bf16.msra.mxu0 %v1870_v51  ;;  %v685_v51 = vld [vmem:[%s3215_s26 + $0x20] sm:$0xff] }
0x11fa   :  { %v2138_v50 = vpop.eup %2137  ;;  %1778 = vmatpush.bf16.msra.mxu1 %v1766_v7 }
0x11fb   :  { %v1702_v35 = vmul.f32 %v2138_v50, %v1700_v44  ;;  %vm1708_vm9 = vweird.f32 %v2138_v50  ;;  %v1793_v44 = vpack.c.bf16 %v674_v41, %v673_v40 }
0x11fc   :  { %vm1709_vm11 = vmor %vm1707_vm10, %vm1708_vm9 }
0x11fd   :  { %v1703_v37 = vmul.f32 %v2138_v50, %v1702_v35  ;;  %1801 = vmatpush.bf16.msrb.mxu2 %v1793_v44  ;;  %v669_v35 = vld [vmem:[%s3212_s18 + $0x30] sm:$0xff]  ;;  %v1893_v44 = vpack.c.bf16 %v710_v43, %v709_v42 }
0x11fe   :  { %1779 = vmatpush.bf16.msra.mxu1 %v1765_v16  ;;  %v1791_v63 = vpack.c.bf16 %v670_v52, %v669_v35  ;;  %v664_v16 = vld [vmem:[%s3212_s18 + $0x8] sm:$0xff] }
0x11ff   :  { %v1704_v56 = vmul.f32 0.5, %v1703_v37  ;;  %v697_v37 = vld [vmem:[#allocation20 + $0x38] sm:$0xff]  ;;  %v686_v35 = vld [vmem:[%s3215_s26 + $0x28] sm:$0xff] }
0x1200   :  { %v1825_v52 = vpack.c.bf16 %v686_v35, %v685_v51 }
0x1201   :  { %v1705_v59 = vsub.f32 1.5, %v1704_v56  ;;  %v1869_v56 = vpack.c.bf16 %v697_v37, %v696_v55  ;;  %v683_v55 = vld [vmem:[%s3215_s26 + $0x10] sm:$0xff]  ;;  %v684_v37 = vld [vmem:[%s3215_s26 + $0x18] sm:$0xff] }
0x1203   :  { %v1706_v61 = vmul.f32 %v2138_v50, %v1705_v59  ;;  %v694_v59 = vld [vmem:[#allocation20 + $0x20] sm:$0xff]  ;;  %1881 = vmatpush.bf16.msra.mxu0 %v1869_v56 }
0x1204   :  { %v1868_v54 = vpack.c.bf16 %v695_v60, %v694_v59  ;;  %v681_v56 = vld [vmem:[%s3215_s26] sm:$0xff] }
0x1205   :  { %v1710_v3 = vsel %vm1709_vm11, %v2138_v50, %v1706_v61  ;;  %v1792_v50 = vpack.c.bf16 %v672_v47, %v671_v46  ;;  %v1790_v61 = vpack.c.bf16 %v668_v58, %v667_v57  ;;  %v688_v46 = vld [vmem:[%s3215_s26 + $0x38] sm:$0xff]  ;;  %v682_v57 = vld [vmem:[%s3215_s26 + $0x8] sm:$0xff]  ;;  %v2086_v59 = vld [vmem:[%s3216_s25] ss:$0 sm:$0xff] }
0x1206   :  { %v1712_v62 = vrot.slane %v1710_v3, 1  ;;  %v1715_v5 = vmul.f32 %v1710_v3, %v3085_v13  ;;  %v2083_v3 = vld [vmem:[%s3213_s22] ss:$0 sm:$0xff]  ;;  %v1826_v47 = vpack.c.bf16 %v688_v46, %v687_v45  ;;  %v1823_v58 = vpack.c.bf16 %v682_v57, %v681_v56 }
0x1207   :  { %1802 = vmatpush.bf16.msrb.mxu2 %v1792_v50  ;;  %1882 = vmatpush.bf16.msra.mxu0 %v1868_v54  ;;  %v1892_v50 = vpack.c.bf16 %v708_v49, %v707_v48 }
0x1208   :  { %v1716_v11 = vmul.f32 %v1712_v62, %v3087_v2  ;;  %v1720_v12 = vmul.f32 %v2081_v1, %v1715_v5  ;;  %v648_v2 = vld [vmem:[#allocation18 + $0x10] sm:$0xff]  ;;  %v693_v5 = vld [vmem:[#allocation20 + $0x18] sm:$0xff]  ;;  %1838 = vmatpush.bf16.msra.mxu3 %v1826_v47 }
0x1209   :  { %v1764_v9 = vpack.c.bf16 %v649_v22, %v648_v2  ;;  %v692_v62 = vld [vmem:[#allocation20 + $0x10] sm:$0xff]  ;;  %v719_v2 = vld [vmem:[%s2734_s24 + $0x60] sm:$0xff]  ;;  %v720_v22 = vld [vmem:[%s2734_s24 + $0x68] sm:$0xff] }
0x120a   :  { %v1721_v14 = vmul.f32 %v2081_v1, %v1716_v11  ;;  %v1725_v15 = vadd.f32 %v2082_v0, %v1720_v12  ;;  %v666_v1 = vld [vmem:[%s3212_s18 + $0x18] sm:$0xff]  ;;  %v1867_v8 = vpack.c.bf16 %v693_v5, %v692_v62 }
0x120b   :  { %1780 = vmatpush.bf16.msra.mxu1 %v1764_v9  ;;  %1803 = vmatpush.bf16.msrb.mxu2 %v1791_v63  ;;  %v1898_v9 = vpack.c.bf16 %v720_v22, %v719_v2  ;;  %v1824_v63 = vpack.c.bf16 %v684_v37, %v683_v55  ;;  %v2088_v22 = vld [vmem:[%s2739_s8] ss:$0 sm:$0xff]  ;;  %s1930_s8 = sshll.u32 %s2749_s23, 4  ;;  %s1931_s8 = int_to_ptr.hbm [resolvable:$true] %s1930_s8 }
0x120c   :  { %v1726_v6 = vadd.f32 %v2082_v0, %v1721_v14  ;;  %v1727_v17 = vpack.c.bf16 %v1725_v15, %v1725_v15  ;;  %v1789_v0 = vpack.c.bf16 %v666_v1, %v665_v53  ;;  %1883 = vmatpush.bf16.msra.mxu0 %v1867_v8  ;;  %v663_v15 = vld [vmem:[%s3212_s18] sm:$0xff]  ;;  %1839 = vmatpush.bf16.msra.mxu3 %v1825_v52  ;;  %s2419_s13 = sshra.s32 %s1931_s8, 4  ;;  %s2420_s13 = int_to_ptr.hbm [resolvable:$true] %s2419_s13 }
0x120d   :  { %v2087_v53 = vld [vmem:[%s3217_s21] ss:$0 sm:$0xff]  ;;  %s2421_s2 = scalar_lea.hbm %s2420_s13, 2  ;;  %p2424_p0 = scmp.lt.s32.totalorder %s2420_s13, %s2749_s23 }
0x120e   :  { %v1728_v18 = vpack.c.bf16 %v1726_v6, %v1726_v6  ;;  %v1742_v13 = vunpack.c.l.b16 %v1727_v17  ;;  %v690_v6 = vld [vmem:[#allocation20] sm:$0xff]  ;;  %v1788_v17 = vpack.c.bf16 %v664_v16, %v663_v15  ;;  %p2422_p13 = scmp.ne.s32.totalorder %s2420_s13, %s2421_s2 }
0x120f   :  { %1781 = vmatpush.bf16.msra.mxu1 %v1763_v25  ;;  %1804 = vmatpush.bf16.msrb.mxu2 %v1790_v61  ;;  %v1897_v25 = vpack.c.bf16 %v718_v24, %v717_v23 }
0x1210   :  { %v1743_v4 = vunpack.c.l.b16 %v1728_v18  ;;  %v691_v18 = vld [vmem:[#allocation20 + $0x8] sm:$0xff]  ;;  %1840 = vmatpush.bf16.msra.mxu3 %v1824_v63 }
0x1212   :  { %v1744_v19 = vrot.slane %v1743_v4, 7  ;;  %v1866_v4 = vpack.c.bf16 %v691_v18, %v690_v6 }
0x1213   :  { %1805 = vmatpush.bf16.msrb.mxu2 %v1789_v0 }
0x1214   :  { %v1745_v20 = vsel %vm1675_vm7, %v1744_v19, %v1742_v13  ;;  %1884 = vmatpush.bf16.msra.mxu0 %v1866_v4  ;;  %v2085_v13 = vld [vmem:[#allocation2] ss:$0 sm:$0xff]  ;;  %v721_v19 = vld [vmem:[%s2734_s24 + $0x70] sm:$0xff]  ;;  %1841 = vmatpush.bf16.msra.mxu3 %v1823_v58 }
0x1215   :  { %v1746_v21 = vpack.c.b16 %v1745_v20, %v1745_v20  ;;  %v722_v20 = vld [vmem:[%s2734_s24 + $0x78] sm:$0xff]  ;;  %1817 = vperm.xlu2 %2068, %v2085_v13   ;;  %s3218_s24 = sld [smem:[#allocation56_spill]] }
0x1217   :  { %1756 = vmatmul.bf16.vlgmr.msrb.gmra.mxu0 %v1746_v21  ;;  %1806 = vmatpush.bf16.msrb.mxu2 %v1788_v17  ;;  %v1899_v21 = vpack.c.bf16 %v722_v20, %v721_v19 }
0x1219   :  { %1903 = vmatpush.bf16.msrb.mxu1 %v1899_v21 }
0x121b   :  { %v2089_v6 = vld [vmem:[%s3218_s24] ss:$0 sm:$0xff] }
0x121d   :  { %1904 = vmatpush.bf16.msrb.mxu1 %v1898_v9 }
0x1221   :  { %1905 = vmatpush.bf16.msrb.mxu1 %v1897_v25 }
0x1225   :  { %1906 = vmatpush.bf16.msrb.mxu1 %v1896_v30  ;;  %v2090_v30 = vld [vmem:[%s2744_s15] ss:$0 sm:$0xff]  ;;  %s2423_s15 = scalar_lea.hbm %s2749_s23, 2 }
0x1226   :  { %p2425_p1 = scmp.lt.s32.totalorder %s2423_s15, %s2421_s2 }
0x1228   :  { %p2426_p2 = por %p2425_p1, %p2424_p0 }
0x1229   :  { %1907 = vmatpush.bf16.msrb.mxu1 %v1895_v32 }
0x122a   :  { %p2427_p3 = pnand %p2426_p2, %p2422_p13 }
0x122d   :  { %1908 = vmatpush.bf16.msrb.mxu1 %v1894_v34 }
0x1231   :  { %1909 = vmatpush.bf16.msrb.mxu1 %v1893_v44 }
0x1235   :  { %1910 = vmatpush.bf16.msrb.mxu1 %v1892_v50 }
0x126f   :  { %v1818_v0 = vpop.permute.xlu2 %1817 }
0x1294   :  { %v1757_v7 = vpop.f32.mrf.mxu0 }
0x1295   :  { %v1758_v10 = vadd.f32 %v2083_v3, %v1757_v7 }
0x1297   :  { %v1761_v11 = vmax.f32 %v1758_v10, 0.0 }
0x1299   :  { %v1762_v12 = vpack.c.bf16 %v1761_v11, %v1761_v11 }
0x129b   :  { %1782 = vmatmul.bf16.vlgmr.msra.gmra.mxu1 %v1762_v12 }
0x129c   :  { %v1759_v14 = vpop.f32.mrf.mxu0 }
0x1318   :  { %v1783_v38 = vpop.f32.mrf.mxu1 }
0x1319   :  { %v1784_v39 = vadd.f32 %v2084_v36, %v1783_v38 }
0x131b   :  { %v1787_v40 = vpack.c.bf16 %v1784_v39, %v1784_v39 }
0x131d   :  { %1807 = vmatmul.bf16.vlgmr.msrb.gmra.mxu2 %v1787_v40  ;;  %1885 = vmatmul.bf16.vlgmr.msra.gmra.mxu0 %v1787_v40 }
0x1320   :  { %v1785_v41 = vpop.f32.mrf.mxu1 }
0x139a   :  { %v1886_v60 = vpop.f32.mrf.mxu0 }
0x139b   :  { %v1887_v61 = vadd.f32 %v2086_v59, %v1886_v60 }
0x139d   :  { %v1890_v54 = vmax.f32 %v1887_v61, 0.0 }
0x139f   :  { %v1891_v1 = vpack.c.bf16 %v1890_v54, %v1890_v54 }
0x13a0   :  { %v1808_v3 = vpop.f32.mrf.mxu2 }
0x13a1   :  { %v1809_v62 = vadd.f32 %v2087_v53, %v1808_v3  ;;  %1911 = vmatmul.bf16.vlgmr.msrb.gmra.mxu1 %v1891_v1 }
0x13a2   :  { %v1888_v5 = vpop.f32.mrf.mxu0 }
0x13a3   :  { %v1813_v7 = vmin.f32 %v1809_v62, 0.0  ;;  %v1812_v8 = vmax.f32 %v1809_v62, 0.0 }
0x13a5   :  { %v1820_v10 = vmul.f32 %v1818_v0, %v1813_v7 }
0x13a7   :  { %v1821_v11 = vadd.f32 %v1820_v10, %v1812_v8 }
0x13a8   :  { %v1810_v12 = vpop.f32.mrf.mxu2 }
0x13a9   :  { %v1822_v14 = vpack.c.bf16 %v1821_v11, %v1821_v11 }
0x13ab   :  { %2001 = vmatmul.msk.bf16.vlgmr.msra.gmra.mxu3 %vm1830_vm12, %v1822_v14 }
0x141e   :  { %v1912_v15 = vpop.f32.mrf.mxu1 }
0x141f   :  { %v1913_v26 = vadd.f32 %v2088_v22, %v1912_v15 }
0x1421   :  { %v1916_v29 = vmax.f32 %v1913_v26, 0.0 }
0x1426   :  { %v1914_v16 = vpop.f32.mrf.mxu1 }
0x142e   :  { %v1843_v17 = vpop.f32.mrf.mxu3 }
0x142f   :  { %v1844_v18 = vadd.f32 %v2089_v6, %v1843_v17 }
0x1431   :  { %v2002_v4 = vmul.f32 -1.442695, %v1844_v18 }
0x1433   :  { %2139 = vpow2.f32 %v2002_v4 }
0x1436   :  { %v1845_v13 = vpop.f32.mrf.mxu3 }
0x1439   :  { %v2140_v19 = vpop.eup %2139 }
0x143a   :  { %v1850_v20 = vadd.f32 1.0, %v2140_v19 }
0x143c   :  { %2141 = vrcp.f32 %v1850_v20  ;;  %v1862_v23 = vand.u32 2147483648, %v1850_v20  ;;  %v1860_v25 = vand.u32 2147483647, %v1850_v20  ;;  %vm1856_vm14 = vweird.f32 %v1850_v20 }
0x143e   :  { %v1863_v31 = vor.u32 1.1754944e-38, %v1862_v23  ;;  %vm1861_vm0 = vcmp.eq.f32.partialorder %v1860_v25, 8.507059e+37 }
0x1442   :  { %v2142_v21 = vpop.eup %2141 }
0x1443   :  { %v1852_v2 = vmul.f32 %v2142_v21, %v1850_v20  ;;  %vm1857_vm13 = vweird.f32 %v2142_v21 }
0x1444   :  { %vm1858_vm15 = vmor %vm1856_vm14, %vm1857_vm13 }
0x1445   :  { %v1853_v9 = vsub.f32 1.0, %v1852_v2 }
0x1447   :  { %v1854_v24 = vmul.f32 %v2142_v21, %v1853_v9 }
0x1449   :  { %v1855_v27 = vadd.f32 %v2142_v21, %v1854_v24 }
0x144b   :  { %v1859_v28 = vsel %vm1858_vm15, %v2142_v21, %v1855_v27 }
0x144c   :  { %v1864_v32 = vsel %vm1861_vm0, %v1863_v31, %v1859_v28 }
0x144d   :  { %v1920_v33 = vmul.f32 %v2090_v30, %v1864_v32 }
0x144f   :  { %v1921_v34 = vadd.f32 %v1920_v33, %v1916_v29 }
0x1451   :  { %1922 = vst [vmem:[#allocation21] sm:$0x3] %v1921_v34 }
0x1452   :  { %2430 = shalt.err (!%p2427_p3)
}
0x1453   :  { %1933 = dma.vmem_to_hbm [thread:$0]  %s1929_s9, 32, %s1931_s8, [#allocation5]  }
0x1454   :  { %2443 = dma.done.wait [#allocation5], 32  }
0x1455   :  { %2444 = vsyncadd [#allocation5], 4294967264 }
0x1456   :  { %1938 = vsyncpa [#allocation4], 1 }
0x1457   :  { %1939 = vsyncpa [#allocation7], 1 }
0x1458   :  { %1940 = vsyncpa [#allocation10], 1 }
0x1459   :  { %1941 = vsyncpa [#allocation13], 1 }
0x145a   :  { %1942 = vsyncpa [#allocation16], 1 }
0x145b   :  { %1943 = vsyncpa [#allocation19], 1 }
0x145c   :  { %1944 = vsyncpa [#allocation5], 1 }

</bundles_post_ra>
